<compile_context>
chip_gen: v6e
topology: v6e:2x2x1
jax: 0.10.0
libtpu: 0.0.40
codegen_flags: <defaults>
</compile_context>

<pallas_src>
import jax
import jax.numpy as jnp
from jax.experimental import pallas as pl
from jax.experimental.pallas import tpu as pltpu

VOCAB = 30
EMBED_DIM = 64
VOCAB_PAD = 32              # pad vocab 30 -> 32 (clean sublane multiple)
MAX_TILE_TOKENS = 16384     # tokens per grid step at large N
SPLIT_TOKENS = 4096         # above this, use >=2 tiles (v7x 2-TC / megacore)
SMALL_N_FALLBACK = 1024     # below this, plain XLA gather is faster


def _round_up(x, m):
    return ((x + m - 1) // m) * m


def default_pack_factor():
    """Tokens packed per output row: 8 (K=256) on v6e/v7x, 4 (K=128) on v5e."""
    try:
        kind = jax.devices()[0].device_kind.lower()
    except Exception:
        return 8
    if "v5e" in kind or "v5 lite" in kind or "v5lite" in kind:
        return 4
    return 8


def pack_embedding_table(table, pack):
    """Build the block-diagonal (pack*VOCAB_PAD, pack*D) table ONCE per model."""
    v, d = table.shape
    table_pad = jnp.pad(table, ((0, VOCAB_PAD - v), (0, 0)))
    zeros = jnp.zeros_like(table_pad)
    rows = []
    for j in range(pack):
        row = [zeros] * pack
        row[j] = table_pad
        rows.append(jnp.concatenate(row, axis=1))
    return jnp.concatenate(rows, axis=0)


def _embedding_kernel(idx_ref, table_ref, out_ref):
    """One grid step: gather embeddings for R*PACK tokens.

    idx_ref:   (R, PACK)            int32, block offset j*VOCAB_PAD pre-added
    table_ref: (PACK*Vp, PACK*D)    block-diagonal packed embedding table
    out_ref:   (R, PACK*D)          row r = [emb(tok r*P) | ... | emb(tok r*P+P-1)]
    """
    idx = idx_ref[...]                                   # (R, P) int32
    r, p = idx.shape
    k = table_ref.shape[0]                               # P * VOCAB_PAD

    # One-hot over the packed-vocab axis: token j of a row hits columns
    # [j*Vp, (j+1)*Vp) (offsets pre-added on the host).  Pure VPU compares/ORs.
    col_ids = jax.lax.broadcasted_iota(jnp.int32, (r, k), 1)
    hit = col_ids == idx[:, 0:1]
    for j in range(1, p):
        hit = jnp.logical_or(hit, col_ids == idx[:, j:j + 1])
    onehot = hit.astype(table_ref.dtype)

    # (R, P*Vp) x (P*Vp, P*D) -> (R, P*D) lane-dense output on the MXU.
    # HIGHEST precision keeps the f32 table rows exact (one-hot is 0/1).
    out_ref[...] = jnp.dot(
        onehot, table_ref[...],
        preferred_element_type=jnp.float32,
        precision=jax.lax.Precision.HIGHEST,
    ).astype(out_ref.dtype)


def type_embedding_lookup(types, table, table_packed=None, *, pack=None,
                          min_pallas_tokens=SMALL_N_FALLBACK):
    """Pallas equivalent of Type.forward(types): table[types]."""
    # TODO(synk): nn.Embedding raises on out-of-range indices; here indices
    # outside [0, 30) silently produce an all-zero embedding row.
    if pack is None:
        pack = default_pack_factor()
    v, d = table.shape
    orig_shape = types.shape

    flat = types.reshape(-1).astype(jnp.int32)
    n = flat.shape[0]
    if n == 0:
        return jnp.zeros(orig_shape + (d,), table.dtype)

    # Small-N fast path: pallas launch + tile padding dominate; XLA gather wins.
    if n < min_pallas_tokens:
        return jnp.take(table, flat, axis=0).reshape(orig_shape + (d,))

    if table_packed is None:
        table_packed = pack_embedding_table(table, pack)
    assert table_packed.shape == (pack * VOCAB_PAD, pack * d)

    # --- tile selection ------------------------------------------------------
    align = pack * 8                      # tile_rows must be a sublane multiple
    n_ceil = _round_up(n, align)
    if n_ceil > SPLIT_TOKENS:
        # Balanced tiles, at least 2 so both v7x TensorCores get work.
        n_tiles_target = max(2, -(-n_ceil // MAX_TILE_TOKENS))
        tile_tokens = _round_up(-(-n_ceil // n_tiles_target), align)
    else:
        tile_tokens = n_ceil
    n_pad = _round_up(n_ceil, tile_tokens)
    tile_rows = tile_tokens // pack
    n_tiles = n_pad // tile_tokens

    # Indices, PACK per row (tokens on sublanes), per-block offsets pre-added.
    flat_padded = jnp.pad(flat, (0, n_pad - n))          # pad tokens -> index 0
    offsets = jnp.arange(pack, dtype=jnp.int32) * VOCAB_PAD
    idx2 = flat_padded.reshape(n_pad // pack, pack) + offsets

    # --- VMEM budget / cost hint ----------------------------------------------
    itemsize = jnp.dtype(table_packed.dtype).itemsize
    out_tile_bytes = tile_rows * (pack * d) * itemsize
    idx_tile_bytes = tile_rows * 128 * 4                 # int32, lane-padded to 128
    table_bytes = table_packed.size * itemsize
    vmem_limit = 2 * (out_tile_bytes + idx_tile_bytes + table_bytes) + (8 << 20)

    cost = pl.CostEstimate(
        flops=2 * n_pad * pack * VOCAB_PAD * d,
        transcendentals=0,
        bytes_accessed=n_pad * 4 + n_pad * d * itemsize + table_bytes,
    )

    out = pl.pallas_call(
        _embedding_kernel,
        out_shape=jax.ShapeDtypeStruct((n_pad // pack, pack * d), table.dtype),
        grid_spec=pltpu.PrefetchScalarGridSpec(
            num_scalar_prefetch=0,
            grid=(n_tiles,),
            in_specs=[
                pl.BlockSpec((tile_rows, pack), lambda i: (i, 0)),
                pl.BlockSpec((pack * VOCAB_PAD, pack * d), lambda i: (0, 0)),
            ],
            out_specs=pl.BlockSpec((tile_rows, pack * d), lambda i: (i, 0)),
        ),
        compiler_params=pltpu.CompilerParams(
            dimension_semantics=("parallel",),
            vmem_limit_bytes=int(vmem_limit),
        ),
        cost_estimate=cost,
    )(idx2, table_packed)

    # Row r holds [emb(P*r) | ... | emb(P*r+P-1)] -> (n_pad, D), slice, reshape.
    return out.reshape(n_pad, d)[:n].reshape(orig_shape + (d,))


if __name__ == "__main__":
    key = jax.random.PRNGKey(0)
    k_tbl, k1, k2, k3 = jax.random.split(key, 4)

    # Deterministic "learned" embedding table (nn.Embedding init ~ N(0,1)).
    table = jax.random.normal(k_tbl, (VOCAB, EMBED_DIM), dtype=jnp.float32)
    pack = default_pack_factor()
    table_packed = pack_embedding_table(table, pack)     # built once, reused

    # (1) Small batch of span-type indices, forced through the Pallas path.
    types = jax.random.randint(k1, (2, 8), 0, VOCAB, dtype=jnp.int32)
    out = jax.block_until_ready(
        type_embedding_lookup(types, table, table_packed, pack=pack,
                              min_pallas_tokens=0))
    assert out.shape == (2, 8, EMBED_DIM), out.shape
    assert jnp.allclose(out, table[types], atol=1e-6), "mismatch (small)"

    # (2) Odd token count (exercises the pack-P-per-row padding + slice path).
    types2 = jax.random.randint(k2, (3, 5), 0, VOCAB, dtype=jnp.int32)
    out2 = jax.block_until_ready(
        type_embedding_lookup(types2, table, table_packed, pack=pack,
                              min_pallas_tokens=0))
    assert out2.shape == (3, 5, EMBED_DIM), out2.shape
    assert jnp.allclose(out2, table[types2], atol=1e-6), "mismatch (odd)"

    # (3) Larger input -> >=2 grid tiles (exercises the parallel token grid).
    types3 = jax.random.randint(k3, (8, 640), 0, VOCAB, dtype=jnp.int32)
    out3 = jax.block_until_ready(
        type_embedding_lookup(types3, table, table_packed, pack=pack))
    assert out3.shape == (8, 640, EMBED_DIM), out3.shape
    assert jnp.allclose(out3, table[types3], atol=1e-6), "mismatch (tiled)"

    # (4) Default small-N fast path (plain XLA gather fallback).
    out4 = jax.block_until_ready(
        type_embedding_lookup(types, table, table_packed, pack=pack))
    assert jnp.allclose(out4, table[types], atol=0), "mismatch (fast path)"

    print("KERNEL_OK")
</pallas_src>

<mosaic_0001>
module attributes {stable_mosaic.version = 11 : i64} {
  func.func @_embedding_kernel(%arg0: i32, %arg1: memref<8x8xi32, #tpu.memory_space<vmem>>, %arg2: memref<256x512xf32, #tpu.memory_space<vmem>>, %arg3: memref<8x512xf32, #tpu.memory_space<vmem>>) attributes {dimension_semantics = [#tpu.dimension_semantics<parallel>], iteration_bounds = array<i64: 1>, scalar_prefetch = 0 : i64, scratch_operands = 0 : i64, tpu.core_type = #tpu.core_type<tc>, window_params = [{transform_indices = @transform_0, window_bounds = array<i64: 8, 8>}, {pipeline_mode = #tpu.pipeline_mode<synchronous>, transform_indices = @transform_1, window_bounds = array<i64: 256, 512>}, {transform_indices = @transform_2, window_bounds = array<i64: 8, 512>}]} {
    %c0 = arith.constant 0 : index
    %c0_0 = arith.constant 0 : index
    %0 = vector.load %arg1[%c0, %c0_0] : memref<8x8xi32, #tpu.memory_space<vmem>>, vector<8x8xi32>
    %1 = tpu.iota {dimensions = array<i32: 1>} : vector<8x256xi32>
    %2 = vector.extract_strided_slice %0 {offsets = [0, 0], sizes = [8, 1], strides = [1, 1]} : vector<8x8xi32> to vector<8x1xi32>
    %3 = vector.broadcast %2 : vector<8x1xi32> to vector<8x256xi32>
    %4 = arith.cmpi eq, %1, %3 : vector<8x256xi32>
    %5 = vector.extract_strided_slice %0 {offsets = [0, 1], sizes = [8, 1], strides = [1, 1]} : vector<8x8xi32> to vector<8x1xi32>
    %6 = vector.broadcast %5 : vector<8x1xi32> to vector<8x256xi32>
    %7 = arith.cmpi eq, %1, %6 : vector<8x256xi32>
    %8 = arith.ori %4, %7 : vector<8x256xi1>
    %9 = vector.extract_strided_slice %0 {offsets = [0, 2], sizes = [8, 1], strides = [1, 1]} : vector<8x8xi32> to vector<8x1xi32>
    %10 = vector.broadcast %9 : vector<8x1xi32> to vector<8x256xi32>
    %11 = arith.cmpi eq, %1, %10 : vector<8x256xi32>
    %12 = arith.ori %8, %11 : vector<8x256xi1>
    %13 = vector.extract_strided_slice %0 {offsets = [0, 3], sizes = [8, 1], strides = [1, 1]} : vector<8x8xi32> to vector<8x1xi32>
    %14 = vector.broadcast %13 : vector<8x1xi32> to vector<8x256xi32>
    %15 = arith.cmpi eq, %1, %14 : vector<8x256xi32>
    %16 = arith.ori %12, %15 : vector<8x256xi1>
    %17 = vector.extract_strided_slice %0 {offsets = [0, 4], sizes = [8, 1], strides = [1, 1]} : vector<8x8xi32> to vector<8x1xi32>
    %18 = vector.broadcast %17 : vector<8x1xi32> to vector<8x256xi32>
    %19 = arith.cmpi eq, %1, %18 : vector<8x256xi32>
    %20 = arith.ori %16, %19 : vector<8x256xi1>
    %21 = vector.extract_strided_slice %0 {offsets = [0, 5], sizes = [8, 1], strides = [1, 1]} : vector<8x8xi32> to vector<8x1xi32>
    %22 = vector.broadcast %21 : vector<8x1xi32> to vector<8x256xi32>
    %23 = arith.cmpi eq, %1, %22 : vector<8x256xi32>
    %24 = arith.ori %20, %23 : vector<8x256xi1>
    %25 = vector.extract_strided_slice %0 {offsets = [0, 6], sizes = [8, 1], strides = [1, 1]} : vector<8x8xi32> to vector<8x1xi32>
    %26 = vector.broadcast %25 : vector<8x1xi32> to vector<8x256xi32>
    %27 = arith.cmpi eq, %1, %26 : vector<8x256xi32>
    %28 = arith.ori %24, %27 : vector<8x256xi1>
    %29 = vector.extract_strided_slice %0 {offsets = [0, 7], sizes = [8, 1], strides = [1, 1]} : vector<8x8xi32> to vector<8x1xi32>
    %30 = vector.broadcast %29 : vector<8x1xi32> to vector<8x256xi32>
    %31 = arith.cmpi eq, %1, %30 : vector<8x256xi32>
    %32 = arith.ori %28, %31 : vector<8x256xi1>
    %33 = arith.extui %32 : vector<8x256xi1> to vector<8x256xi32>
    %34 = arith.sitofp %33 : vector<8x256xi32> to vector<8x256xf32>
    %c0_1 = arith.constant 0 : index
    %c0_2 = arith.constant 0 : index
    %35 = vector.load %arg2[%c0_1, %c0_2] : memref<256x512xf32, #tpu.memory_space<vmem>>, vector<256x512xf32>
    %cst = arith.constant dense<0.000000e+00> : vector<8x512xf32>
    %36 = tpu.matmul %34, %35, %cst {dimension_numbers = #tpu.dot_dimension_numbers<[1], [0], [0], [1], [0, 0, 1, 1], [], []>, precision = #tpu.contract_precision<fp32>} : vector<8x256xf32>, vector<256x512xf32>, vector<8x512xf32> -> vector<8x512xf32>
    %c0_3 = arith.constant 0 : index
    %c0_4 = arith.constant 0 : index
    %37 = vector.load %arg3[%c0_3, %c0_4] : memref<8x512xf32, #tpu.memory_space<vmem>>, vector<8x512xf32>
    tpu.vector_store %arg3[%c0_3, %c0_4], %36 {strides = array<i32>} : memref<8x512xf32, #tpu.memory_space<vmem>>, vector<8x512xf32>,
    return
  }
  func.func @transform_0(%arg0: i32) -> (i32, i32) {
    %c0_i32 = arith.constant 0 : i32
    %c0_i32_0 = arith.constant 0 : i32
    return %arg0, %c0_i32 : i32, i32
  }
  func.func @transform_1(%arg0: i32) -> (i32, i32) {
    %c0_i32 = arith.constant 0 : i32
    %c0_i32_0 = arith.constant 0 : i32
    %c0_i32_1 = arith.constant 0 : i32
    return %c0_i32, %c0_i32_0 : i32, i32
  }
  func.func @transform_2(%arg0: i32) -> (i32, i32) {
    %c0_i32 = arith.constant 0 : i32
    %c0_i32_0 = arith.constant 0 : i32
    return %arg0, %c0_i32 : i32, i32
  }
}

</mosaic_0001>

<bundles_post_ra>
// kernel: tpu_custom_call.1
= control target key start
LH: loop header
LB: loop body
LE: loop exit
PB: predicated region body
PF: predicated region fallthrough
CT: control target
= control target key end

     0   :  { %7 = vsyncpa [#allocation3], 0  ;;  %s5135_s0 = inlined_call_operand.hbm [shape: s32[8,8], index: 0, kind: input, shape index: {}]   ;;  %s5136_s1 = inlined_call_operand.hbm [shape: f32[256,512], index: 1, kind: input, shape index: {}]   ;;  %s5137_s2 = inlined_call_operand.hbm [shape: f32[8,512], index: 2, kind: output, shape index: {}]  }
   0x1   :  { %8 = vsyncpa [#allocation6], 0 }
   0x2   :  { %9 = vsyncpa [#allocation4], 0  ;;  %s2907_s9 = smov [#allocation2]   ;;  %s2908_s11 = smov [#allocation5]  }
   0x3   :  { %s16_s10 = sshll.u32 %s2907_s9, 4  ;;  %s25_s12 = sshll.u32 %s2908_s11, 4  ;;  %s17_s10 = int_to_ptr.vmem [resolvable:$true] %s16_s10  ;;  %s26_s12 = int_to_ptr.vmem [resolvable:$true] %s25_s12 }
   0x4   :  { %s2849_s13 = scalar_lea.vmem %s17_s10, 128  ;;  %p2854_p1 = scmp.lt.s32.totalorder %s17_s10, %s17_s10 }
   0x5   :  { %p2850_p0 = scmp.ne.s32.totalorder %s17_s10, %s2849_s13  ;;  %p2855_p2 = scmp.lt.s32.totalorder %s2849_s13, %s2849_s13 }
   0x7   :  { %p2856_p3 = por %p2855_p2, %p2854_p1 }
   0x9   :  { %p2857_p4 = pnand %p2856_p3, %p2850_p0 }
   0xb   :  { %2860 = shalt.err (!%p2857_p4)
}
   0xc   :  { %19 = dma.hbm_to_vmem [thread:$0]  %s5135_s0, 128, %s17_s10, [#allocation3]  }
   0xd   :  { %s2869_s16 = scalar_lea.vmem %s26_s12, 16384  ;;  %p2874_p6 = scmp.lt.s32.totalorder %s26_s12, %s26_s12 }
   0xe   :  { %p2870_p5 = scmp.ne.s32.totalorder %s26_s12, %s2869_s16  ;;  %p2875_p7 = scmp.lt.s32.totalorder %s2869_s16, %s2869_s16 }
  0x10   :  { %p2876_p8 = por %p2875_p7, %p2874_p6 }
  0x12   :  { %p2877_p9 = pnand %p2876_p8, %p2870_p5 }
  0x14   :  { %2880 = shalt.err (!%p2877_p9)
}
  0x15   :  { %s2909_s17 = smov 512   ;;  %s2910_s18 = smov 32  }
  0x16   :  { %31 = dma.hbm_to_vmem [thread:$0]  %s5136_s1, 16384, %s26_s12, [#allocation6], %s2909_s17, %s2909_s17, %s2910_s18  }
  0x17   :  { %2901 = dma.done.wait [#allocation3], 128  }
  0x18   :  { %2902 = vsyncadd [#allocation3], 4294967168 }
  0x19   :  { %2903 = dma.done.wait [#allocation6], 16384  }
  0x1a   :  { %2904 = vsyncadd [#allocation6], 4294950912  ;;  %v2911_v0 = vmov 2   ;;  %v2912_v1 = vmov 0   ;;  %v2942_v2 = vld [vmem:[#allocation2] sm:$0xff]  ;;  %v161_v3 = vld [vmem:[#allocation5 + $0x1e8] sm:$0xff] }
  0x1b   :  { %2834 = vset.pattern.permute.xlu1 %v2911_v0  ;;  %2832 = vset.pattern.permute.xlu0 %v2912_v1  ;;  %v160_v4 = vld [vmem:[#allocation5 + $0x1e0] sm:$0xff]  ;;  %v2946_v5 = vand.u32 4294901760, %v161_v3  ;;  %v157_v7 = vld [vmem:[#allocation5 + $0x1c8] sm:$0xff]  ;;  %v2913_v24 = vmov 3   ;;  %v2914_v25 = vmov 1   ;;  %v2915_v51 = vmov 4  }
  0x1c   :  { %55 = vperm.xlu1 %2834, %v2942_v2   ;;  %43 = vperm.xlu0 %2832, %v2942_v2   ;;  %v2948_v6 = vand.u32 4294901760, %v160_v4  ;;  %v156_v8 = vld [vmem:[#allocation5 + $0x1c0] sm:$0xff]  ;;  %v153_v9 = vld [vmem:[#allocation5 + $0x1a8] sm:$0xff]  ;;  %v2950_v10 = vand.u32 4294901760, %v157_v7  ;;  %v2916_v52 = vmov 5   ;;  %s2920_s0 = smov [#allocation7]  }
  0x1d   :  { %v2952_v11 = vand.u32 4294901760, %v156_v8  ;;  %v2954_v12 = vand.u32 4294901760, %v153_v9  ;;  %v152_v13 = vld [vmem:[#allocation5 + $0x1a0] sm:$0xff]  ;;  %v149_v14 = vld [vmem:[#allocation5 + $0x188] sm:$0xff]  ;;  %v2957_v16 = vsub.f32 %v161_v3, %v2946_v5  ;;  %229 = vmatprep.subr.mxu0 %v2946_v5  ;;  %s2806_s1 = sshll.u32 %s2920_s0, 4  ;;  %s2807_s1 = int_to_ptr.vmem [resolvable:$true] %s2806_s1 }
  0x1e   :  { %v148_v15 = vld [vmem:[#allocation5 + $0x180] sm:$0xff]  ;;  %v2960_v17 = vsub.f32 %v160_v4, %v2948_v6  ;;  %v2962_v18 = vand.u32 4294901760, %v152_v13  ;;  %v2964_v19 = vand.u32 4294901760, %v149_v14  ;;  %v2968_v20 = vsub.f32 %v157_v7, %v2950_v10  ;;  %231 = vmatpush1.msra.mxu0 %v2948_v6  ;;  %v145_v42 = vld [vmem:[#allocation5 + $0x168] sm:$0xff]  ;;  %s2881_s21 = scalar_lea.vmem %s2807_s1, 512  ;;  %p2886_p11 = scmp.lt.s32.totalorder %s2807_s1, %s2807_s1 }
  0x1f   :  { %v2971_v21 = vsub.f32 %v156_v8, %v2952_v11  ;;  %v2974_v22 = vsub.f32 %v153_v9, %v2954_v12  ;;  %v2976_v23 = vand.u32 4294901760, %v148_v15  ;;  %v5155_v26 = vand.u32 4294901760, %v2957_v16  ;;  %233 = vmatprep.subr.mxu0 %v2950_v10  ;;  %v144_v43 = vld [vmem:[#allocation5 + $0x160] sm:$0xff]  ;;  %v141_v48 = vld [vmem:[#allocation5 + $0x148] sm:$0xff]  ;;  %p2882_p10 = scmp.ne.s32.totalorder %s2807_s1, %s2881_s21  ;;  %p2887_p12 = scmp.lt.s32.totalorder %s2881_s21, %s2881_s21 }
  0x20   :  { %2835 = vset.pattern.permute.xlu1 %v2913_v24  ;;  %2833 = vset.pattern.permute.xlu0 %v2914_v25  ;;  %v5154_v27 = vand.u32 4294901760, %v2960_v17  ;;  %v2982_v28 = vsub.f32 %v152_v13, %v2962_v18  ;;  %v2985_v29 = vsub.f32 %v149_v14, %v2964_v19  ;;  %v5153_v30 = vand.u32 4294901760, %v2968_v20  ;;  %v140_v49 = vld [vmem:[#allocation5 + $0x140] sm:$0xff]  ;;  %v137_v50 = vld [vmem:[#allocation5 + $0x128] sm:$0xff] }
  0x21   :  { %62 = vperm.xlu1 %2835, %v2942_v2   ;;  %48 = vperm.xlu0 %2833, %v2942_v2   ;;  %v5150_v31 = vand.u32 4294901760, %v2971_v21  ;;  %v5149_v32 = vand.u32 4294901760, %v2974_v22  ;;  %v2993_v33 = vsub.f32 %v148_v15, %v2976_v23  ;;  %v376_v34 = vsub.f32 %v2957_v16, %v5155_v26  ;;  %v136_v57 = vld [vmem:[#allocation5 + $0x120] sm:$0xff]  ;;  %v133_v58 = vld [vmem:[#allocation5 + $0x108] sm:$0xff]  ;;  %p2888_p13 = por %p2887_p12, %p2886_p11 }
  0x22   :  { %v382_v35 = vsub.f32 %v2960_v17, %v5154_v27  ;;  %v5148_v36 = vand.u32 4294901760, %v2982_v28  ;;  %v5146_v37 = vand.u32 4294901760, %v2985_v29  ;;  %v388_v38 = vsub.f32 %v2968_v20, %v5153_v30  ;;  %235 = vmatpush1.msra.mxu0 %v2952_v11  ;;  %v132_v63 = vld [vmem:[#allocation5 + $0x100] sm:$0xff]  ;;  %v113_v30 = vld [vmem:[#allocation5 + $0x68] sm:$0xff] }
  0x23   :  { %v394_v39 = vsub.f32 %v2971_v21, %v5150_v31  ;;  %v400_v40 = vsub.f32 %v2974_v22, %v5149_v32  ;;  %v5145_v41 = vand.u32 4294901760, %v2993_v33  ;;  %v377_v44 = vand.u32 4294901760, %v376_v34  ;;  %237 = vmatprep.subr.mxu0 %v2954_v12  ;;  %v112_v27 = vld [vmem:[#allocation5 + $0x60] sm:$0xff]  ;;  %p2889_p0 = pnand %p2888_p13, %p2882_p10 }
  0x24   :  { %v383_v45 = vand.u32 4294901760, %v382_v35  ;;  %v406_v46 = vsub.f32 %v2982_v28, %v5148_v36  ;;  %v412_v47 = vsub.f32 %v2985_v29, %v5146_v37  ;;  %v389_v53 = vand.u32 4294901760, %v388_v38  ;;  %239 = vmatpush1.msra.mxu0 %v2962_v18 }
  0x25   :  { %2836 = vset.pattern.permute.xlu1 %v2915_v51  ;;  %2837 = vset.pattern.permute.xlu0 %v2916_v52  ;;  %v395_v54 = vand.u32 4294901760, %v394_v39  ;;  %v401_v55 = vand.u32 4294901760, %v400_v40  ;;  %v418_v56 = vsub.f32 %v2993_v33, %v5145_v41  ;;  %v3027_v61 = vand.u32 4294901760, %v145_v42 }
  0x26   :  { %69 = vperm.xlu1 %2836, %v2942_v2   ;;  %76 = vperm.xlu0 %2837, %v2942_v2   ;;  %v407_v59 = vand.u32 4294901760, %v406_v46  ;;  %v413_v60 = vand.u32 4294901760, %v412_v47  ;;  %v3029_v62 = vand.u32 4294901760, %v144_v43  ;;  %v3031_v1 = vand.u32 4294901760, %v141_v48 }
  0x27   :  { %378 = vmatprep.subr.mxu1 %v377_v44  ;;  %v419_v0 = vand.u32 4294901760, %v418_v56  ;;  %v3033_v3 = vand.u32 4294901760, %v140_v49  ;;  %v3035_v4 = vand.u32 4294901760, %v137_v50  ;;  %v3039_v7 = vsub.f32 %v145_v42, %v3027_v61  ;;  %241 = vmatprep.subr.mxu0 %v2964_v19 }
  0x28   :  { %384 = vmatpush1.msra.mxu1 %v383_v45  ;;  %v3042_v8 = vsub.f32 %v144_v43, %v3029_v62  ;;  %v3044_v9 = vand.u32 4294901760, %v136_v57  ;;  %v3047_v13 = vand.u32 4294901760, %v133_v58  ;;  %v3050_v14 = vsub.f32 %v141_v48, %v3031_v1  ;;  %243 = vmatpush1.msra.mxu0 %v2976_v23 }
  0x29   :  { %390 = vmatprep.subr.mxu1 %v389_v53  ;;  %v3053_v15 = vsub.f32 %v140_v49, %v3033_v3  ;;  %v3056_v24 = vsub.f32 %v137_v50, %v3035_v4  ;;  %v3059_v25 = vand.u32 4294901760, %v132_v63  ;;  %v2917_v34 = vmov 6   ;;  %245 = vmatprep.subr.mxu0 %v3027_v61 }
  0x2a   :  { %2838 = vset.pattern.permute.xlu1 %v2917_v34  ;;  %396 = vmatpush1.msra.mxu1 %v395_v54  ;;  %v5144_v35 = vand.u32 4294901760, %v3039_v7  ;;  %v5143_v38 = vand.u32 4294901760, %v3042_v8  ;;  %v3064_v39 = vsub.f32 %v136_v57, %v3044_v9  ;;  %v3067_v40 = vsub.f32 %v133_v58, %v3047_v13  ;;  %v129_v54 = vld [vmem:[#allocation5 + $0xe8] sm:$0xff] }
  0x2b   :  { %83 = vperm.xlu1 %2838, %v2942_v2   ;;  %402 = vmatprep.subr.mxu1 %v401_v55  ;;  %v5141_v42 = vand.u32 4294901760, %v3050_v14  ;;  %v5139_v43 = vand.u32 4294901760, %v3053_v15  ;;  %v5138_v44 = vand.u32 4294901760, %v3056_v24  ;;  %v3074_v45 = vsub.f32 %v132_v63, %v3059_v25  ;;  %v128_v55 = vld [vmem:[#allocation5 + $0xe0] sm:$0xff]  ;;  %v121_v34 = vld [vmem:[#allocation5 + $0xa8] sm:$0xff] }
  0x2c   :  { %408 = vmatpush1.msra.mxu1 %v407_v59  ;;  %v424_v46 = vsub.f32 %v3039_v7, %v5144_v35  ;;  %v430_v47 = vsub.f32 %v3042_v8, %v5143_v38  ;;  %v5140_v48 = vand.u32 4294901760, %v3064_v39  ;;  %v5142_v49 = vand.u32 4294901760, %v3067_v40  ;;  %247 = vmatpush1.msra.mxu0 %v3029_v62  ;;  %v124_v63 = vld [vmem:[#allocation5 + $0xc0] sm:$0xff] }
  0x2d   :  { %5547 = vst [vmem:[#allocation11_spill] sm:$0xff] %v3074_v45  ;;  %414 = vmatprep.subr.mxu1 %v413_v60  ;;  %v436_v50 = vsub.f32 %v3050_v14, %v5141_v42  ;;  %v442_v51 = vsub.f32 %v3053_v15, %v5139_v43  ;;  %v448_v52 = vsub.f32 %v3056_v24, %v5138_v44  ;;  %v5147_v53 = vand.u32 4294901760, %v3074_v45  ;;  %v125_v60 = vld [vmem:[#allocation5 + $0xc8] sm:$0xff] }
  0x2e   :  { %420 = vmatpush1.msra.mxu1 %v419_v0  ;;  %v425_v56 = vand.u32 4294901760, %v424_v46  ;;  %v431_v57 = vand.u32 4294901760, %v430_v47  ;;  %v454_v58 = vsub.f32 %v3064_v39, %v5140_v48  ;;  %v460_v59 = vsub.f32 %v3067_v40, %v5142_v49  ;;  %249 = vmatprep.subr.mxu0 %v3031_v1  ;;  %v120_v48 = vld [vmem:[#allocation5 + $0xa0] sm:$0xff]  ;;  %v117_v42 = vld [vmem:[#allocation5 + $0x88] sm:$0xff] }
  0x2f   :  { %v5158_v44 = vmov 7   ;;  %v437_v43 = vand.u32 4294901760, %v436_v50  ;;  %v443_v0 = vand.u32 4294901760, %v442_v51  ;;  %v449_v46 = vand.u32 4294901760, %v448_v52  ;;  %251 = vmatpush1.msra.mxu0 %v3033_v3  ;;  %v116_v50 = vld [vmem:[#allocation5 + $0x80] sm:$0xff] }
  0x30   :  { %2839 = vset.pattern.permute.xlu1 %v5158_v44  ;;  %v466_v47 = vsub.f32 %v3074_v45, %v5147_v53  ;;  %426 = vmatprep.subr.mxu1 %v425_v56  ;;  %v455_v49 = vand.u32 4294901760, %v454_v58  ;;  %v461_v38 = vand.u32 4294901760, %v460_v59  ;;  %v3109_v35 = vand.u32 4294901760, %v129_v54  ;;  %v109_v44 = vld [vmem:[#allocation5 + $0x48] sm:$0xff] }
  0x31   :  { %90 = vperm.xlu1 %2839, %v2942_v2   ;;  %v3111_v41 = vand.u32 4294901760, %v128_v55  ;;  %432 = vmatpush1.msra.mxu1 %v431_v57  ;;  %v3113_v52 = vand.u32 4294901760, %v125_v60  ;;  %v3115_v37 = vand.u32 4294901760, %v124_v63  ;;  %v3118_v53 = vand.u32 4294901760, %v121_v34 }
  0x32   :  { %v467_v51 = vand.u32 4294901760, %v466_v47  ;;  %253 = vmatprep.subr.mxu0 %v3035_v4  ;;  %438 = vmatprep.subr.mxu1 %v437_v43  ;;  %v3121_v2 = vsub.f32 %v129_v54, %v3109_v35  ;;  %v3127_v58 = vand.u32 4294901760, %v120_v48  ;;  %v3129_v57 = vand.u32 4294901760, %v117_v42 }
  0x33   :  { %v3124_v56 = vsub.f32 %v128_v55, %v3111_v41  ;;  %255 = vmatpush1.msra.mxu0 %v3044_v9  ;;  %444 = vmatpush1.msra.mxu1 %v443_v0  ;;  %v3132_v59 = vsub.f32 %v125_v60, %v3113_v52  ;;  %v3135_v47 = vsub.f32 %v124_v63, %v3115_v37  ;;  %v3141_v54 = vand.u32 4294901760, %v116_v50 }
  0x34   :  { %5548 = vst [vmem:[#allocation12_spill] sm:$0xff] %v3121_v2  ;;  %5550 = vst [vmem:[#allocation14_spill] sm:$0xff] %v3129_v57  ;;  %v3138_v43 = vsub.f32 %v121_v34, %v3118_v53  ;;  %257 = vmatprep.subr.mxu0 %v3047_v13  ;;  %450 = vmatprep.subr.mxu1 %v449_v46  ;;  %v5151_v55 = vand.u32 4294901760, %v3121_v2  ;;  %v3146_v0 = vsub.f32 %v120_v48, %v3127_v58 }
  0x35   :  { %5549 = vst [vmem:[#allocation13_spill] sm:$0xff] %v3124_v56  ;;  %5551 = vst [vmem:[#allocation15_spill] sm:$0xff] %v3132_v59  ;;  %v5152_v36 = vand.u32 4294901760, %v3124_v56  ;;  %v3149_v60 = vsub.f32 %v117_v42, %v3129_v57  ;;  %259 = vmatpush1.msra.mxu0 %v3059_v25  ;;  %456 = vmatpush1.msra.mxu1 %v455_v49  ;;  %v5156_v63 = vand.u32 4294901760, %v3132_v59  ;;  %v5157_v34 = vand.u32 4294901760, %v3135_v47 }
  0x36   :  { %5552 = vst [vmem:[#allocation16_spill] sm:$0xff] %v3135_v47  ;;  %5553 = vst [vmem:[#allocation17_spill] sm:$0xff] %v3138_v43  ;;  %v5159_v32 = vand.u32 4294901760, %v3138_v43  ;;  %v3156_v46 = vsub.f32 %v116_v50, %v3141_v54  ;;  %261 = vmatprep.subr.mxu0 %v3109_v35  ;;  %462 = vmatprep.subr.mxu1 %v461_v38  ;;  %v472_v42 = vsub.f32 %v3121_v2, %v5151_v55 }
  0x37   :  { %5554 = vst [vmem:[#allocation18_spill] sm:$0xff] %v3141_v54  ;;  %5555 = vst [vmem:[#allocation19_spill] sm:$0xff] %v3146_v0  ;;  %v478_v48 = vsub.f32 %v3124_v56, %v5152_v36  ;;  %v5168_v49 = vand.u32 4294901760, %v3146_v0  ;;  %v5171_v31 = vand.u32 4294901760, %v3149_v60  ;;  %263 = vmatpush1.msra.mxu0 %v3111_v41  ;;  %468 = vmatpush1.msra.mxu1 %v467_v51  ;;  %v5558_v36 = vmov 7  }
  0x38   :  { %5556 = vst [vmem:[#allocation20_spill] sm:$0xff] %v3149_v60  ;;  %5557 = vst [vmem:[#allocation21_spill] sm:$0xff] %v3156_v46  ;;  %v484_v50 = vsub.f32 %v3132_v59, %v5156_v63  ;;  %v490_v38 = vsub.f32 %v3135_v47, %v5157_v34  ;;  %v496_v55 = vsub.f32 %v3138_v43, %v5159_v32  ;;  %265 = vmatprep.subr.mxu0 %v3113_v52  ;;  %v108_v32 = vld [vmem:[#allocation5 + $0x40] sm:$0xff]  ;;  %v105_v43 = vld [vmem:[#allocation5 + $0x28] sm:$0xff] }
  0x39   :  { %v473_v26 = vand.u32 4294901760, %v472_v42  ;;  %v479_v51 = vand.u32 4294901760, %v478_v48  ;;  %v502_v63 = vsub.f32 %v3146_v0, %v5168_v49  ;;  %v508_v34 = vsub.f32 %v3149_v60, %v5171_v31  ;;  %267 = vmatpush1.msra.mxu0 %v3115_v37  ;;  %2840 = vset.pattern.permute.xlu0 %v5558_v36  ;;  %v104_v49 = vld [vmem:[#allocation5 + $0x20] sm:$0xff]  ;;  %v101_v0 = vld [vmem:[#allocation5 + $0x8] sm:$0xff] }
  0x3a   :  { %v485_v47 = vand.u32 4294901760, %v484_v50  ;;  %v491_v59 = vand.u32 4294901760, %v490_v38  ;;  %v497_v56 = vand.u32 4294901760, %v496_v55  ;;  %v5559_v42 = vand.u32 4294901760, %v3156_v46  ;;  %269 = vmatprep.subr.mxu0 %v3118_v53  ;;  %v100_v36 = vld [vmem:[#allocation5] sm:$0xff] }
  0x3b   :  { %474 = vmatprep.subr.mxu1 %v473_v26  ;;  %v503_v31 = vand.u32 4294901760, %v502_v63  ;;  %v509_v60 = vand.u32 4294901760, %v508_v34  ;;  %v3191_v2 = vand.u32 4294901760, %v113_v30  ;;  %v3193_v45 = vand.u32 4294901760, %v112_v27  ;;  %271 = vmatpush1.msra.mxu0 %v3127_v58 }
  0x3c   :  { %v514_v48 = vsub.f32 %v3156_v46, %v5559_v42  ;;  %480 = vmatpush1.msra.mxu1 %v479_v51  ;;  %v3196_v50 = vand.u32 4294901760, %v109_v44  ;;  %v3198_v38 = vand.u32 4294901760, %v108_v32  ;;  %v3200_v42 = vand.u32 4294901760, %v105_v43  ;;  %273 = vmatprep.subr.mxu0 %v3129_v57 }
  0x3d   :  { %5560 = vst [vmem:[#allocation22_spill] sm:$0xff] %v3191_v2  ;;  %5561 = vst [vmem:[#allocation23_spill] sm:$0xff] %v3193_v45  ;;  %486 = vmatprep.subr.mxu1 %v485_v47  ;;  %v3204_v26 = vsub.f32 %v113_v30, %v3191_v2  ;;  %v3207_v63 = vsub.f32 %v112_v27, %v3193_v45  ;;  %v3209_v34 = vand.u32 4294901760, %v104_v49  ;;  %v3211_v46 = vand.u32 4294901760, %v101_v0 }
  0x3e   :  { %v515_v55 = vand.u32 4294901760, %v514_v48  ;;  %5562 = vst [vmem:[#allocation24_spill] sm:$0xff] %v3196_v50  ;;  %5563 = vst [vmem:[#allocation25_spill] sm:$0xff] %v3198_v38  ;;  %275 = vmatpush1.msra.mxu0 %v3141_v54  ;;  %492 = vmatpush1.msra.mxu1 %v491_v59  ;;  %v3215_v51 = vsub.f32 %v109_v44, %v3196_v50  ;;  %v3218_v48 = vsub.f32 %v108_v32, %v3198_v38 }
  0x3f   :  { %5564 = vst [vmem:[#allocation26_spill] sm:$0xff] %v3200_v42  ;;  %5565 = vst [vmem:[#allocation27_spill] sm:$0xff] %v3204_v26  ;;  %v3221_v47 = vsub.f32 %v105_v43, %v3200_v42  ;;  %v3223_v30 = vand.u32 4294901760, %v100_v36  ;;  %277 = vmatprep.subr.mxu0 %v3191_v2  ;;  %498 = vmatprep.subr.mxu1 %v497_v56  ;;  %v5184_v27 = vand.u32 4294901760, %v3204_v26  ;;  %v5187_v57 = vand.u32 4294901760, %v3207_v63 }
  0x40   :  { %5566 = vst [vmem:[#allocation28_spill] sm:$0xff] %v3207_v63  ;;  %5567 = vst [vmem:[#allocation29_spill] sm:$0xff] %v3209_v34  ;;  %v3229_v59 = vsub.f32 %v104_v49, %v3209_v34  ;;  %v3232_v44 = vsub.f32 %v101_v0, %v3211_v46  ;;  %279 = vmatpush1.msra.mxu0 %v3193_v45  ;;  %504 = vmatpush1.msra.mxu1 %v503_v31  ;;  %v5192_v32 = vand.u32 4294901760, %v3215_v51  ;;  %v225_v49 = vld [vmem:[#allocation5 + $0x3e8] sm:$0xff] }
  0x41   :  { %5568 = vst [vmem:[#allocation30_spill] sm:$0xff] %v3211_v46  ;;  %5569 = vst [vmem:[#allocation31_spill] sm:$0xff] %v3215_v51  ;;  %v3239_v56 = vsub.f32 %v100_v36, %v3223_v30  ;;  %281 = vmatprep.subr.mxu0 %v3196_v50  ;;  %510 = vmatprep.subr.mxu1 %v509_v60  ;;  %v520_v0 = vsub.f32 %v3204_v26, %v5184_v27  ;;  %v5576_v60 = vand.u32 4294901760, %v3218_v48  ;;  %v220_v50 = vld [vmem:[#allocation5 + $0x3c0] sm:$0xff]  ;;  %v217_v45 = vld [vmem:[#allocation5 + $0x3a8] sm:$0xff] }
  0x42   :  { %5570 = vst [vmem:[#allocation32_spill] sm:$0xff] %v3218_v48  ;;  %5571 = vst [vmem:[#allocation33_spill] sm:$0xff] %v3221_v47  ;;  %v526_v31 = vsub.f32 %v3207_v63, %v5187_v57  ;;  %283 = vmatpush1.msra.mxu0 %v3198_v38  ;;  %516 = vmatpush1.msra.mxu1 %v515_v55  ;;  %v532_v36 = vsub.f32 %v3215_v51, %v5192_v32  ;;  %v5577_v27 = vand.u32 4294901760, %v3221_v47  ;;  %v224_v63 = vld [vmem:[#allocation5 + $0x3e0] sm:$0xff] }
  0x43   :  { %5572 = vst [vmem:[#allocation34_spill] sm:$0xff] %v3223_v30  ;;  %5573 = vst [vmem:[#allocation35_spill] sm:$0xff] %v3229_v59  ;;  %v538_v2 = vsub.f32 %v3218_v48, %v5576_v60  ;;  %285 = vmatprep.subr.mxu0 %v3200_v42  ;;  %v521_v43 = vand.u32 4294901760, %v520_v0  ;;  %v5578_v38 = vand.u32 4294901760, %v3229_v59  ;;  %v5579_v51 = vand.u32 4294901760, %v3232_v44  ;;  %v221_v48 = vld [vmem:[#allocation5 + $0x3c8] sm:$0xff] }
  0x44   :  { %5574 = vst [vmem:[#allocation36_spill] sm:$0xff] %v3232_v44  ;;  %5575 = vst [vmem:[#allocation37_spill] sm:$0xff] %v3239_v56  ;;  %v544_v26 = vsub.f32 %v3221_v47, %v5577_v27  ;;  %v527_v55 = vand.u32 4294901760, %v526_v31  ;;  %287 = vmatpush1.msra.mxu0 %v3209_v34  ;;  %v533_v27 = vand.u32 4294901760, %v532_v36  ;;  %v5580_v42 = vand.u32 4294901760, %v3239_v56  ;;  %v216_v31 = vld [vmem:[#allocation5 + $0x3a0] sm:$0xff] }
  0x45   :  { %v550_v32 = vsub.f32 %v3229_v59, %v5578_v38  ;;  %v556_v60 = vsub.f32 %v3232_v44, %v5579_v51  ;;  %v539_v57 = vand.u32 4294901760, %v538_v2  ;;  %289 = vmatprep.subr.mxu0 %v3211_v46  ;;  %v213_v38 = vld [vmem:[#allocation5 + $0x388] sm:$0xff]  ;;  %522 = vmatprep.subr.mxu1 %v521_v43  ;;  %v3273_v51 = vand.u32 4294901760, %v225_v49  ;;  %v212_v36 = vld [vmem:[#allocation5 + $0x380] sm:$0xff] }
  0x46   :  { %v545_v47 = vand.u32 4294901760, %v544_v26  ;;  %v562_v0 = vsub.f32 %v3239_v56, %v5580_v42  ;;  %v3275_v44 = vand.u32 4294901760, %v224_v63  ;;  %291 = vmatpush1.msra.mxu0 %v3223_v30  ;;  %528 = vmatpush1.msra.mxu1 %v527_v55  ;;  %v3278_v26 = vand.u32 4294901760, %v221_v48  ;;  %v196_v46 = vld [vmem:[#allocation5 + $0x300] sm:$0xff] }
  0x47   :  { %v551_v59 = vand.u32 4294901760, %v550_v32  ;;  %v557_v54 = vand.u32 4294901760, %v556_v60  ;;  %5581 = vst [vmem:[#allocation38_spill] sm:$0xff] %v3273_v51  ;;  %v3280_v34 = vand.u32 4294901760, %v220_v50  ;;  %v3282_v42 = vand.u32 4294901760, %v217_v45  ;;  %534 = vmatprep.subr.mxu1 %v533_v27  ;;  %293 = vmatprep.subr.mxu0 %v3273_v51 }
  0x48   :  { %5582 = vst [vmem:[#allocation39_spill] sm:$0xff] %v3275_v44  ;;  %v563_v2 = vand.u32 4294901760, %v562_v0  ;;  %5583 = vst [vmem:[#allocation40_spill] sm:$0xff] %v3278_v26  ;;  %v3285_v43 = vsub.f32 %v225_v49, %v3273_v51  ;;  %v3288_v32 = vsub.f32 %v224_v63, %v3275_v44  ;;  %v3290_v60 = vand.u32 4294901760, %v216_v31  ;;  %540 = vmatpush1.msra.mxu1 %v539_v57  ;;  %v197_v51 = vld [vmem:[#allocation5 + $0x308] sm:$0xff] }
  0x49   :  { %5584 = vst [vmem:[#allocation41_spill] sm:$0xff] %v3280_v34  ;;  %5585 = vst [vmem:[#allocation42_spill] sm:$0xff] %v3282_v42  ;;  %v3292_v56 = vand.u32 4294901760, %v213_v38  ;;  %v3296_v55 = vsub.f32 %v221_v48, %v3278_v26  ;;  %v3299_v0 = vsub.f32 %v220_v50, %v3280_v34  ;;  %v3302_v27 = vsub.f32 %v217_v45, %v3282_v42 }
  0x4a   :  { %5586 = vst [vmem:[#allocation43_spill] sm:$0xff] %v3285_v43  ;;  %5587 = vst [vmem:[#allocation44_spill] sm:$0xff] %v3288_v32  ;;  %v3304_v49 = vand.u32 4294901760, %v212_v36  ;;  %295 = vmatpush2.msra.mxu0 %v3275_v44  ;;  %546 = vmatprep.subr.mxu1 %v545_v47  ;;  %v5219_v63 = vand.u32 4294901760, %v3285_v43  ;;  %v5222_v30 = vand.u32 4294901760, %v3288_v32  ;;  %v3310_v57 = vsub.f32 %v216_v31, %v3290_v60 }
  0x4b   :  { %5588 = vst [vmem:[#allocation45_spill] sm:$0xff] %v3290_v60  ;;  %5589 = vst [vmem:[#allocation46_spill] sm:$0xff] %v3292_v56  ;;  %v3313_v48 = vsub.f32 %v213_v38, %v3292_v56  ;;  %297 = vmatprep.subr.mxu0 %v3278_v26  ;;  %552 = vmatpush1.msra.mxu1 %v551_v59  ;;  %v5227_v45 = vand.u32 4294901760, %v3296_v55  ;;  %v209_v38 = vld [vmem:[#allocation5 + $0x368] sm:$0xff] }
  0x4c   :  { %5590 = vst [vmem:[#allocation47_spill] sm:$0xff] %v3296_v55  ;;  %5591 = vst [vmem:[#allocation48_spill] sm:$0xff] %v3299_v0  ;;  %v3320_v47 = vsub.f32 %v212_v36, %v3304_v49  ;;  %299 = vmatpush2.msra.mxu0 %v3280_v34  ;;  %558 = vmatprep.subr.mxu1 %v557_v54  ;;  %v568_v31 = vsub.f32 %v3285_v43, %v5219_v63  ;;  %v5597_v54 = vand.u32 4294901760, %v3299_v0  ;;  %v204_v34 = vld [vmem:[#allocation5 + $0x340] sm:$0xff]  ;;  %v201_v26 = vld [vmem:[#allocation5 + $0x328] sm:$0xff] }
  0x4d   :  { %5592 = vst [vmem:[#allocation49_spill] sm:$0xff] %v3302_v27  ;;  %5593 = vst [vmem:[#allocation50_spill] sm:$0xff] %v3304_v49  ;;  %v574_v59 = vsub.f32 %v3288_v32, %v5222_v30  ;;  %301 = vmatprep.subr.mxu0 %v3282_v42  ;;  %564 = vmatpush1.msra.mxu1 %v563_v2  ;;  %v580_v36 = vsub.f32 %v3296_v55, %v5227_v45  ;;  %v5598_v63 = vand.u32 4294901760, %v3302_v27  ;;  %v208_v32 = vld [vmem:[#allocation5 + $0x360] sm:$0xff] }
  0x4e   :  { %5594 = vst [vmem:[#allocation51_spill] sm:$0xff] %v3310_v57  ;;  %5595 = vst [vmem:[#allocation52_spill] sm:$0xff] %v3313_v48  ;;  %v586_v44 = vsub.f32 %v3299_v0, %v5597_v54  ;;  %303 = vmatpush2.msra.mxu0 %v3290_v60  ;;  %v569_v50 = vand.u32 4294901760, %v568_v31  ;;  %v5599_v42 = vand.u32 4294901760, %v3310_v57  ;;  %v5600_v55 = vand.u32 4294901760, %v3313_v48  ;;  %v205_v0 = vld [vmem:[#allocation5 + $0x348] sm:$0xff] }
  0x4f   :  { %5596 = vst [vmem:[#allocation53_spill] sm:$0xff] %v3320_v47  ;;  %v592_v43 = vsub.f32 %v3302_v27, %v5598_v63  ;;  %v575_v2 = vand.u32 4294901760, %v574_v59  ;;  %305 = vmatprep.subr.mxu0 %v3292_v56  ;;  %v581_v63 = vand.u32 4294901760, %v580_v36  ;;  %v5601_v60 = vand.u32 4294901760, %v3320_v47  ;;  %v200_v59 = vld [vmem:[#allocation5 + $0x320] sm:$0xff] }
  0x50   :  { %v598_v45 = vsub.f32 %v3310_v57, %v5599_v42  ;;  %v604_v54 = vsub.f32 %v3313_v48, %v5600_v55  ;;  %v587_v30 = vand.u32 4294901760, %v586_v44  ;;  %307 = vmatpush2.msra.mxu0 %v3304_v49  ;;  %570 = vmatprep.subr.mxu1 %v569_v50  ;;  %v3354_v55 = vand.u32 4294901760, %v209_v38  ;;  %v180_v49 = vld [vmem:[#allocation5 + $0x280] sm:$0xff] }
  0x51   :  { %v593_v27 = vand.u32 4294901760, %v592_v43  ;;  %v610_v31 = vsub.f32 %v3320_v47, %v5601_v60  ;;  %v3356_v48 = vand.u32 4294901760, %v208_v32  ;;  %576 = vmatpush2.msra.mxu1 %v575_v2  ;;  %v3358_v44 = vand.u32 4294901760, %v205_v0 }
  0x52   :  { %v599_v42 = vand.u32 4294901760, %v598_v45  ;;  %v605_v57 = vand.u32 4294901760, %v604_v54  ;;  %5602 = vst [vmem:[#allocation54_spill] sm:$0xff] %v3354_v55  ;;  %v3360_v43 = vand.u32 4294901760, %v204_v34  ;;  %v3362_v56 = vand.u32 4294901760, %v201_v26  ;;  %582 = vmatprep.subr.mxu1 %v581_v63  ;;  %309 = vmatprep.subr.mxu0 %v3354_v55 }
  0x53   :  { %5603 = vst [vmem:[#allocation55_spill] sm:$0xff] %v3356_v48  ;;  %v611_v36 = vand.u32 4294901760, %v610_v31  ;;  %5604 = vst [vmem:[#allocation56_spill] sm:$0xff] %v3358_v44  ;;  %v3365_v60 = vsub.f32 %v209_v38, %v3354_v55  ;;  %v3368_v45 = vsub.f32 %v208_v32, %v3356_v48  ;;  %v3370_v50 = vand.u32 4294901760, %v200_v59  ;;  %588 = vmatpush2.msra.mxu1 %v587_v30  ;;  %v181_v55 = vld [vmem:[#allocation5 + $0x288] sm:$0xff] }
  0x54   :  { %5605 = vst [vmem:[#allocation57_spill] sm:$0xff] %v3360_v43  ;;  %5606 = vst [vmem:[#allocation58_spill] sm:$0xff] %v3362_v56  ;;  %v3372_v54 = vand.u32 4294901760, %v197_v51  ;;  %v3376_v2 = vsub.f32 %v205_v0, %v3358_v44  ;;  %v3379_v31 = vsub.f32 %v204_v34, %v3360_v43  ;;  %v3382_v63 = vsub.f32 %v201_v26, %v3362_v56 }
  0x55   :  { %5607 = vst [vmem:[#allocation59_spill] sm:$0xff] %v3365_v60  ;;  %5608 = vst [vmem:[#allocation60_spill] sm:$0xff] %v3368_v45  ;;  %v3384_v38 = vand.u32 4294901760, %v196_v46  ;;  %311 = vmatpush2.msra.mxu0 %v3356_v48  ;;  %594 = vmatprep.subr.mxu1 %v593_v27  ;;  %v5254_v32 = vand.u32 4294901760, %v3365_v60  ;;  %v5257_v47 = vand.u32 4294901760, %v3368_v45  ;;  %v3390_v30 = vsub.f32 %v200_v59, %v3370_v50 }
  0x56   :  { %5609 = vst [vmem:[#allocation61_spill] sm:$0xff] %v3370_v50  ;;  %5610 = vst [vmem:[#allocation62_spill] sm:$0xff] %v3372_v54  ;;  %v3393_v0 = vsub.f32 %v197_v51, %v3372_v54  ;;  %313 = vmatprep.subr.mxu0 %v3358_v44  ;;  %600 = vmatpush2.msra.mxu1 %v599_v42  ;;  %v5262_v34 = vand.u32 4294901760, %v3376_v2  ;;  %v193_v42 = vld [vmem:[#allocation5 + $0x2e8] sm:$0xff] }
  0x57   :  { %5611 = vst [vmem:[#allocation63_spill] sm:$0xff] %v3376_v2  ;;  %5612 = vst [vmem:[#allocation64_spill] sm:$0xff] %v3379_v31  ;;  %v3400_v27 = vsub.f32 %v196_v46, %v3384_v38  ;;  %315 = vmatpush2.msra.mxu0 %v3360_v43  ;;  %606 = vmatprep.subr.mxu1 %v605_v57  ;;  %v616_v51 = vsub.f32 %v3365_v60, %v5254_v32  ;;  %v5618_v57 = vand.u32 4294901760, %v3379_v31  ;;  %v188_v43 = vld [vmem:[#allocation5 + $0x2c0] sm:$0xff]  ;;  %v185_v44 = vld [vmem:[#allocation5 + $0x2a8] sm:$0xff] }
  0x58   :  { %5613 = vst [vmem:[#allocation65_spill] sm:$0xff] %v3382_v63  ;;  %5614 = vst [vmem:[#allocation66_spill] sm:$0xff] %v3384_v38  ;;  %v622_v59 = vsub.f32 %v3368_v45, %v5257_v47  ;;  %317 = vmatprep.subr.mxu0 %v3362_v56  ;;  %612 = vmatpush2.msra.mxu1 %v611_v36  ;;  %v628_v46 = vsub.f32 %v3376_v2, %v5262_v34  ;;  %v5619_v32 = vand.u32 4294901760, %v3382_v63  ;;  %v192_v45 = vld [vmem:[#allocation5 + $0x2e0] sm:$0xff] }
  0x59   :  { %5615 = vst [vmem:[#allocation67_spill] sm:$0xff] %v3390_v30  ;;  %5616 = vst [vmem:[#allocation68_spill] sm:$0xff] %v3393_v0  ;;  %v634_v48 = vsub.f32 %v3379_v31, %v5618_v57  ;;  %319 = vmatpush2.msra.mxu0 %v3370_v50  ;;  %v617_v26 = vand.u32 4294901760, %v616_v51  ;;  %v5620_v56 = vand.u32 4294901760, %v3390_v30  ;;  %v5621_v2 = vand.u32 4294901760, %v3393_v0  ;;  %v189_v31 = vld [vmem:[#allocation5 + $0x2c8] sm:$0xff] }
  0x5a   :  { %5617 = vst [vmem:[#allocation69_spill] sm:$0xff] %v3400_v27  ;;  %v640_v60 = vsub.f32 %v3382_v63, %v5619_v32  ;;  %v623_v36 = vand.u32 4294901760, %v622_v59  ;;  %321 = vmatprep.subr.mxu0 %v3372_v54  ;;  %v629_v32 = vand.u32 4294901760, %v628_v46  ;;  %v5622_v50 = vand.u32 4294901760, %v3400_v27  ;;  %v184_v59 = vld [vmem:[#allocation5 + $0x2a0] sm:$0xff] }
  0x5b   :  { %v646_v34 = vsub.f32 %v3390_v30, %v5620_v56  ;;  %v652_v57 = vsub.f32 %v3393_v0, %v5621_v2  ;;  %v635_v47 = vand.u32 4294901760, %v634_v48  ;;  %323 = vmatpush2.msra.mxu0 %v3384_v38  ;;  %618 = vmatprep.subr.mxu1 %v617_v26  ;;  %v3434_v2 = vand.u32 4294901760, %v193_v42 }
  0x5c   :  { %v641_v63 = vand.u32 4294901760, %v640_v60  ;;  %v658_v51 = vsub.f32 %v3400_v27, %v5622_v50  ;;  %v3436_v0 = vand.u32 4294901760, %v192_v45  ;;  %624 = vmatpush2.msra.mxu1 %v623_v36  ;;  %v3438_v48 = vand.u32 4294901760, %v189_v31 }
  0x5d   :  { %v647_v56 = vand.u32 4294901760, %v646_v34  ;;  %v653_v30 = vand.u32 4294901760, %v652_v57  ;;  %5623 = vst [vmem:[#allocation70_spill] sm:$0xff] %v3434_v2  ;;  %v3440_v60 = vand.u32 4294901760, %v188_v43  ;;  %v3442_v54 = vand.u32 4294901760, %v185_v44  ;;  %630 = vmatprep.subr.mxu1 %v629_v32  ;;  %325 = vmatprep.subr.mxu0 %v3434_v2 }
  0x5e   :  { %5624 = vst [vmem:[#allocation71_spill] sm:$0xff] %v3436_v0  ;;  %v659_v46 = vand.u32 4294901760, %v658_v51  ;;  %5625 = vst [vmem:[#allocation72_spill] sm:$0xff] %v3438_v48  ;;  %v3445_v50 = vsub.f32 %v193_v42, %v3434_v2  ;;  %v3448_v34 = vsub.f32 %v192_v45, %v3436_v0  ;;  %v3450_v26 = vand.u32 4294901760, %v184_v59  ;;  %636 = vmatpush2.msra.mxu1 %v635_v47 }
  0x5f   :  { %5626 = vst [vmem:[#allocation73_spill] sm:$0xff] %v3440_v60  ;;  %5627 = vst [vmem:[#allocation74_spill] sm:$0xff] %v3442_v54  ;;  %v3452_v57 = vand.u32 4294901760, %v181_v55  ;;  %v3456_v36 = vsub.f32 %v189_v31, %v3438_v48  ;;  %v3459_v51 = vsub.f32 %v188_v43, %v3440_v60  ;;  %v3462_v32 = vsub.f32 %v185_v44, %v3442_v54 }
  0x60   :  { %5628 = vst [vmem:[#allocation75_spill] sm:$0xff] %v3445_v50  ;;  %5629 = vst [vmem:[#allocation76_spill] sm:$0xff] %v3448_v34  ;;  %v3464_v42 = vand.u32 4294901760, %v180_v49  ;;  %327 = vmatpush2.msra.mxu0 %v3436_v0  ;;  %642 = vmatprep.subr.mxu1 %v641_v63  ;;  %v5289_v45 = vand.u32 4294901760, %v3445_v50  ;;  %v5292_v27 = vand.u32 4294901760, %v3448_v34  ;;  %v3470_v47 = vsub.f32 %v184_v59, %v3450_v26 }
  0x61   :  { %5630 = vst [vmem:[#allocation77_spill] sm:$0xff] %v3450_v26  ;;  %5631 = vst [vmem:[#allocation78_spill] sm:$0xff] %v3452_v57  ;;  %v3473_v31 = vsub.f32 %v181_v55, %v3452_v57  ;;  %329 = vmatprep.subr.mxu0 %v3438_v48  ;;  %648 = vmatpush2.msra.mxu1 %v647_v56  ;;  %v5297_v44 = vand.u32 4294901760, %v3456_v36  ;;  %v177_v56 = vld [vmem:[#allocation5 + $0x268] sm:$0xff] }
  0x62   :  { %5632 = vst [vmem:[#allocation79_spill] sm:$0xff] %v3456_v36  ;;  %5633 = vst [vmem:[#allocation80_spill] sm:$0xff] %v3459_v51  ;;  %v3480_v63 = vsub.f32 %v180_v49, %v3464_v42  ;;  %331 = vmatpush2.msra.mxu0 %v3440_v60  ;;  %654 = vmatprep.subr.mxu1 %v653_v30  ;;  %v664_v55 = vsub.f32 %v3445_v50, %v5289_v45  ;;  %v5639_v30 = vand.u32 4294901760, %v3459_v51  ;;  %v172_v60 = vld [vmem:[#allocation5 + $0x240] sm:$0xff]  ;;  %v169_v48 = vld [vmem:[#allocation5 + $0x228] sm:$0xff] }
  0x63   :  { %5634 = vst [vmem:[#allocation81_spill] sm:$0xff] %v3462_v32  ;;  %5635 = vst [vmem:[#allocation82_spill] sm:$0xff] %v3464_v42  ;;  %v670_v59 = vsub.f32 %v3448_v34, %v5292_v27  ;;  %333 = vmatprep.subr.mxu0 %v3442_v54  ;;  %660 = vmatpush2.msra.mxu1 %v659_v46  ;;  %v676_v49 = vsub.f32 %v3456_v36, %v5297_v44  ;;  %v5640_v45 = vand.u32 4294901760, %v3462_v32  ;;  %v176_v34 = vld [vmem:[#allocation5 + $0x260] sm:$0xff] }
  0x64   :  { %5636 = vst [vmem:[#allocation83_spill] sm:$0xff] %v3470_v47  ;;  %5637 = vst [vmem:[#allocation84_spill] sm:$0xff] %v3473_v31  ;;  %v682_v0 = vsub.f32 %v3459_v51, %v5639_v30  ;;  %335 = vmatpush2.msra.mxu0 %v3450_v26  ;;  %v665_v43 = vand.u32 4294901760, %v664_v55  ;;  %v5641_v54 = vand.u32 4294901760, %v3470_v47  ;;  %v5642_v36 = vand.u32 4294901760, %v3473_v31  ;;  %v173_v51 = vld [vmem:[#allocation5 + $0x248] sm:$0xff] }
  0x65   :  { %5638 = vst [vmem:[#allocation85_spill] sm:$0xff] %v3480_v63  ;;  %v688_v50 = vsub.f32 %v3462_v32, %v5640_v45  ;;  %v671_v46 = vand.u32 4294901760, %v670_v59  ;;  %337 = vmatprep.subr.mxu0 %v3452_v57  ;;  %v677_v45 = vand.u32 4294901760, %v676_v49  ;;  %v5643_v32 = vand.u32 4294901760, %v3480_v63  ;;  %v168_v59 = vld [vmem:[#allocation5 + $0x220] sm:$0xff] }
  0x66   :  { %v694_v44 = vsub.f32 %v3470_v47, %v5641_v54  ;;  %v700_v30 = vsub.f32 %v3473_v31, %v5642_v36  ;;  %v683_v27 = vand.u32 4294901760, %v682_v0  ;;  %339 = vmatpush2.msra.mxu0 %v3464_v42  ;;  %666 = vmatprep.subr.mxu1 %v665_v43  ;;  %v3514_v26 = vand.u32 4294901760, %v177_v56  ;;  %v165_v31 = vld [vmem:[#allocation5 + $0x208] sm:$0xff] }
  0x67   :  { %v706_v55 = vsub.f32 %v3480_v63, %v5643_v32  ;;  %v689_v54 = vand.u32 4294901760, %v688_v50  ;;  %v3516_v36 = vand.u32 4294901760, %v176_v34  ;;  %672 = vmatpush2.msra.mxu1 %v671_v46  ;;  %v3518_v57 = vand.u32 4294901760, %v173_v51  ;;  %v164_v32 = vld [vmem:[#allocation5 + $0x200] sm:$0xff] }
  0x68   :  { %v695_v47 = vand.u32 4294901760, %v694_v44  ;;  %5644 = vst [vmem:[#allocation86_spill] sm:$0xff] %v3514_v26  ;;  %v701_v2 = vand.u32 4294901760, %v700_v30  ;;  %v3520_v0 = vand.u32 4294901760, %v172_v60  ;;  %v3522_v49 = vand.u32 4294901760, %v169_v48  ;;  %678 = vmatprep.subr.mxu1 %v677_v45  ;;  %341 = vmatprep.subr.mxu0 %v3514_v26 }
  0x69   :  { %5645 = vst [vmem:[#allocation87_spill] sm:$0xff] %v3516_v36  ;;  %5646 = vst [vmem:[#allocation88_spill] sm:$0xff] %v3518_v57  ;;  %v707_v63 = vand.u32 4294901760, %v706_v55  ;;  %v3525_v43 = vsub.f32 %v177_v56, %v3514_v26  ;;  %v3528_v50 = vsub.f32 %v176_v34, %v3516_v36  ;;  %v3530_v44 = vand.u32 4294901760, %v168_v59  ;;  %684 = vmatpush2.msra.mxu1 %v683_v27 }
  0x6a   :  { %5647 = vst [vmem:[#allocation89_spill] sm:$0xff] %v3522_v49  ;;  %v3534_v46 = vsub.f32 %v173_v51, %v3518_v57  ;;  %v3537_v30 = vsub.f32 %v172_v60, %v3520_v0  ;;  %v3540_v45 = vsub.f32 %v169_v48, %v3522_v49  ;;  %v3542_v55 = vand.u32 4294901760, %v165_v31  ;;  %343 = vmatpush2.msra.mxu0 %v3516_v36 }
  0x6b   :  { %5648 = vst [vmem:[#allocation90_spill] sm:$0xff] %v3525_v43  ;;  %5649 = vst [vmem:[#allocation91_spill] sm:$0xff] %v3528_v50  ;;  %690 = vmatprep.subr.mxu1 %v689_v54  ;;  %v5322_v34 = vand.u32 4294901760, %v3525_v43  ;;  %v5325_v56 = vand.u32 4294901760, %v3528_v50  ;;  %v3548_v27 = vsub.f32 %v168_v59, %v3530_v44  ;;  %v3550_v51 = vand.u32 4294901760, %v164_v32  ;;  %345 = vmatprep.subr.mxu0 %v3518_v57 }
  0x6c   :  { %5650 = vst [vmem:[#allocation92_spill] sm:$0xff] %v3530_v44  ;;  %5651 = vst [vmem:[#allocation93_spill] sm:$0xff] %v3534_v46  ;;  %696 = vmatpush2.msra.mxu1 %v695_v47  ;;  %v3557_v54 = vsub.f32 %v165_v31, %v3542_v55  ;;  %347 = vmatpush2.msra.mxu0 %v3520_v0  ;;  %v5655_v31 = vand.u32 4294901760, %v3534_v46  ;;  %v5656_v26 = vand.u32 4294901760, %v3537_v30 }
  0x6d   :  { %5652 = vst [vmem:[#allocation94_spill] sm:$0xff] %v3540_v45  ;;  %5653 = vst [vmem:[#allocation95_spill] sm:$0xff] %v3550_v51  ;;  %702 = vmatprep.subr.mxu1 %v701_v2  ;;  %v712_v59 = vsub.f32 %v3525_v43, %v5322_v34  ;;  %v718_v47 = vsub.f32 %v3528_v50, %v5325_v56  ;;  %v3568_v60 = vsub.f32 %v164_v32, %v3550_v51 }
  0x6e   :  { %5654 = vst [vmem:[#allocation96_spill] sm:$0xff] %v3557_v54  ;;  %349 = vmatprep.subr.mxu0 %v3522_v49  ;;  %708 = vmatpush2.msra.mxu1 %v707_v63  ;;  %v724_v2 = vsub.f32 %v3534_v46, %v5655_v31  ;;  %v730_v34 = vsub.f32 %v3537_v30, %v5656_v26  ;;  %v5657_v43 = vand.u32 4294901760, %v3540_v45  ;;  %v5334_v48 = vand.u32 4294901760, %v3557_v54 }
  0x6f   :  { %351 = vmatpush2.msra.mxu0 %v3530_v44  ;;  %v713_v32 = vand.u32 4294901760, %v712_v59  ;;  %v719_v50 = vand.u32 4294901760, %v718_v47  ;;  %v5658_v63 = vand.u32 4294901760, %v3548_v27  ;;  %v5337_v31 = vand.u32 4294901760, %v3568_v60 }
  0x70   :  { %v736_v56 = vsub.f32 %v3540_v45, %v5657_v43  ;;  %353 = vmatprep.subr.mxu0 %v3542_v55  ;;  %v725_v46 = vand.u32 4294901760, %v724_v2  ;;  %v731_v26 = vand.u32 4294901760, %v730_v34  ;;  %v748_v43 = vsub.f32 %v3557_v54, %v5334_v48 }
  0x71   :  { %v742_v49 = vsub.f32 %v3548_v27, %v5658_v63  ;;  %355 = vmatpush2.msra.mxu0 %v3550_v51  ;;  %714 = vmatprep.subr.mxu1 %v713_v32  ;;  %v754_v59 = vsub.f32 %v3568_v60, %v5337_v31  ;;  %v39_v2 = vlaneseq }
  0x72   :  { %v737_v45 = vand.u32 4294901760, %v736_v56  ;;  %768 = vmatprep.subr.mxu0 %v2957_v16  ;;  %720 = vmatpush2.msra.mxu1 %v719_v50  ;;  %v749_v63 = vand.u32 4294901760, %v748_v43 }
  0x73   :  { %v743_v47 = vand.u32 4294901760, %v742_v49  ;;  %726 = vmatprep.subr.mxu1 %v725_v46  ;;  %v755_v34 = vand.u32 4294901760, %v754_v59  ;;  %v40_v56 = vand.u32 127, %v39_v2 }
  0x74   :  { %732 = vmatpush2.msra.mxu1 %v731_v26 }
  0x75   :  { %738 = vmatprep.subr.mxu1 %v737_v45  ;;  %v41_v54 = vadd.s32 128, %v40_v56 }
  0x76   :  { %744 = vmatpush2.msra.mxu1 %v743_v47 }
  0x77   :  { %750 = vmatprep.subr.mxu1 %v749_v63 }
  0x78   :  { %756 = vmatpush2.msra.mxu1 %v755_v34 }
  0x79   :  { %970 = vmatprep.subr.mxu1 %v2946_v5 }
  0x97   :  { %v56_v32 = vpop.permute.xlu1 %55  ;;  %v44_v48 = vpop.permute.xlu0 %43 }
  0x98   :  { %vm45_vm0 = vcmp.eq.s32.totalorder %v40_v56, %v44_v48  ;;  %vm46_vm1 = vcmp.eq.s32.totalorder %v41_v54, %v44_v48  ;;  %vm57_vm6 = vcmp.eq.s32.totalorder %v40_v56, %v56_v32  ;;  %vm58_vm7 = vcmp.eq.s32.totalorder %v41_v54, %v56_v32 }
  0x9c   :  { %v63_v31 = vpop.permute.xlu1 %62  ;;  %v49_v50 = vpop.permute.xlu0 %48 }
  0x9d   :  { %vm50_vm2 = vcmp.eq.s32.totalorder %v40_v56, %v49_v50  ;;  %vm51_vm3 = vcmp.eq.s32.totalorder %v41_v54, %v49_v50  ;;  %vm64_vm10 = vcmp.eq.s32.totalorder %v40_v56, %v63_v31  ;;  %vm65_vm12 = vcmp.eq.s32.totalorder %v41_v54, %v63_v31  ;;  %v5667_v50 = vld [vmem:[#allocation14_spill] sm:$0xff] }
  0x9e   :  { %vm52_vm4 = vmor %vm45_vm0, %vm50_vm2  ;;  %v2919_v31 = vmov 0.0  }
  0x9f   :  { %vm53_vm5 = vmor %vm46_vm1, %vm51_vm3 }
  0xa0   :  { %vm59_vm8 = vmor %vm52_vm4, %vm57_vm6 }
  0xa1   :  { %v70_v49 = vpop.permute.xlu1 %69  ;;  %vm60_vm9 = vmor %vm53_vm5, %vm58_vm7  ;;  %v77_v46 = vpop.permute.xlu0 %76 }
  0xa2   :  { %vm71_vm11 = vcmp.eq.s32.totalorder %v40_v56, %v70_v49  ;;  %vm72_vm13 = vcmp.eq.s32.totalorder %v41_v54, %v70_v49  ;;  %vm66_vm14 = vmor %vm59_vm8, %vm64_vm10  ;;  %vm78_vm2 = vcmp.eq.s32.totalorder %v40_v56, %v77_v46  ;;  %vm79_vm3 = vcmp.eq.s32.totalorder %v41_v54, %v77_v46  ;;  %v5668_v49 = vld [vmem:[#allocation11_spill] sm:$0xff]  ;;  %v5669_v46 = vld [vmem:[#allocation18_spill] sm:$0xff] }
  0xa3   :  { %vm67_vm15 = vmor %vm60_vm9, %vm65_vm12 }
  0xa4   :  { %vm73_vm0 = vmor %vm66_vm14, %vm71_vm11 }
  0xa5   :  { %vm74_vm1 = vmor %vm67_vm15, %vm72_vm13 }
  0xa6   :  { %v84_v45 = vpop.permute.xlu1 %83  ;;  %vm80_vm6 = vmor %vm73_vm0, %vm78_vm2 }
  0xa7   :  { %vm85_vm4 = vcmp.eq.s32.totalorder %v40_v56, %v84_v45  ;;  %vm86_vm5 = vcmp.eq.s32.totalorder %v41_v54, %v84_v45  ;;  %vm81_vm7 = vmor %vm74_vm1, %vm79_vm3  ;;  %v5670_v45 = vld [vmem:[#allocation12_spill] sm:$0xff] }
  0xa8   :  { %vm87_vm8 = vmor %vm80_vm6, %vm85_vm4 }
  0xa9   :  { %vm88_vm10 = vmor %vm81_vm7, %vm86_vm5 }
  0xac   :  { %v91_v48 = vpop.permute.xlu1 %90 }
  0xad   :  { %vm92_vm9 = vcmp.eq.s32.totalorder %v40_v56, %v91_v48  ;;  %vm93_vm12 = vcmp.eq.s32.totalorder %v41_v54, %v91_v48  ;;  %v5671_v48 = vld [vmem:[#allocation22_spill] sm:$0xff] }
  0xae   :  { %vm94_vm11 = vmor %vm87_vm8, %vm92_vm9 }
  0xaf   :  { %vm95_vm14 = vmor %vm88_vm10, %vm93_vm12  ;;  %v3596_v26 = vsel %vm94_vm11, 1.0, %v2919_v31 }
  0xb0   :  { %5659 = vst [vmem:[#allocation97_spill] sm:$0xff] %v3596_v26  ;;  %v3598_v43 = vsel %vm95_vm14, 1.0, %v2919_v31  ;;  %v3602_v59 = vsub.f32 %v3596_v26, %v3596_v26  ;;  %v5672_v31 = vld [vmem:[#allocation13_spill] sm:$0xff] }
  0xb1   :  { %5660 = vst [vmem:[#allocation98_spill] sm:$0xff] %v3598_v43  ;;  %758 = vmatprep.mubr.f32.mxu1 %v3598_v43  ;;  %v3607_v47 = vsub.f32 %v3598_v43, %v3598_v43 }
  0xb2   :  { %5661 = vst [vmem:[#allocation99_spill] sm:$0xff] %v3602_v59  ;;  %760 = vmatmul.mubr.f32.vlgmr.msra.gmra.mxu1 %v3596_v26  ;;  %v3611_v54 = vand.u32 4294901760, %v3602_v59  ;;  %v5679_v26 = vld [vmem:[#allocation26_spill] sm:$0xff] }
  0xb3   :  { %5662 = vst [vmem:[#allocation100_spill] sm:$0xff] %v3607_v47  ;;  %972 = vmatpush1.msra.mxu1 %v2948_v6  ;;  %v3615_v63 = vand.u32 4294901760, %v3607_v47 }
  0xb4   :  { %5663 = vst [vmem:[#allocation101_spill] sm:$0xff] %v3611_v54  ;;  %974 = vmatprep.subr.mxu1 %v2950_v10  ;;  %v365_v34 = vsub.f32 %v3602_v59, %v3611_v54 }
  0xb5   :  { %5664 = vst [vmem:[#allocation102_spill] sm:$0xff] %v3615_v63  ;;  %976 = vmatpush1.msra.mxu1 %v2952_v11  ;;  %1100 = vmatprep.mubr.f32.mxu1 %v3615_v63  ;;  %v359_v2 = vsub.f32 %v3607_v47, %v3615_v63  ;;  %v5677_v63 = vld [vmem:[#allocation25_spill] sm:$0xff] }
  0xb6   :  { %978 = vmatprep.subr.mxu1 %v2954_v12  ;;  %v3625_v56 = vand.u32 4294901760, %v365_v34  ;;  %v5673_v34 = vld [vmem:[#allocation23_spill] sm:$0xff] }
  0xb7   :  { %980 = vmatpush1.msra.mxu1 %v2962_v18  ;;  %v3628_v32 = vand.u32 4294901760, %v359_v2  ;;  %v5674_v2 = vld [vmem:[#allocation15_spill] sm:$0xff] }
  0xb8   :  { %5665 = vst [vmem:[#allocation103_spill] sm:$0xff] %v3625_v56  ;;  %982 = vmatprep.subr.mxu1 %v2964_v19 }
  0xb9   :  { %5666 = vst [vmem:[#allocation104_spill] sm:$0xff] %v3628_v32  ;;  %984 = vmatpush1.msra.mxu1 %v2976_v23  ;;  %361 = vmatprep.mubr.f32.mxu0 %v3628_v32  ;;  %v5678_v32 = vld [vmem:[#allocation17_spill] sm:$0xff] }
  0xba   :  { %986 = vmatprep.subr.mxu1 %v3027_v61  ;;  %367 = vmatmul.mubr.f32.vlgmr.msra.gmra.mxu0 %v3625_v56  ;;  %v5676_v56 = vld [vmem:[#allocation16_spill] sm:$0xff] }
  0xbb   :  { %771 = vmatpush1.msra.mxu0 %v2960_v17  ;;  %988 = vmatpush1.msra.mxu1 %v3029_v62 }
  0xbc   :  { %774 = vmatprep.subr.mxu0 %v2968_v20  ;;  %960 = vmatprep.mubr.f32.mxu0 %v3607_v47  ;;  %v5675_v47 = vld [vmem:[#allocation24_spill] sm:$0xff] }
  0xbd   :  { %990 = vmatprep.subr.mxu1 %v3031_v1  ;;  %777 = vmatpush1.msra.mxu0 %v2971_v21 }
  0xbe   :  { %992 = vmatpush1.msra.mxu1 %v3033_v3  ;;  %780 = vmatprep.subr.mxu0 %v2974_v22 }
  0xbf   :  { %994 = vmatprep.subr.mxu1 %v3035_v4  ;;  %783 = vmatpush1.msra.mxu0 %v2982_v28 }
  0xc0   :  { %996 = vmatpush1.msra.mxu1 %v3044_v9  ;;  %786 = vmatprep.subr.mxu0 %v2985_v29 }
  0xc1   :  { %998 = vmatprep.subr.mxu1 %v3047_v13  ;;  %789 = vmatpush1.msra.mxu0 %v2993_v33 }
  0xc2   :  { %1000 = vmatpush1.msra.mxu1 %v3059_v25  ;;  %792 = vmatprep.subr.mxu0 %v3039_v7 }
  0xc3   :  { %1002 = vmatprep.subr.mxu1 %v3109_v35  ;;  %795 = vmatpush1.msra.mxu0 %v3042_v8 }
  0xc4   :  { %1004 = vmatpush1.msra.mxu1 %v3111_v41  ;;  %798 = vmatprep.subr.mxu0 %v3050_v14 }
  0xc5   :  { %1006 = vmatprep.subr.mxu1 %v3113_v52  ;;  %801 = vmatpush1.msra.mxu0 %v3053_v15 }
  0xc6   :  { %1008 = vmatpush1.msra.mxu1 %v3115_v37  ;;  %804 = vmatprep.subr.mxu0 %v3056_v24 }
  0xc7   :  { %1010 = vmatprep.subr.mxu1 %v3118_v53  ;;  %807 = vmatpush1.msra.mxu0 %v3064_v39 }
  0xc8   :  { %1012 = vmatpush1.msra.mxu1 %v3127_v58  ;;  %810 = vmatprep.subr.mxu0 %v3067_v40 }
  0xc9   :  { %1014 = vmatprep.subr.mxu1 %v5667_v50  ;;  %813 = vmatpush1.msra.mxu0 %v5668_v49 }
  0xca   :  { %1016 = vmatpush1.msra.mxu1 %v5669_v46  ;;  %816 = vmatprep.subr.mxu0 %v5670_v45  ;;  %v5680_v46 = vld [vmem:[#allocation19_spill] sm:$0xff]  ;;  %v5681_v45 = vld [vmem:[#allocation29_spill] sm:$0xff] }
  0xcb   :  { %1018 = vmatprep.subr.mxu1 %v5671_v48  ;;  %819 = vmatpush1.msra.mxu0 %v5672_v31  ;;  %v5682_v48 = vld [vmem:[#allocation20_spill] sm:$0xff]  ;;  %v5683_v31 = vld [vmem:[#allocation30_spill] sm:$0xff] }
  0xcc   :  { %1020 = vmatpush1.msra.mxu1 %v5673_v34  ;;  %822 = vmatprep.subr.mxu0 %v5674_v2  ;;  %v5684_v34 = vld [vmem:[#allocation21_spill] sm:$0xff]  ;;  %v5685_v2 = vld [vmem:[#allocation34_spill] sm:$0xff] }
  0xcd   :  { %1022 = vmatprep.subr.mxu1 %v5675_v47  ;;  %825 = vmatpush1.msra.mxu0 %v5676_v56  ;;  %v5686_v47 = vld [vmem:[#allocation27_spill] sm:$0xff]  ;;  %v5687_v56 = vld [vmem:[#allocation38_spill] sm:$0xff] }
  0xce   :  { %1024 = vmatpush1.msra.mxu1 %v5677_v63  ;;  %828 = vmatprep.subr.mxu0 %v5678_v32  ;;  %v5688_v63 = vld [vmem:[#allocation28_spill] sm:$0xff]  ;;  %v5689_v32 = vld [vmem:[#allocation39_spill] sm:$0xff] }
  0xcf   :  { %1026 = vmatprep.subr.mxu1 %v5679_v26  ;;  %831 = vmatpush1.msra.mxu0 %v5680_v46  ;;  %v5690_v26 = vld [vmem:[#allocation31_spill] sm:$0xff]  ;;  %v5691_v46 = vld [vmem:[#allocation40_spill] sm:$0xff] }
  0xd0   :  { %1028 = vmatpush1.msra.mxu1 %v5681_v45  ;;  %834 = vmatprep.subr.mxu0 %v5682_v48  ;;  %v5692_v45 = vld [vmem:[#allocation32_spill] sm:$0xff]  ;;  %v5693_v48 = vld [vmem:[#allocation41_spill] sm:$0xff] }
  0xd1   :  { %1030 = vmatprep.subr.mxu1 %v5683_v31  ;;  %837 = vmatpush1.msra.mxu0 %v5684_v34  ;;  %v5694_v31 = vld [vmem:[#allocation33_spill] sm:$0xff]  ;;  %v5695_v34 = vld [vmem:[#allocation42_spill] sm:$0xff] }
  0xd2   :  { %1032 = vmatpush1.msra.mxu1 %v5685_v2  ;;  %840 = vmatprep.subr.mxu0 %v5686_v47  ;;  %v5696_v2 = vld [vmem:[#allocation35_spill] sm:$0xff]  ;;  %v5697_v47 = vld [vmem:[#allocation45_spill] sm:$0xff] }
  0xd3   :  { %1034 = vmatprep.subr.mxu1 %v5687_v56  ;;  %843 = vmatpush1.msra.mxu0 %v5688_v63  ;;  %v5698_v56 = vld [vmem:[#allocation36_spill] sm:$0xff]  ;;  %v5699_v63 = vld [vmem:[#allocation46_spill] sm:$0xff] }
  0xd4   :  { %1036 = vmatpush2.msra.mxu1 %v5689_v32  ;;  %846 = vmatprep.subr.mxu0 %v5690_v26  ;;  %v5700_v32 = vld [vmem:[#allocation37_spill] sm:$0xff]  ;;  %v5701_v26 = vld [vmem:[#allocation50_spill] sm:$0xff] }
  0xd5   :  { %1038 = vmatprep.subr.mxu1 %v5691_v46  ;;  %849 = vmatpush1.msra.mxu0 %v5692_v45  ;;  %v5702_v46 = vld [vmem:[#allocation43_spill] sm:$0xff]  ;;  %v5703_v45 = vld [vmem:[#allocation54_spill] sm:$0xff] }
  0xd6   :  { %1040 = vmatpush2.msra.mxu1 %v5693_v48  ;;  %852 = vmatprep.subr.mxu0 %v5694_v31  ;;  %v5704_v48 = vld [vmem:[#allocation44_spill] sm:$0xff]  ;;  %v5705_v31 = vld [vmem:[#allocation55_spill] sm:$0xff] }
  0xd7   :  { %1042 = vmatprep.subr.mxu1 %v5695_v34  ;;  %855 = vmatpush1.msra.mxu0 %v5696_v2  ;;  %v5706_v34 = vld [vmem:[#allocation47_spill] sm:$0xff]  ;;  %v5707_v2 = vld [vmem:[#allocation56_spill] sm:$0xff] }
  0xd8   :  { %1044 = vmatpush2.msra.mxu1 %v5697_v47  ;;  %858 = vmatprep.subr.mxu0 %v5698_v56  ;;  %v5708_v47 = vld [vmem:[#allocation48_spill] sm:$0xff]  ;;  %v5709_v56 = vld [vmem:[#allocation57_spill] sm:$0xff] }
  0xd9   :  { %1046 = vmatprep.subr.mxu1 %v5699_v63  ;;  %861 = vmatpush1.msra.mxu0 %v5700_v32  ;;  %v5710_v63 = vld [vmem:[#allocation49_spill] sm:$0xff]  ;;  %v5711_v32 = vld [vmem:[#allocation58_spill] sm:$0xff] }
  0xda   :  { %1048 = vmatpush2.msra.mxu1 %v5701_v26  ;;  %864 = vmatprep.subr.mxu0 %v5702_v46  ;;  %v5712_v26 = vld [vmem:[#allocation51_spill] sm:$0xff]  ;;  %v5713_v46 = vld [vmem:[#allocation61_spill] sm:$0xff] }
  0xdb   :  { %1050 = vmatprep.subr.mxu1 %v5703_v45  ;;  %867 = vmatpush2.msra.mxu0 %v5704_v48  ;;  %v5714_v45 = vld [vmem:[#allocation52_spill] sm:$0xff]  ;;  %v5715_v48 = vld [vmem:[#allocation62_spill] sm:$0xff] }
  0xdc   :  { %1052 = vmatpush2.msra.mxu1 %v5705_v31  ;;  %870 = vmatprep.subr.mxu0 %v5706_v34  ;;  %v5716_v31 = vld [vmem:[#allocation53_spill] sm:$0xff] }
  0xdd   :  { %1054 = vmatprep.subr.mxu1 %v5707_v2  ;;  %873 = vmatpush2.msra.mxu0 %v5708_v47  ;;  %v5717_v2 = vld [vmem:[#allocation59_spill] sm:$0xff]  ;;  %v5718_v47 = vld [vmem:[#allocation70_spill] sm:$0xff] }
  0xde   :  { %1056 = vmatpush2.msra.mxu1 %v5709_v56  ;;  %876 = vmatprep.subr.mxu0 %v5710_v63  ;;  %v5719_v56 = vld [vmem:[#allocation60_spill] sm:$0xff]  ;;  %v5720_v63 = vld [vmem:[#allocation71_spill] sm:$0xff] }
  0xdf   :  { %1058 = vmatprep.subr.mxu1 %v5711_v32  ;;  %879 = vmatpush2.msra.mxu0 %v5712_v26  ;;  %v5721_v32 = vld [vmem:[#allocation63_spill] sm:$0xff]  ;;  %v5722_v26 = vld [vmem:[#allocation72_spill] sm:$0xff] }
  0xe0   :  { %1060 = vmatpush2.msra.mxu1 %v5713_v46  ;;  %882 = vmatprep.subr.mxu0 %v5714_v45  ;;  %v5723_v46 = vld [vmem:[#allocation64_spill] sm:$0xff]  ;;  %v5724_v45 = vld [vmem:[#allocation73_spill] sm:$0xff] }
  0xe1   :  { %1062 = vmatprep.subr.mxu1 %v5715_v48  ;;  %885 = vmatpush2.msra.mxu0 %v5716_v31  ;;  %v5725_v48 = vld [vmem:[#allocation65_spill] sm:$0xff]  ;;  %v5726_v31 = vld [vmem:[#allocation74_spill] sm:$0xff] }
  0xe2   :  { %1064 = vmatpush2.msra.mxu1 %v3384_v38  ;;  %888 = vmatprep.subr.mxu0 %v5717_v2  ;;  %v5727_v38 = vld [vmem:[#allocation67_spill] sm:$0xff]  ;;  %v5728_v2 = vld [vmem:[#allocation77_spill] sm:$0xff] }
  0xe3   :  { %1066 = vmatprep.subr.mxu1 %v5718_v47  ;;  %891 = vmatpush2.msra.mxu0 %v5719_v56  ;;  %v5729_v47 = vld [vmem:[#allocation68_spill] sm:$0xff]  ;;  %v5730_v56 = vld [vmem:[#allocation78_spill] sm:$0xff] }
  0xe4   :  { %1068 = vmatpush2.msra.mxu1 %v5720_v63  ;;  %894 = vmatprep.subr.mxu0 %v5721_v32  ;;  %v5731_v63 = vld [vmem:[#allocation69_spill] sm:$0xff] }
  0xe5   :  { %1070 = vmatprep.subr.mxu1 %v5722_v26  ;;  %897 = vmatpush2.msra.mxu0 %v5723_v46  ;;  %v5732_v26 = vld [vmem:[#allocation75_spill] sm:$0xff]  ;;  %v5733_v46 = vld [vmem:[#allocation86_spill] sm:$0xff] }
  0xe6   :  { %1072 = vmatpush2.msra.mxu1 %v5724_v45  ;;  %900 = vmatprep.subr.mxu0 %v5725_v48  ;;  %v5734_v45 = vld [vmem:[#allocation76_spill] sm:$0xff] }
  0xe7   :  { %1074 = vmatprep.subr.mxu1 %v5726_v31  ;;  %903 = vmatpush2.msra.mxu0 %v5727_v38  ;;  %v5735_v31 = vld [vmem:[#allocation79_spill] sm:$0xff] }
  0xe8   :  { %1076 = vmatpush2.msra.mxu1 %v5728_v2  ;;  %906 = vmatprep.subr.mxu0 %v5729_v47  ;;  %v5736_v2 = vld [vmem:[#allocation80_spill] sm:$0xff] }
  0xe9   :  { %1078 = vmatprep.subr.mxu1 %v5730_v56  ;;  %909 = vmatpush2.msra.mxu0 %v5731_v63  ;;  %v5737_v56 = vld [vmem:[#allocation81_spill] sm:$0xff] }
  0xea   :  { %1080 = vmatpush2.msra.mxu1 %v3464_v42  ;;  %912 = vmatprep.subr.mxu0 %v5732_v26  ;;  %v5738_v63 = vld [vmem:[#allocation89_spill] sm:$0xff]  ;;  %v5739_v42 = vld [vmem:[#allocation83_spill] sm:$0xff] }
  0xeb   :  { %1082 = vmatprep.subr.mxu1 %v5733_v46  ;;  %915 = vmatpush2.msra.mxu0 %v5734_v45  ;;  %v5740_v46 = vld [vmem:[#allocation84_spill] sm:$0xff] }
  0xec   :  { %1084 = vmatpush2.msra.mxu1 %v3516_v36  ;;  %918 = vmatprep.subr.mxu0 %v5735_v31  ;;  %v5741_v36 = vld [vmem:[#allocation85_spill] sm:$0xff] }
  0xed   :  { %1086 = vmatprep.subr.mxu1 %v3518_v57  ;;  %921 = vmatpush2.msra.mxu0 %v5736_v2  ;;  %v5742_v57 = vld [vmem:[#allocation90_spill] sm:$0xff] }
  0xee   :  { %1088 = vmatpush2.msra.mxu1 %v3520_v0  ;;  %924 = vmatprep.subr.mxu0 %v5737_v56  ;;  %v5743_v56 = vld [vmem:[#allocation91_spill] sm:$0xff] }
  0xef   :  { %1090 = vmatprep.subr.mxu1 %v5738_v63  ;;  %927 = vmatpush2.msra.mxu0 %v5739_v42 }
  0xf0   :  { %1092 = vmatpush2.msra.mxu1 %v3530_v44  ;;  %930 = vmatprep.subr.mxu0 %v5740_v46  ;;  %v5744_v44 = vld [vmem:[#allocation93_spill] sm:$0xff] }
  0xf1   :  { %1094 = vmatprep.subr.mxu1 %v3542_v55  ;;  %933 = vmatpush2.msra.mxu0 %v5741_v36 }
  0xf2   :  { %1096 = vmatpush2.msra.mxu1 %v3550_v51  ;;  %936 = vmatprep.subr.mxu0 %v5742_v57  ;;  %v5745_v51 = vld [vmem:[#allocation94_spill] sm:$0xff] }
  0xf3   :  { %1104 = vmatmul.mubr.f32.vlgmr.msra.gmra.mxu1 %v3611_v54  ;;  %1376 = vmatprep.subr.mxu1 %v2946_v5  ;;  %v5746_v5 = vld [vmem:[#allocation96_spill] sm:$0xff] }
  0xf4   :  { %939 = vmatpush2.msra.mxu0 %v5743_v56  ;;  %1378 = vmatpush1.msra.mxu1 %v2948_v6  ;;  %v5747_v6 = vand.u32 4294901760, %v2957_v16  ;;  %v5751_v16 = vand.u32 4294901760, %v2974_v22  ;;  %v5757_v22 = vand.u32 4294901760, %v3050_v14  ;;  %v5773_v14 = vld [vmem:[#allocation16_spill] sm:$0xff] }
  0xf5   :  { %1504 = vmatprep.mubr.f32.mxu1 %v3598_v43  ;;  %942 = vmatprep.subr.mxu0 %v5744_v44 }
  0xf6   :  { %1380 = vmatprep.subr.mxu1 %v2950_v10  ;;  %945 = vmatpush2.msra.mxu0 %v3537_v30  ;;  %v5748_v10 = vand.u32 4294901760, %v2960_v17  ;;  %v5752_v17 = vand.u32 4294901760, %v2982_v28  ;;  %v5759_v28 = vand.u32 4294901760, %v3056_v24  ;;  %v5775_v24 = vld [vmem:[#allocation25_spill] sm:$0xff] }
  0xf7   :  { %1382 = vmatpush1.msra.mxu1 %v2952_v11  ;;  %948 = vmatprep.subr.mxu0 %v5745_v51  ;;  %v5749_v11 = vand.u32 4294901760, %v2968_v20  ;;  %v5755_v20 = vand.u32 4294901760, %v3039_v7  ;;  %v5769_v7 = vld [vmem:[#allocation23_spill] sm:$0xff] }
  0xf8   :  { %1384 = vmatprep.subr.mxu1 %v2954_v12  ;;  %951 = vmatpush2.msra.mxu0 %v3548_v27  ;;  %v5750_v12 = vand.u32 4294901760, %v2971_v21  ;;  %v5756_v21 = vand.u32 4294901760, %v3042_v8  ;;  %v5770_v8 = vld [vmem:[#allocation15_spill] sm:$0xff] }
  0xf9   :  { %1386 = vmatpush1.msra.mxu1 %v2962_v18  ;;  %954 = vmatprep.subr.mxu0 %v5746_v5  ;;  %v5753_v18 = vand.u32 4294901760, %v2985_v29  ;;  %v5760_v29 = vand.u32 4294901760, %v3064_v39  ;;  %v5778_v39 = vld [vmem:[#allocation26_spill] sm:$0xff] }
  0xfa   :  { %1388 = vmatprep.subr.mxu1 %v2964_v19  ;;  %957 = vmatpush2.msra.mxu0 %v3568_v60  ;;  %v5754_v19 = vand.u32 4294901760, %v2993_v33  ;;  %v5761_v33 = vand.u32 4294901760, %v3067_v40  ;;  %v5779_v40 = vld [vmem:[#allocation19_spill] sm:$0xff] }
  0xfb   :  { %1390 = vmatpush1.msra.mxu1 %v2976_v23  ;;  %963 = vmatmul.mubr.f32.vlgmr.msra.gmra.mxu0 %v3602_v59  ;;  %v5758_v23 = vand.u32 4294901760, %v3053_v15  ;;  %v5774_v15 = vand.u32 4294901760, %v5773_v14  ;;  %v5859_v59 = vld [vmem:[#allocation60_spill] sm:$0xff] }
  0xfc   :  { %1113 = vmatprep.subr.mxu0 %v5747_v6  ;;  %1392 = vmatprep.subr.mxu1 %v3027_v61  ;;  %v5763_v61 = vld [vmem:[#allocation18_spill] sm:$0xff]  ;;  %v5785_v6 = vld [vmem:[#allocation21_spill] sm:$0xff]  ;;  %v5860_v54 = vand.u32 4294901760, %v5859_v59 }
  0xfd   :  { %1117 = vmatpush1.msra.mxu0 %v5748_v10  ;;  %1367 = vmatprep.mubr.f32.mxu0 %v3598_v43  ;;  %v5786_v10 = vand.u32 4294901760, %v5785_v6 }
  0xfe   :  { %1394 = vmatpush1.msra.mxu1 %v3029_v62  ;;  %1121 = vmatprep.subr.mxu0 %v5749_v11  ;;  %v5787_v11 = vld [vmem:[#allocation34_spill] sm:$0xff] }
  0xff   :  { %1396 = vmatprep.subr.mxu1 %v3031_v1  ;;  %1125 = vmatpush1.msra.mxu0 %v5750_v12  ;;  %v5766_v1 = vld [vmem:[#allocation22_spill] sm:$0xff]  ;;  %v5788_v12 = vld [vmem:[#allocation27_spill] sm:$0xff] }
 0x100   :  { %1398 = vmatpush1.msra.mxu1 %v3033_v3  ;;  %1129 = vmatprep.subr.mxu0 %v5751_v16  ;;  %v5767_v3 = vld [vmem:[#allocation13_spill] sm:$0xff]  ;;  %v5789_v16 = vand.u32 4294901760, %v5788_v12  ;;  %v5815_v12 = vld [vmem:[#allocation43_spill] sm:$0xff] }
 0x101   :  { %1400 = vmatprep.subr.mxu1 %v3035_v4  ;;  %1133 = vmatpush1.msra.mxu0 %v5752_v17  ;;  %v5768_v4 = vand.u32 4294901760, %v5767_v3  ;;  %v163_v17 = vld [vmem:[#allocation5 + $0x1f8] sm:$0xff]  ;;  %v5800_v3 = vld [vmem:[#allocation33_spill] sm:$0xff] }
 0x102   :  { %1402 = vmatpush1.msra.mxu1 %v3044_v9  ;;  %1137 = vmatprep.subr.mxu0 %v5753_v18  ;;  %v5771_v9 = vand.u32 4294901760, %v5770_v8  ;;  %v5790_v18 = vld [vmem:[#allocation38_spill] sm:$0xff] }
 0x103   :  { %1404 = vmatprep.subr.mxu1 %v3047_v13  ;;  %1141 = vmatpush1.msra.mxu0 %v5754_v19  ;;  %v5772_v13 = vld [vmem:[#allocation24_spill] sm:$0xff]  ;;  %v155_v8 = vld [vmem:[#allocation5 + $0x1b8] sm:$0xff] }
 0x104   :  { %1406 = vmatpush1.msra.mxu1 %v3059_v25  ;;  %1145 = vmatprep.subr.mxu0 %v5755_v20  ;;  %v5776_v25 = vld [vmem:[#allocation17_spill] sm:$0xff]  ;;  %v5791_v19 = vld [vmem:[#allocation28_spill] sm:$0xff]  ;;  %v3872_v6 = vand.u32 4294901760, %v155_v8 }
 0x105   :  { %1408 = vmatprep.subr.mxu1 %v3109_v35  ;;  %1149 = vmatpush1.msra.mxu0 %v5756_v21  ;;  %v5777_v35 = vand.u32 4294901760, %v5776_v25  ;;  %v5792_v20 = vand.u32 4294901760, %v5791_v19  ;;  %v162_v21 = vld [vmem:[#allocation5 + $0x1f0] sm:$0xff] }
 0x106   :  { %1410 = vmatpush1.msra.mxu1 %v3111_v41  ;;  %1153 = vmatprep.subr.mxu0 %v5757_v22  ;;  %v5762_v41 = vand.u32 4294901760, %v5668_v49  ;;  %v5784_v49 = vld [vmem:[#allocation30_spill] sm:$0xff]  ;;  %v5793_v22 = vld [vmem:[#allocation39_spill] sm:$0xff]  ;;  %v5805_v25 = vld [vmem:[#allocation45_spill] sm:$0xff]  ;;  %5813 = vst [vmem:[#allocation47_spill] sm:$0xff] %v3872_v6 }
 0x107   :  { %1412 = vmatprep.subr.mxu1 %v3113_v52  ;;  %1157 = vmatpush1.msra.mxu0 %v5758_v23  ;;  %v5781_v52 = vld [vmem:[#allocation29_spill] sm:$0xff]  ;;  %v5794_v23 = vld [vmem:[#allocation31_spill] sm:$0xff] }
 0x108   :  { %1414 = vmatpush1.msra.mxu1 %v3115_v37  ;;  %1161 = vmatprep.subr.mxu0 %v5759_v28  ;;  %v5764_v37 = vld [vmem:[#allocation12_spill] sm:$0xff]  ;;  %v5795_v28 = vand.u32 4294901760, %v5794_v23 }
 0x109   :  { %1416 = vmatprep.subr.mxu1 %v3118_v53  ;;  %1165 = vmatpush1.msra.mxu0 %v5760_v29  ;;  %v5765_v62 = vand.u32 4294901760, %v5764_v37  ;;  %v5780_v53 = vand.u32 4294901760, %v5779_v40  ;;  %v159_v29 = vld [vmem:[#allocation5 + $0x1d8] sm:$0xff]  ;;  %v3849_v37 = vand.u32 4294901760, %v163_v17  ;;  %v5820_v23 = vld [vmem:[#allocation44_spill] sm:$0xff] }
 0x10a   :  { %1418 = vmatpush1.msra.mxu1 %v3127_v58  ;;  %1169 = vmatprep.subr.mxu0 %v5761_v33  ;;  %v5782_v58 = vld [vmem:[#allocation20_spill] sm:$0xff] }
 0x10b   :  { %1420 = vmatprep.subr.mxu1 %v5667_v50  ;;  %1173 = vmatpush1.msra.mxu0 %v5762_v41  ;;  %v5783_v50 = vand.u32 4294901760, %v5782_v58  ;;  %v5796_v33 = vld [vmem:[#allocation40_spill] sm:$0xff]  ;;  %v5810_v58 = vld [vmem:[#allocation37_spill] sm:$0xff] }
 0x10c   :  { %1422 = vmatpush1.msra.mxu1 %v5763_v61  ;;  %1177 = vmatprep.subr.mxu0 %v5765_v62  ;;  %v5797_v41 = vld [vmem:[#allocation32_spill] sm:$0xff]  ;;  %v158_v62 = vld [vmem:[#allocation5 + $0x1d0] sm:$0xff] }
 0x10d   :  { %1424 = vmatprep.subr.mxu1 %v5766_v1  ;;  %1181 = vmatpush1.msra.mxu0 %v5768_v4  ;;  %v5798_v61 = vand.u32 4294901760, %v5797_v41  ;;  %v5799_v1 = vld [vmem:[#allocation41_spill] sm:$0xff]  ;;  %v5801_v4 = vand.u32 4294901760, %v5800_v3  ;;  %v3864_v40 = vand.u32 4294901760, %v158_v62 }
 0x10e   :  { %1426 = vmatpush1.msra.mxu1 %v5769_v7  ;;  %1185 = vmatprep.subr.mxu0 %v5771_v9  ;;  %v3854_v7 = vand.u32 4294901760, %v162_v21  ;;  %v5802_v9 = vld [vmem:[#allocation42_spill] sm:$0xff]  ;;  %v146_v41 = vld [vmem:[#allocation5 + $0x170] sm:$0xff] }
 0x10f   :  { %1428 = vmatprep.subr.mxu1 %v5772_v13  ;;  %1189 = vmatpush1.msra.mxu0 %v5774_v15  ;;  %v5803_v13 = vld [vmem:[#allocation35_spill] sm:$0xff]  ;;  %v3859_v15 = vand.u32 4294901760, %v159_v29  ;;  %5808 = vst [vmem:[#allocation14_spill] sm:$0xff] %v3864_v40 }
 0x110   :  { %1430 = vmatpush1.msra.mxu1 %v5775_v24  ;;  %1193 = vmatprep.subr.mxu0 %v5777_v35  ;;  %v5804_v14 = vand.u32 4294901760, %v5803_v13  ;;  %v154_v24 = vld [vmem:[#allocation5 + $0x1b0] sm:$0xff]  ;;  %v5806_v35 = vld [vmem:[#allocation36_spill] sm:$0xff] }
 0x111   :  { %1432 = vmatprep.subr.mxu1 %v5778_v39  ;;  %1197 = vmatpush1.msra.mxu0 %v5780_v53  ;;  %v5807_v39 = vand.u32 4294901760, %v5806_v35  ;;  %v151_v53 = vld [vmem:[#allocation5 + $0x198] sm:$0xff]  ;;  %v3880_v19 = vand.u32 4294901760, %v154_v24  ;;  %v5829_v13 = vld [vmem:[#allocation48_spill] sm:$0xff] }
 0x112   :  { %1434 = vmatpush1.msra.mxu1 %v5781_v52  ;;  %1201 = vmatprep.subr.mxu0 %v5783_v50  ;;  %v5809_v52 = vld [vmem:[#allocation46_spill] sm:$0xff]  ;;  %v5811_v50 = vand.u32 4294901760, %v5810_v58 }
 0x113   :  { %1436 = vmatprep.subr.mxu1 %v5784_v49  ;;  %1205 = vmatpush1.msra.mxu0 %v5786_v10  ;;  %v3870_v49 = vsub.f32 %v163_v17, %v3849_v37  ;;  %v150_v10 = vld [vmem:[#allocation5 + $0x190] sm:$0xff]  ;;  %5818 = vst [vmem:[#allocation65_spill] sm:$0xff] %v3880_v19  ;;  %v3886_v17 = vsub.f32 %v159_v29, %v3859_v15 }
 0x114   :  { %1438 = vmatpush1.msra.mxu1 %v5787_v11  ;;  %1209 = vmatprep.subr.mxu0 %v5789_v16  ;;  %v5814_v11 = vld [vmem:[#allocation50_spill] sm:$0xff]  ;;  %v5816_v16 = vand.u32 4294901760, %v5815_v12  ;;  %v3896_v3 = vand.u32 4294901760, %v150_v10 }
 0x115   :  { %1440 = vmatprep.subr.mxu1 %v5790_v18  ;;  %1213 = vmatpush1.msra.mxu0 %v5792_v20  ;;  %5812 = vst [vmem:[#allocation11_spill] sm:$0xff] %v3870_v49  ;;  %v3878_v18 = vsub.f32 %v162_v21, %v3854_v7  ;;  %v147_v20 = vld [vmem:[#allocation5 + $0x178] sm:$0xff]  ;;  %5822 = vst [vmem:[#allocation67_spill] sm:$0xff] %v3886_v17  ;;  %v3894_v21 = vsub.f32 %v158_v62, %v3864_v40  ;;  %v5350_v29 = vand.u32 4294901760, %v3870_v49  ;;  %v5834_v62 = vld [vmem:[#allocation49_spill] sm:$0xff] }
 0x116   :  { %1442 = vmatpush2.msra.mxu1 %v5793_v22  ;;  %1217 = vmatprep.subr.mxu0 %v5795_v28  ;;  %v5819_v22 = vld [vmem:[#allocation54_spill] sm:$0xff]  ;;  %v5821_v28 = vand.u32 4294901760, %v5820_v23  ;;  %5827 = vst [vmem:[#allocation76_spill] sm:$0xff] %v3896_v3  ;;  %v3905_v35 = vand.u32 4294901760, %v147_v20  ;;  %v5854_v23 = vld [vmem:[#allocation59_spill] sm:$0xff] }
 0x117   :  { %1444 = vmatprep.subr.mxu1 %v5796_v33  ;;  %1221 = vmatpush1.msra.mxu0 %v5798_v61  ;;  %5817 = vst [vmem:[#allocation63_spill] sm:$0xff] %v3878_v18  ;;  %v3888_v33 = vand.u32 4294901760, %v151_v53  ;;  %v5824_v61 = vld [vmem:[#allocation55_spill] sm:$0xff]  ;;  %5826 = vst [vmem:[#allocation75_spill] sm:$0xff] %v3894_v21  ;;  %v5353_v58 = vand.u32 4294901760, %v3878_v18  ;;  %v139_v12 = vld [vmem:[#allocation5 + $0x138] sm:$0xff] }
 0x118   :  { %1446 = vmatpush2.msra.mxu1 %v5799_v1  ;;  %1225 = vmatprep.subr.mxu0 %v5801_v4  ;;  %v5825_v1 = vand.u32 4294901760, %v5706_v34  ;;  %v143_v4 = vld [vmem:[#allocation5 + $0x158] sm:$0xff]  ;;  %5832 = vst [vmem:[#allocation80_spill] sm:$0xff] %v3905_v35  ;;  %v142_v34 = vld [vmem:[#allocation5 + $0x150] sm:$0xff]  ;;  %v5866_v59 = vand.u32 4294901760, %v3894_v21 }
 0x119   :  { %1448 = vmatprep.subr.mxu1 %v5802_v9  ;;  %1229 = vmatpush1.msra.mxu0 %v5804_v14  ;;  %5823 = vst [vmem:[#allocation68_spill] sm:$0xff] %v3888_v33  ;;  %v5828_v9 = vld [vmem:[#allocation56_spill] sm:$0xff]  ;;  %v5830_v14 = vand.u32 4294901760, %v5829_v13 }
 0x11a   :  { %1450 = vmatpush2.msra.mxu1 %v5805_v25  ;;  %1233 = vmatprep.subr.mxu0 %v5807_v39  ;;  %v3903_v25 = vsub.f32 %v155_v8, %v3872_v6  ;;  %v5833_v39 = vld [vmem:[#allocation57_spill] sm:$0xff]  ;;  %v5839_v8 = vld [vmem:[#allocation51_spill] sm:$0xff] }
 0x11b   :  { %1452 = vmatprep.subr.mxu1 %v5809_v52  ;;  %1237 = vmatpush1.msra.mxu0 %v5811_v50  ;;  %v5835_v52 = vand.u32 4294901760, %v5834_v62  ;;  %v3912_v50 = vsub.f32 %v154_v24, %v3880_v19  ;;  %v5844_v24 = vld [vmem:[#allocation52_spill] sm:$0xff]  ;;  %v3932_v62 = vand.u32 4294901760, %v142_v34 }
 0x11c   :  { %1454 = vmatpush2.msra.mxu1 %v5814_v11  ;;  %1241 = vmatprep.subr.mxu0 %v5816_v16  ;;  %5831 = vst [vmem:[#allocation79_spill] sm:$0xff] %v3903_v25  ;;  %v3914_v11 = vand.u32 4294901760, %v146_v41  ;;  %v5838_v16 = vld [vmem:[#allocation58_spill] sm:$0xff]  ;;  %v5845_v13 = vand.u32 4294901760, %v5844_v24  ;;  %v3944_v24 = vsub.f32 %v147_v20, %v3905_v35 }
 0x11d   :  { %1456 = vmatprep.subr.mxu1 %v5819_v22  ;;  %1245 = vmatpush2.msra.mxu0 %v5821_v28  ;;  %5836 = vst [vmem:[#allocation89_spill] sm:$0xff] %v3912_v50  ;;  %v5840_v22 = vand.u32 4294901760, %v5839_v8  ;;  %v3921_v28 = vsub.f32 %v151_v53, %v3888_v33  ;;  %5847 = vst [vmem:[#allocation91_spill] sm:$0xff] %v3932_v62  ;;  %v5849_v53 = vld [vmem:[#allocation53_spill] sm:$0xff] }
 0x11e   :  { %1458 = vmatpush2.msra.mxu1 %v5824_v61  ;;  %1249 = vmatprep.subr.mxu0 %v5825_v1  ;;  %5837 = vst [vmem:[#allocation83_spill] sm:$0xff] %v3914_v11  ;;  %v3923_v61 = vand.u32 4294901760, %v143_v4  ;;  %v138_v1 = vld [vmem:[#allocation5 + $0x130] sm:$0xff]  ;;  %v5850_v8 = vand.u32 4294901760, %v5849_v53  ;;  %5851 = vst [vmem:[#allocation93_spill] sm:$0xff] %v3944_v24  ;;  %v3954_v53 = vsub.f32 %v3878_v18, %v5353_v58  ;;  %v5865_v18 = vand.u32 4294901760, %v5721_v32 }
 0x11f   :  { %1460 = vmatprep.subr.mxu1 %v5828_v9  ;;  %1253 = vmatpush2.msra.mxu0 %v5830_v14  ;;  %5841 = vst [vmem:[#allocation84_spill] sm:$0xff] %v3921_v28  ;;  %v5843_v9 = vld [vmem:[#allocation61_spill] sm:$0xff]  ;;  %v5853_v14 = vld [vmem:[#allocation66_spill] sm:$0xff]  ;;  %v3960_v20 = vand.u32 4294901760, %v138_v1 }
 0x120   :  { %1462 = vmatpush2.msra.mxu1 %v5833_v39  ;;  %1257 = vmatprep.subr.mxu0 %v5835_v52  ;;  %5842 = vst [vmem:[#allocation85_spill] sm:$0xff] %v3923_v61  ;;  %v3930_v39 = vsub.f32 %v150_v10, %v3896_v3  ;;  %v135_v52 = vld [vmem:[#allocation5 + $0x118] sm:$0xff]  ;;  %v3946_v10 = vand.u32 4294901760, %v139_v12  ;;  %v3972_v58 = vsub.f32 %v143_v4, %v3923_v61  ;;  %v5869_v4 = vld [vmem:[#allocation72_spill] sm:$0xff] }
 0x121   :  { %1464 = vmatprep.subr.mxu1 %v5838_v16  ;;  %1261 = vmatpush2.msra.mxu0 %v5840_v22  ;;  %v5848_v16 = vld [vmem:[#allocation62_spill] sm:$0xff]  ;;  %v3940_v22 = vsub.f32 %v3870_v49, %v5350_v29  ;;  %v3958_v29 = vsub.f32 %v146_v41, %v3914_v11  ;;  %5857 = vst [vmem:[#allocation18_spill] sm:$0xff] %v3960_v20  ;;  %v5864_v41 = vld [vmem:[#allocation71_spill] sm:$0xff] }
 0x122   :  { %1466 = vmatpush2.msra.mxu1 %v5843_v9  ;;  %1265 = vmatprep.subr.mxu0 %v5845_v13  ;;  %5846 = vst [vmem:[#allocation90_spill] sm:$0xff] %v3930_v39  ;;  %5852 = vst [vmem:[#allocation94_spill] sm:$0xff] %v3946_v10  ;;  %v134_v13 = vld [vmem:[#allocation5 + $0x110] sm:$0xff]  ;;  %v5858_v9 = vld [vmem:[#allocation70_spill] sm:$0xff]  ;;  %v4014_v32 = vsub.f32 %v138_v1, %v3960_v20  ;;  %v5900_v20 = vand.u32 4294901760, %v5735_v31 }
 0x123   :  { %1468 = vmatprep.subr.mxu1 %v5848_v16  ;;  %1269 = vmatpush2.msra.mxu0 %v5850_v8  ;;  %v5855_v16 = vand.u32 4294901760, %v5854_v23  ;;  %5856 = vst [vmem:[#allocation96_spill] sm:$0xff] %v3958_v29  ;;  %v5861_v23 = vand.u32 4294901760, %v3886_v17  ;;  %5862 = vst [vmem:[#allocation12_spill] sm:$0xff] %v3972_v58  ;;  %v3974_v8 = vand.u32 4294901760, %v135_v52  ;;  %v130_v1 = vld [vmem:[#allocation5 + $0xf0] sm:$0xff] }
 0x124   :  { %1470 = vmatpush2.msra.mxu1 %v5853_v14  ;;  %5877 = vst [vmem:[#allocation24_spill] sm:$0xff] %v4014_v32 }
 0x125   :  { %1273 = vmatprep.subr.mxu0 %v5855_v16  ;;  %1472 = vmatprep.subr.mxu1 %v5858_v9  ;;  %v3968_v14 = vsub.f32 %v3886_v17, %v5861_v23  ;;  %5863 = vst [vmem:[#allocation22_spill] sm:$0xff] %v3974_v8  ;;  %v3986_v23 = vsub.f32 %v142_v34, %v3932_v62  ;;  %v3988_v16 = vand.u32 4294901760, %v134_v13  ;;  %v5870_v17 = vld [vmem:[#allocation64_spill] sm:$0xff]  ;;  %v5874_v34 = vld [vmem:[#allocation73_spill] sm:$0xff] }
 0x126   :  { %1277 = vmatpush2.msra.mxu0 %v5860_v54  ;;  %1474 = vmatpush2.msra.mxu1 %v5864_v41  ;;  %v3982_v54 = vsub.f32 %v3894_v21, %v5866_v59  ;;  %v5871_v49 = vand.u32 4294901760, %v5870_v17  ;;  %v4001_v9 = vsub.f32 %v139_v12, %v3946_v10  ;;  %v5875_v21 = vand.u32 4294901760, %v5725_v48  ;;  %v131_v59 = vld [vmem:[#allocation5 + $0xf8] sm:$0xff] }
 0x127   :  { %1281 = vmatprep.subr.mxu0 %v5865_v18  ;;  %5867 = vst [vmem:[#allocation13_spill] sm:$0xff] %v3986_v23  ;;  %5868 = vst [vmem:[#allocation23_spill] sm:$0xff] %v3988_v16  ;;  %1476 = vmatprep.subr.mxu1 %v5869_v4  ;;  %v5872_v18 = vand.u32 4294901760, %v3903_v25  ;;  %v5878_v12 = vld [vmem:[#allocation74_spill] sm:$0xff]  ;;  %v5904_v10 = vand.u32 4294901760, %v5736_v2 }
 0x128   :  { %1285 = vmatpush2.msra.mxu0 %v5871_v49  ;;  %5873 = vst [vmem:[#allocation15_spill] sm:$0xff] %v4001_v9  ;;  %1478 = vmatpush2.msra.mxu1 %v5874_v34  ;;  %v5876_v49 = vand.u32 4294901760, %v3912_v50  ;;  %v5879_v34 = vand.u32 4294901760, %v5727_v38 }
 0x129   :  { %v3997_v41 = vsub.f32 %v3903_v25, %v5872_v18  ;;  %1289 = vmatprep.subr.mxu0 %v5875_v21  ;;  %1480 = vmatprep.subr.mxu1 %v5878_v12  ;;  %v5880_v21 = vand.u32 4294901760, %v3921_v28  ;;  %v4027_v18 = vsub.f32 %v135_v52, %v3974_v8  ;;  %v5883_v12 = vand.u32 4294901760, %v5729_v47  ;;  %v127_v52 = vld [vmem:[#allocation5 + $0xd8] sm:$0xff]  ;;  %v5887_v25 = vld [vmem:[#allocation69_spill] sm:$0xff] }
 0x12a   :  { %v4010_v4 = vsub.f32 %v3912_v50, %v5876_v49  ;;  %1293 = vmatpush2.msra.mxu0 %v5879_v34  ;;  %v5882_v50 = vld [vmem:[#allocation77_spill] sm:$0xff]  ;;  %v5884_v34 = vand.u32 4294901760, %v3930_v39  ;;  %v4040_v49 = vsub.f32 %v134_v13, %v3988_v16  ;;  %v5891_v13 = vld [vmem:[#allocation82_spill] sm:$0xff]  ;;  %v5892_v16 = vand.u32 4294901760, %v5732_v26 }
 0x12b   :  { %v4023_v17 = vsub.f32 %v3921_v28, %v5880_v21  ;;  %5881 = vst [vmem:[#allocation16_spill] sm:$0xff] %v4027_v18  ;;  %1482 = vmatpush2.msra.mxu1 %v5882_v50  ;;  %1297 = vmatprep.subr.mxu0 %v5883_v12  ;;  %v5886_v28 = vld [vmem:[#allocation78_spill] sm:$0xff]  ;;  %v5888_v50 = vand.u32 4294901760, %v5887_v25  ;;  %v5889_v12 = vand.u32 4294901760, %v3944_v24  ;;  %v126_v21 = vld [vmem:[#allocation5 + $0xd0] sm:$0xff]  ;;  %v4064_v47 = vand.u32 4294901760, %v130_v1 }
 0x12c   :  { %v4036_v48 = vsub.f32 %v3930_v39, %v5884_v34  ;;  %5885 = vst [vmem:[#allocation25_spill] sm:$0xff] %v4040_v49  ;;  %1484 = vmatprep.subr.mxu1 %v5886_v28  ;;  %v4052_v39 = vand.u32 4294901760, %v131_v59  ;;  %v5893_v28 = vand.u32 4294901760, %v3958_v29  ;;  %v123_v34 = vld [vmem:[#allocation5 + $0xb8] sm:$0xff]  ;;  %v5896_v8 = vand.u32 4294901760, %v5734_v45 }
 0x12d   :  { %1301 = vmatpush2.msra.mxu0 %v5888_v50  ;;  %v4049_v38 = vsub.f32 %v3944_v24, %v5889_v12  ;;  %1486 = vmatpush2.msra.mxu1 %v5891_v13  ;;  %5894 = vst [vmem:[#allocation26_spill] sm:$0xff] %v4064_v47  ;;  %v5895_v24 = vld [vmem:[#allocation86_spill] sm:$0xff]  ;;  %v4076_v25 = vand.u32 4294901760, %v127_v52  ;;  %v122_v12 = vld [vmem:[#allocation5 + $0xb0] sm:$0xff]  ;;  %v4088_v26 = vand.u32 4294901760, %v126_v21  ;;  %v4102_v45 = vand.u32 4294901760, %v123_v34 }
 0x12e   :  { %5890 = vst [vmem:[#allocation17_spill] sm:$0xff] %v4052_v39  ;;  %1305 = vmatprep.subr.mxu0 %v5892_v16  ;;  %v4061_v50 = vsub.f32 %v3958_v29, %v5893_v28  ;;  %1488 = vmatprep.subr.mxu1 %v5895_v24  ;;  %v5897_v16 = vand.u32 4294901760, %v3972_v58  ;;  %v5899_v29 = vld [vmem:[#allocation87_spill] sm:$0xff]  ;;  %v5901_v24 = vand.u32 4294901760, %v3986_v23  ;;  %v119_v28 = vld [vmem:[#allocation5 + $0x98] sm:$0xff] }
 0x12f   :  { %1309 = vmatpush2.msra.mxu0 %v5896_v8  ;;  %5898 = vst [vmem:[#allocation19_spill] sm:$0xff] %v4076_v25  ;;  %1490 = vmatpush2.msra.mxu1 %v5899_v29  ;;  %5902 = vst [vmem:[#allocation29_spill] sm:$0xff] %v4088_v26  ;;  %v5905_v29 = vand.u32 4294901760, %v4001_v9 }
 0x130   :  { %v4073_v13 = vsub.f32 %v3972_v58, %v5897_v16  ;;  %1313 = vmatprep.subr.mxu0 %v5900_v20  ;;  %v4085_v8 = vsub.f32 %v3986_v23, %v5901_v24  ;;  %v5903_v58 = vld [vmem:[#allocation88_spill] sm:$0xff]  ;;  %v4100_v24 = vsub.f32 %v131_v59, %v4052_v39  ;;  %5907 = vst [vmem:[#allocation30_spill] sm:$0xff] %v4102_v45  ;;  %v118_v16 = vld [vmem:[#allocation5 + $0x90] sm:$0xff]  ;;  %v4116_v59 = vand.u32 4294901760, %v122_v12 }
 0x131   :  { %1492 = vmatprep.subr.mxu1 %v5903_v58  ;;  %1317 = vmatpush2.msra.mxu0 %v5904_v10  ;;  %v4097_v20 = vsub.f32 %v4001_v9, %v5905_v29  ;;  %v5908_v23 = vld [vmem:[#allocation81_spill] sm:$0xff]  ;;  %v5910_v10 = vand.u32 4294901760, %v4014_v32  ;;  %v4114_v29 = vsub.f32 %v130_v1, %v4064_v47  ;;  %v115_v9 = vld [vmem:[#allocation5 + $0x78] sm:$0xff]  ;;  %v4130_v1 = vand.u32 4294901760, %v119_v28  ;;  %v5917_v47 = vld [vmem:[#allocation92_spill] sm:$0xff] }
 0x132   :  { %5906 = vst [vmem:[#allocation20_spill] sm:$0xff] %v4100_v24  ;;  %1494 = vmatpush2.msra.mxu1 %v3520_v0  ;;  %v5909_v58 = vand.u32 4294901760, %v5908_v23  ;;  %5912 = vst [vmem:[#allocation34_spill] sm:$0xff] %v4116_v59  ;;  %v5913_v0 = vand.u32 4294901760, %v5739_v42  ;;  %v4152_v42 = vsub.f32 %v123_v34, %v4102_v45  ;;  %v5929_v34 = vld [vmem:[#allocation97_spill] sm:$0xff]  ;;  %v5930_v45 = vand.u32 4294901760, %v3940_v22 }
 0x133   :  { %v4111_v31 = vsub.f32 %v4014_v32, %v5910_v10  ;;  %5911 = vst [vmem:[#allocation21_spill] sm:$0xff] %v4114_v29  ;;  %1496 = vmatprep.subr.mxu1 %v5738_v63  ;;  %v4128_v10 = vsub.f32 %v127_v52, %v4076_v25  ;;  %5916 = vst [vmem:[#allocation38_spill] sm:$0xff] %v4130_v1  ;;  %v114_v32 = vld [vmem:[#allocation5 + $0x70] sm:$0xff]  ;;  %v5918_v63 = vand.u32 4294901760, %v5740_v46  ;;  %v4144_v52 = vand.u32 4294901760, %v118_v16 }
 0x134   :  { %1321 = vmatprep.subr.mxu0 %v5909_v58  ;;  %v5914_v58 = vand.u32 4294901760, %v4027_v18  ;;  %1498 = vmatpush2.msra.mxu1 %v5917_v47  ;;  %v5922_v47 = vand.u32 4294901760, %v5741_v36  ;;  %5923 = vst [vmem:[#allocation31_spill] sm:$0xff] %v4152_v42  ;;  %v4164_v46 = vand.u32 4294901760, %v114_v32  ;;  %v106_v36 = vld [vmem:[#allocation5 + $0x30] sm:$0xff]  ;;  %v5941_v22 = vand.u32 4294901760, %v3968_v14 }
 0x135   :  { %1325 = vmatpush2.msra.mxu0 %v5913_v0  ;;  %5915 = vst [vmem:[#allocation27_spill] sm:$0xff] %v4128_v10  ;;  %v5919_v0 = vand.u32 4294901760, %v4040_v49  ;;  %5921 = vst [vmem:[#allocation39_spill] sm:$0xff] %v4144_v52  ;;  %1500 = vmatprep.subr.mxu1 %v3542_v55  ;;  %v102_v25 = vld [vmem:[#allocation5 + $0x10] sm:$0xff]  ;;  %v5947_v14 = vand.u32 4294901760, %v5745_v51 }
 0x136   :  { %v4125_v2 = vsub.f32 %v4027_v18, %v5914_v58  ;;  %1329 = vmatprep.subr.mxu0 %v5918_v63  ;;  %v4142_v58 = vsub.f32 %v126_v21, %v4088_v26  ;;  %v111_v18 = vld [vmem:[#allocation5 + $0x58] sm:$0xff]  ;;  %v5925_v21 = vld [vmem:[#allocation95_spill] sm:$0xff]  ;;  %v5926_v26 = vand.u32 4294901760, %v5742_v57  ;;  %5928 = vst [vmem:[#allocation41_spill] sm:$0xff] %v4164_v46  ;;  %v5937_v57 = vand.u32 4294901760, %v5744_v44 }
 0x137   :  { %v4139_v23 = vsub.f32 %v4040_v49, %v5919_v0  ;;  %1333 = vmatpush2.msra.mxu0 %v5922_v47  ;;  %v4154_v0 = vand.u32 4294901760, %v115_v9  ;;  %v110_v49 = vld [vmem:[#allocation5 + $0x50] sm:$0xff]  ;;  %1502 = vmatpush2.msra.mxu1 %v5925_v21  ;;  %v4162_v47 = vsub.f32 %v122_v12, %v4116_v59  ;;  %v107_v63 = vld [vmem:[#allocation5 + $0x38] sm:$0xff]  ;;  %v4174_v55 = vand.u32 4294901760, %v111_v18 }
 0x138   :  { %5920 = vst [vmem:[#allocation28_spill] sm:$0xff] %v4142_v58  ;;  %1337 = vmatprep.subr.mxu0 %v5926_v26  ;;  %1506 = vmatmul.mubr.f32.vlgmr.msra.gmra.mxu1 %v5929_v34  ;;  %v4172_v26 = vsub.f32 %v119_v28, %v4130_v1  ;;  %v5933_v12 = vand.u32 4294901760, %v5743_v56  ;;  %v5934_v59 = vand.u32 4294901760, %v3954_v53  ;;  %v4185_v21 = vand.u32 4294901760, %v110_v49  ;;  %v103_v28 = vld [vmem:[#allocation5 + $0x18] sm:$0xff] }
 0x139   :  { %5924 = vst [vmem:[#allocation40_spill] sm:$0xff] %v4154_v0  ;;  %5927 = vst [vmem:[#allocation32_spill] sm:$0xff] %v4162_v47  ;;  %1662 = vmatprep.subr.mxu1 %v5930_v45  ;;  %v4183_v45 = vsub.f32 %v118_v16, %v4144_v52  ;;  %2042 = vmatprep.mubr.f32.mxu1 %v3598_v43  ;;  %v5938_v56 = vand.u32 4294901760, %v4100_v24  ;;  %v4199_v16 = vand.u32 4294901760, %v107_v63  ;;  %v5942_v43 = vand.u32 4294901760, %v3537_v30 }
 0x13a   :  { %5931 = vst [vmem:[#allocation33_spill] sm:$0xff] %v4172_v26  ;;  %5932 = vst [vmem:[#allocation42_spill] sm:$0xff] %v4174_v55  ;;  %1341 = vmatpush2.msra.mxu0 %v5933_v12  ;;  %1668 = vmatpush1.msra.mxu1 %v5934_v59  ;;  %v4197_v12 = vsub.f32 %v115_v9, %v4154_v0  ;;  %v5943_v44 = vand.u32 4294901760, %v4114_v29  ;;  %v4212_v59 = vsub.f32 %v114_v32, %v4164_v46 }
 0x13b   :  { %5935 = vst [vmem:[#allocation35_spill] sm:$0xff] %v4183_v45  ;;  %5936 = vst [vmem:[#allocation45_spill] sm:$0xff] %v4185_v21  ;;  %1345 = vmatprep.subr.mxu0 %v5937_v57  ;;  %v4193_v53 = vsub.f32 %v4100_v24, %v5938_v56  ;;  %1674 = vmatprep.subr.mxu1 %v5941_v22  ;;  %v4214_v9 = vand.u32 4294901760, %v106_v36  ;;  %v5946_v24 = vand.u32 4294901760, %v3982_v54  ;;  %v5948_v30 = vand.u32 4294901760, %v4128_v10 }
 0x13c   :  { %5939 = vst [vmem:[#allocation36_spill] sm:$0xff] %v4197_v12  ;;  %5940 = vst [vmem:[#allocation46_spill] sm:$0xff] %v4199_v16  ;;  %1349 = vmatpush2.msra.mxu0 %v5942_v43  ;;  %v4208_v57 = vsub.f32 %v4114_v29, %v5943_v44  ;;  %v4227_v44 = vsub.f32 %v111_v18, %v4174_v55  ;;  %v4229_v32 = vand.u32 4294901760, %v103_v28  ;;  %v5951_v56 = vand.u32 4294901760, %v3997_v41 }
 0x13d   :  { %5944 = vst [vmem:[#allocation37_spill] sm:$0xff] %v4212_v59  ;;  %5945 = vst [vmem:[#allocation50_spill] sm:$0xff] %v4214_v9  ;;  %1680 = vmatpush1.msra.mxu1 %v5946_v24  ;;  %1353 = vmatprep.subr.mxu0 %v5947_v14  ;;  %v4223_v43 = vsub.f32 %v4128_v10, %v5948_v30  ;;  %v5952_v54 = vand.u32 4294901760, %v3548_v27  ;;  %v5953_v51 = vand.u32 4294901760, %v4142_v58  ;;  %v4244_v18 = vand.u32 4294901760, %v102_v25 }
 0x13e   :  { %5949 = vst [vmem:[#allocation43_spill] sm:$0xff] %v4227_v44  ;;  %5950 = vst [vmem:[#allocation54_spill] sm:$0xff] %v4229_v32  ;;  %1686 = vmatprep.subr.mxu1 %v5951_v56  ;;  %v4242_v30 = vsub.f32 %v110_v49, %v4185_v21  ;;  %v5956_v22 = vand.u32 4294901760, %v4010_v4  ;;  %v5957_v41 = vand.u32 4294901760, %v5746_v5  ;;  %v5958_v56 = vand.u32 4294901760, %v4152_v42 }
 0x13f   :  { %1357 = vmatpush2.msra.mxu0 %v5952_v54  ;;  %v4238_v24 = vsub.f32 %v4142_v58, %v5953_v51  ;;  %5955 = vst [vmem:[#allocation55_spill] sm:$0xff] %v4244_v18  ;;  %v4258_v49 = vsub.f32 %v107_v63, %v4199_v16  ;;  %v5960_v14 = vand.u32 4294901760, %v4023_v17  ;;  %v5961_v4 = vand.u32 4294901760, %v3568_v60  ;;  %v227_v63 = vld [vmem:[#allocation5 + $0x3f8] sm:$0xff] }
 0x140   :  { %5954 = vst [vmem:[#allocation44_spill] sm:$0xff] %v4242_v30  ;;  %1692 = vmatpush1.msra.mxu1 %v5956_v22  ;;  %1361 = vmatprep.subr.mxu0 %v5957_v41  ;;  %v4254_v54 = vsub.f32 %v4152_v42, %v5958_v56  ;;  %v5962_v22 = vand.u32 4294901760, %v4162_v47  ;;  %v4272_v27 = vsub.f32 %v106_v36, %v4214_v9  ;;  %v5964_v51 = vand.u32 4294901760, %v4036_v48  ;;  %v226_v36 = vld [vmem:[#allocation5 + $0x3f0] sm:$0xff]  ;;  %v5970_v56 = vld [vmem:[#allocation104_spill] sm:$0xff] }
 0x141   :  { %5959 = vst [vmem:[#allocation56_spill] sm:$0xff] %v4258_v49  ;;  %1698 = vmatprep.subr.mxu1 %v5960_v14  ;;  %1365 = vmatpush2.msra.mxu0 %v5961_v4  ;;  %v5965_v17 = vand.u32 4294901760, %v4172_v26  ;;  %v5967_v48 = vand.u32 4294901760, %v4049_v38  ;;  %v5968_v60 = vand.u32 4294901760, %v4183_v45  ;;  %v4298_v4 = vsub.f32 %v102_v25, %v4244_v18 }
 0x142   :  { %v4268_v41 = vsub.f32 %v4162_v47, %v5962_v22  ;;  %5963 = vst [vmem:[#allocation48_spill] sm:$0xff] %v4272_v27  ;;  %1704 = vmatpush1.msra.mxu1 %v5964_v51  ;;  %1369 = vmatmul.mubr.f32.vlgmr.msra.gmra.mxu0 %v5929_v34  ;;  %v4285_v22 = vsub.f32 %v103_v28, %v4229_v32  ;;  %v223_v28 = vld [vmem:[#allocation5 + $0x3d8] sm:$0xff]  ;;  %v5973_v25 = vand.u32 4294901760, %v4061_v50  ;;  %v5976_v47 = vand.u32 4294901760, %v4073_v13 }
 0x143   :  { %v4281_v14 = vsub.f32 %v4172_v26, %v5965_v17  ;;  %1513 = vmatprep.subr.mxu0 %v3849_v37  ;;  %1710 = vmatprep.subr.mxu1 %v5967_v48  ;;  %v4294_v5 = vsub.f32 %v4183_v45, %v5968_v60  ;;  %5969 = vst [vmem:[#allocation49_spill] sm:$0xff] %v4298_v4  ;;  %v5971_v48 = vand.u32 4294901760, %v4197_v12  ;;  %v4309_v45 = vand.u32 4294901760, %v227_v63  ;;  %v222_v17 = vld [vmem:[#allocation5 + $0x3d0] sm:$0xff]  ;;  %v219_v60 = vld [vmem:[#allocation5 + $0x3b8] sm:$0xff] }
 0x144   :  { %5966 = vst [vmem:[#allocation57_spill] sm:$0xff] %v4285_v22  ;;  %1515 = vmatpush1.msra.mxu0 %v3854_v7  ;;  %1645 = vmatprep.mubr.f32.mxu0 %v5970_v56  ;;  %v5974_v56 = vand.u32 4294901760, %v4212_v59  ;;  %v5979_v42 = vand.u32 4294901760, %v4085_v8  ;;  %v5982_v58 = vand.u32 4294901760, %v4097_v20  ;;  %v5986_v10 = vand.u32 4294901760, %v4111_v31 }
 0x145   :  { %v4306_v51 = vsub.f32 %v4197_v12, %v5971_v48  ;;  %5972 = vst [vmem:[#allocation58_spill] sm:$0xff] %v4309_v45  ;;  %1716 = vmatpush1.msra.mxu1 %v5973_v25  ;;  %1517 = vmatprep.subr.mxu0 %v3859_v15  ;;  %v4321_v12 = vand.u32 4294901760, %v226_v36  ;;  %v5977_v25 = vand.u32 4294901760, %v4227_v44  ;;  %v218_v48 = vld [vmem:[#allocation5 + $0x3b0] sm:$0xff]  ;;  %v5990_v29 = vand.u32 4294901760, %v4125_v2 }
 0x146   :  { %v4318_v38 = vsub.f32 %v4212_v59, %v5974_v56  ;;  %1722 = vmatprep.subr.mxu1 %v5976_v47  ;;  %1519 = vmatpush1.msra.mxu0 %v3864_v40  ;;  %v4333_v59 = vand.u32 4294901760, %v223_v28  ;;  %v5980_v47 = vand.u32 4294901760, %v4242_v30  ;;  %v215_v56 = vld [vmem:[#allocation5 + $0x398] sm:$0xff]  ;;  %v6022_v40 = vld [vmem:[#allocation23_spill] sm:$0xff] }
 0x147   :  { %5975 = vst [vmem:[#allocation51_spill] sm:$0xff] %v4321_v12  ;;  %v4330_v26 = vsub.f32 %v4227_v44, %v5977_v25  ;;  %1728 = vmatpush1.msra.mxu1 %v5979_v42  ;;  %1521 = vmatprep.subr.mxu0 %v3872_v6  ;;  %v4345_v44 = vand.u32 4294901760, %v222_v17  ;;  %v5983_v42 = vand.u32 4294901760, %v4258_v49  ;;  %v214_v25 = vld [vmem:[#allocation5 + $0x390] sm:$0xff]  ;;  %v6016_v6 = vand.u32 4294901760, %v4268_v41 }
 0x148   :  { %5978 = vst [vmem:[#allocation61_spill] sm:$0xff] %v4333_v59  ;;  %v4342_v50 = vsub.f32 %v4242_v30, %v5980_v47  ;;  %1734 = vmatprep.subr.mxu1 %v5982_v58  ;;  %1523 = vmatpush1.msra.mxu0 %v3880_v19  ;;  %v4357_v47 = vsub.f32 %v227_v63, %v4309_v45  ;;  %v4359_v30 = vand.u32 4294901760, %v219_v60  ;;  %v5987_v58 = vand.u32 4294901760, %v4272_v27  ;;  %v6012_v19 = vld [vmem:[#allocation18_spill] sm:$0xff] }
 0x149   :  { %5981 = vst [vmem:[#allocation52_spill] sm:$0xff] %v4345_v44  ;;  %v4354_v13 = vsub.f32 %v4258_v49, %v5983_v42  ;;  %1740 = vmatpush1.msra.mxu1 %v5986_v10  ;;  %1525 = vmatprep.subr.mxu0 %v3888_v33  ;;  %v4371_v42 = vsub.f32 %v226_v36, %v4321_v12  ;;  %v4373_v63 = vand.u32 4294901760, %v218_v48  ;;  %v211_v49 = vld [vmem:[#allocation5 + $0x378] sm:$0xff]  ;;  %v5991_v10 = vand.u32 4294901760, %v4285_v22 }
 0x14a   :  { %5984 = vst [vmem:[#allocation62_spill] sm:$0xff] %v4357_v47  ;;  %5985 = vst [vmem:[#allocation53_spill] sm:$0xff] %v4359_v30  ;;  %v4368_v8 = vsub.f32 %v4272_v27, %v5987_v58  ;;  %1746 = vmatprep.subr.mxu1 %v5990_v29  ;;  %1527 = vmatpush1.msra.mxu0 %v3896_v3  ;;  %v4385_v58 = vsub.f32 %v223_v28, %v4333_v59  ;;  %v4387_v36 = vand.u32 4294901760, %v215_v56  ;;  %v210_v27 = vld [vmem:[#allocation5 + $0x370] sm:$0xff] }
 0x14b   :  { %5988 = vst [vmem:[#allocation66_spill] sm:$0xff] %v4371_v42  ;;  %5989 = vst [vmem:[#allocation59_spill] sm:$0xff] %v4373_v63  ;;  %v4382_v20 = vsub.f32 %v4285_v22, %v5991_v10  ;;  %v5994_v33 = vand.u32 4294901760, %v4139_v23  ;;  %1529 = vmatprep.subr.mxu0 %v3905_v35  ;;  %v5995_v29 = vand.u32 4294901760, %v4298_v4  ;;  %v4399_v10 = vsub.f32 %v222_v17, %v4345_v44  ;;  %v207_v22 = vld [vmem:[#allocation5 + $0x358] sm:$0xff] }
 0x14c   :  { %5992 = vst [vmem:[#allocation70_spill] sm:$0xff] %v4385_v58  ;;  %5993 = vst [vmem:[#allocation60_spill] sm:$0xff] %v4387_v36  ;;  %v4401_v28 = vand.u32 4294901760, %v214_v25  ;;  %v5998_v3 = vand.u32 4294901760, %v4193_v53  ;;  %1531 = vmatpush1.msra.mxu0 %v3914_v11  ;;  %v4409_v2 = vsub.f32 %v219_v60, %v4359_v30  ;;  %v6001_v17 = vand.u32 4294901760, %v4208_v57  ;;  %v203_v23 = vld [vmem:[#allocation5 + $0x338] sm:$0xff] }
 0x14d   :  { %1752 = vmatpush1.msra.mxu1 %v5994_v33  ;;  %v4396_v31 = vsub.f32 %v4298_v4, %v5995_v29  ;;  %5996 = vst [vmem:[#allocation71_spill] sm:$0xff] %v4399_v10  ;;  %v4411_v29 = vand.u32 4294901760, %v211_v49  ;;  %v206_v4 = vld [vmem:[#allocation5 + $0x350] sm:$0xff]  ;;  %1533 = vmatprep.subr.mxu0 %v3923_v61  ;;  %v4419_v11 = vsub.f32 %v218_v48, %v4373_v63  ;;  %v4421_v33 = vand.u32 4294901760, %v210_v27  ;;  %v6008_v35 = vld [vmem:[#allocation94_spill] sm:$0xff] }
 0x14e   :  { %5997 = vst [vmem:[#allocation72_spill] sm:$0xff] %v4401_v28  ;;  %1758 = vmatprep.subr.mxu1 %v5998_v3  ;;  %5999 = vst [vmem:[#allocation64_spill] sm:$0xff] %v4409_v2  ;;  %v6004_v60 = vand.u32 4294901760, %v4223_v43  ;;  %1535 = vmatpush1.msra.mxu0 %v3932_v62  ;;  %v4429_v61 = vsub.f32 %v215_v56, %v4387_v36  ;;  %v4431_v53 = vand.u32 4294901760, %v207_v22  ;;  %v202_v3 = vld [vmem:[#allocation5 + $0x330] sm:$0xff]  ;;  %v6007_v48 = vand.u32 4294901760, %v4238_v24 }
 0x14f   :  { %6000 = vst [vmem:[#allocation73_spill] sm:$0xff] %v4411_v29  ;;  %1764 = vmatpush1.msra.mxu1 %v6001_v17  ;;  %6002 = vst [vmem:[#allocation74_spill] sm:$0xff] %v4419_v11  ;;  %1537 = vmatprep.subr.mxu0 %v6008_v35  ;;  %v4439_v62 = vsub.f32 %v214_v25, %v4401_v28  ;;  %v4441_v57 = vand.u32 4294901760, %v206_v4  ;;  %v199_v17 = vld [vmem:[#allocation5 + $0x318] sm:$0xff]  ;;  %v6011_v56 = vand.u32 4294901760, %v4254_v54  ;;  %v6013_v24 = vand.u32 4294901760, %v4357_v47 }
 0x150   :  { %6003 = vst [vmem:[#allocation77_spill] sm:$0xff] %v4421_v33  ;;  %1770 = vmatprep.subr.mxu1 %v6004_v60  ;;  %6005 = vst [vmem:[#allocation78_spill] sm:$0xff] %v4429_v61  ;;  %1539 = vmatpush1.msra.mxu0 %v6012_v19  ;;  %v4453_v60 = vsub.f32 %v211_v49, %v4411_v29  ;;  %v4455_v25 = vand.u32 4294901760, %v203_v23  ;;  %v198_v35 = vld [vmem:[#allocation5 + $0x310] sm:$0xff]  ;;  %v6017_v54 = vld [vmem:[#allocation22_spill] sm:$0xff]  ;;  %v4467_v43 = vsub.f32 %v210_v27, %v4421_v33 }
 0x151   :  { %6006 = vst [vmem:[#allocation69_spill] sm:$0xff] %v4431_v53  ;;  %1776 = vmatpush1.msra.mxu1 %v6007_v48  ;;  %6009 = vst [vmem:[#allocation82_spill] sm:$0xff] %v4439_v62  ;;  %v4449_v48 = vsub.f32 %v4357_v47, %v6013_v24  ;;  %1541 = vmatprep.subr.mxu0 %v6017_v54  ;;  %v4469_v49 = vand.u32 4294901760, %v202_v3  ;;  %v6021_v47 = vand.u32 4294901760, %v4281_v14  ;;  %v4483_v24 = vand.u32 4294901760, %v199_v17 }
 0x152   :  { %6010 = vst [vmem:[#allocation86_spill] sm:$0xff] %v4441_v57  ;;  %1782 = vmatprep.subr.mxu1 %v6011_v56  ;;  %6014 = vst [vmem:[#allocation87_spill] sm:$0xff] %v4453_v60  ;;  %v6018_v56 = vand.u32 4294901760, %v4371_v42  ;;  %1543 = vmatpush1.msra.mxu0 %v6022_v40  ;;  %v6026_v27 = vand.u32 4294901760, %v4294_v5  ;;  %v6027_v14 = vand.u32 4294901760, %v4399_v10  ;;  %v6031_v40 = vld [vmem:[#allocation26_spill] sm:$0xff] }
 0x153   :  { %6015 = vst [vmem:[#allocation88_spill] sm:$0xff] %v4455_v25  ;;  %1788 = vmatpush1.msra.mxu1 %v6016_v6  ;;  %6019 = vst [vmem:[#allocation81_spill] sm:$0xff] %v4467_v43  ;;  %v6023_v6 = vand.u32 4294901760, %v4385_v58  ;;  %1545 = vmatprep.subr.mxu0 %v4052_v39  ;;  %v1853_v5 = vand.u32 4294901760, %v4449_v48 }
 0x154   :  { %v4463_v19 = vsub.f32 %v4371_v42, %v6018_v56  ;;  %6020 = vst [vmem:[#allocation92_spill] sm:$0xff] %v4469_v49  ;;  %1794 = vmatprep.subr.mxu1 %v6021_v47  ;;  %v4481_v42 = vsub.f32 %v207_v22, %v4431_v53  ;;  %6025 = vst [vmem:[#allocation104_spill] sm:$0xff] %v4483_v24  ;;  %v4491_v47 = vsub.f32 %v4399_v10, %v6027_v14  ;;  %v6035_v10 = vld [vmem:[#allocation19_spill] sm:$0xff]  ;;  %v195_v14 = vld [vmem:[#allocation5 + $0x2f8] sm:$0xff] }
 0x155   :  { %v4477_v41 = vsub.f32 %v4385_v58, %v6023_v6  ;;  %1800 = vmatpush1.msra.mxu1 %v6026_v27  ;;  %v4495_v58 = vsub.f32 %v206_v4, %v4441_v57  ;;  %v4497_v56 = vand.u32 4294901760, %v198_v35  ;;  %v6030_v22 = vand.u32 4294901760, %v4306_v51  ;;  %1547 = vmatpush1.msra.mxu0 %v6031_v40 }
 0x156   :  { %6024 = vst [vmem:[#allocation95_spill] sm:$0xff] %v4481_v42  ;;  %v6032_v27 = vand.u32 4294901760, %v4409_v2  ;;  %v4510_v6 = vsub.f32 %v203_v23, %v4455_v25  ;;  %v6034_v4 = vand.u32 4294901760, %v4318_v38  ;;  %1549 = vmatprep.subr.mxu0 %v6035_v10  ;;  %v1859_v51 = vand.u32 4294901760, %v4463_v19  ;;  %v6039_v38 = vld [vmem:[#allocation29_spill] sm:$0xff] }
 0x157   :  { %6028 = vst [vmem:[#allocation105_spill] sm:$0xff] %v4495_v58  ;;  %6029 = vst [vmem:[#allocation106_spill] sm:$0xff] %v4497_v56  ;;  %1806 = vmatprep.subr.mxu1 %v6030_v22  ;;  %v6036_v22 = vand.u32 4294901760, %v4419_v11  ;;  %v6038_v23 = vand.u32 4294901760, %v4330_v26  ;;  %1551 = vmatpush1.msra.mxu0 %v6039_v38  ;;  %v6040_v19 = vand.u32 4294901760, %v4429_v61  ;;  %v6043_v26 = vld [vmem:[#allocation30_spill] sm:$0xff] }
 0x158   :  { %v4506_v39 = vsub.f32 %v4409_v2, %v6032_v27  ;;  %6033 = vst [vmem:[#allocation107_spill] sm:$0xff] %v4510_v6  ;;  %1812 = vmatpush1.msra.mxu1 %v6034_v4  ;;  %v4523_v2 = vsub.f32 %v202_v3, %v4469_v49  ;;  %v1865_v4 = vand.u32 4294901760, %v4477_v41  ;;  %v4536_v27 = vsub.f32 %v199_v17, %v4483_v24  ;;  %v194_v3 = vld [vmem:[#allocation5 + $0x2f0] sm:$0xff]  ;;  %v191_v17 = vld [vmem:[#allocation5 + $0x2d8] sm:$0xff] }
 0x159   :  { %v4519_v48 = vsub.f32 %v4419_v11, %v6036_v22  ;;  %1818 = vmatprep.subr.mxu1 %v6038_v23  ;;  %v4532_v10 = vsub.f32 %v4429_v61, %v6040_v19  ;;  %v6042_v11 = vand.u32 4294901760, %v4342_v50  ;;  %1553 = vmatprep.subr.mxu0 %v6043_v26  ;;  %v1871_v23 = vand.u32 4294901760, %v4491_v47  ;;  %v6047_v50 = vld [vmem:[#allocation34_spill] sm:$0xff]  ;;  %v190_v19 = vld [vmem:[#allocation5 + $0x2d0] sm:$0xff] }
 0x15a   :  { %6037 = vst [vmem:[#allocation108_spill] sm:$0xff] %v4523_v2  ;;  %6041 = vst [vmem:[#allocation109_spill] sm:$0xff] %v4536_v27  ;;  %v6044_v41 = vand.u32 4294901760, %v4439_v62  ;;  %v4549_v22 = vsub.f32 %v198_v35, %v4497_v56  ;;  %v6046_v61 = vand.u32 4294901760, %v4354_v13  ;;  %1555 = vmatpush1.msra.mxu0 %v6047_v50  ;;  %v6048_v47 = vand.u32 4294901760, %v4453_v60 }
 0x15b   :  { %1824 = vmatpush1.msra.mxu1 %v6042_v11  ;;  %v1877_v11 = vand.u32 4294901760, %v4506_v39  ;;  %v6050_v35 = vand.u32 4294901760, %v4368_v8  ;;  %1557 = vmatprep.subr.mxu0 %v4130_v1  ;;  %v6051_v13 = vand.u32 4294901760, %v4467_v43  ;;  %v6053_v50 = vand.u32 4294901760, %v4382_v20 }
 0x15c   :  { %v4545_v38 = vsub.f32 %v4439_v62, %v6044_v41  ;;  %6045 = vst [vmem:[#allocation110_spill] sm:$0xff] %v4549_v22  ;;  %1830 = vmatprep.subr.mxu1 %v6046_v61  ;;  %v4558_v26 = vsub.f32 %v4453_v60, %v6048_v47  ;;  %v4561_v62 = vand.u32 4294901760, %v195_v14  ;;  %v1883_v61 = vand.u32 4294901760, %v4519_v48  ;;  %v187_v41 = vld [vmem:[#allocation5 + $0x2b8] sm:$0xff]  ;;  %1559 = vmatpush1.msra.mxu0 %v4144_v52  ;;  %v186_v47 = vld [vmem:[#allocation5 + $0x2b0] sm:$0xff] }
 0x15d   :  { %1836 = vmatpush1.msra.mxu1 %v6050_v35  ;;  %v4570_v39 = vsub.f32 %v4467_v43, %v6051_v13  ;;  %v4573_v60 = vand.u32 4294901760, %v194_v3  ;;  %v1889_v8 = vand.u32 4294901760, %v4532_v10  ;;  %v6054_v35 = vand.u32 4294901760, %v4481_v42  ;;  %1561 = vmatprep.subr.mxu0 %v4154_v0  ;;  %v183_v13 = vld [vmem:[#allocation5 + $0x298] sm:$0xff] }
 0x15e   :  { %6049 = vst [vmem:[#allocation111_spill] sm:$0xff] %v4561_v62  ;;  %1842 = vmatprep.subr.mxu1 %v6053_v50  ;;  %v4585_v43 = vand.u32 4294901760, %v191_v17  ;;  %v6056_v1 = vand.u32 4294901760, %v4396_v31  ;;  %v1895_v20 = vand.u32 4294901760, %v4545_v38  ;;  %v6057_v50 = vand.u32 4294901760, %v4495_v58  ;;  %1563 = vmatpush1.msra.mxu0 %v4164_v46 }
 0x15f   :  { %6052 = vst [vmem:[#allocation112_spill] sm:$0xff] %v4573_v60  ;;  %v4582_v48 = vsub.f32 %v4481_v42, %v6054_v35  ;;  %v4597_v42 = vand.u32 4294901760, %v190_v19  ;;  %v1901_v31 = vand.u32 4294901760, %v4558_v26  ;;  %v4607_v38 = vsub.f32 %v195_v14, %v4561_v62  ;;  %1565 = vmatprep.subr.mxu0 %v4174_v55  ;;  %v179_v14 = vld [vmem:[#allocation5 + $0x278] sm:$0xff] }
 0x160   :  { %6055 = vst [vmem:[#allocation113_spill] sm:$0xff] %v4585_v43  ;;  %1848 = vmatpush1.msra.mxu1 %v6056_v1  ;;  %v4594_v10 = vsub.f32 %v4495_v58, %v6057_v50  ;;  %v6059_v1 = vand.u32 4294901760, %v4510_v6  ;;  %v4609_v50 = vand.u32 4294901760, %v187_v41  ;;  %v182_v58 = vld [vmem:[#allocation5 + $0x290] sm:$0xff]  ;;  %v6062_v35 = vand.u32 4294901760, %v4523_v2  ;;  %1567 = vmatpush1.msra.mxu0 %v4185_v21 }
 0x161   :  { %6058 = vst [vmem:[#allocation114_spill] sm:$0xff] %v4597_v42  ;;  %1854 = vmatprep.subr.mxu1 %v1853_v5  ;;  %6060 = vst [vmem:[#allocation115_spill] sm:$0xff] %v4607_v38  ;;  %v1907_v5 = vand.u32 4294901760, %v4570_v39  ;;  %v4619_v46 = vsub.f32 %v194_v3, %v4573_v60  ;;  %v4631_v55 = vsub.f32 %v191_v17, %v4585_v43  ;;  %v178_v3 = vld [vmem:[#allocation5 + $0x270] sm:$0xff]  ;;  %1569 = vmatprep.subr.mxu0 %v4199_v16  ;;  %v175_v17 = vld [vmem:[#allocation5 + $0x258] sm:$0xff] }
 0x162   :  { %v4604_v0 = vsub.f32 %v4510_v6, %v6059_v1  ;;  %6061 = vst [vmem:[#allocation116_spill] sm:$0xff] %v4609_v50  ;;  %1860 = vmatpush2.msra.mxu1 %v1859_v51  ;;  %v4616_v26 = vsub.f32 %v4523_v2, %v6062_v35  ;;  %v4621_v1 = vand.u32 4294901760, %v186_v47  ;;  %v1913_v51 = vand.u32 4294901760, %v4582_v48  ;;  %1571 = vmatpush1.msra.mxu0 %v4214_v9 }
 0x163   :  { %6063 = vst [vmem:[#allocation117_spill] sm:$0xff] %v4619_v46  ;;  %1866 = vmatprep.subr.mxu1 %v1865_v4  ;;  %v6064_v6 = vand.u32 4294901760, %v4536_v27  ;;  %6065 = vst [vmem:[#allocation118_spill] sm:$0xff] %v4631_v55  ;;  %v4633_v35 = vand.u32 4294901760, %v183_v13  ;;  %v1919_v4 = vand.u32 4294901760, %v4594_v10  ;;  %v6066_v2 = vand.u32 4294901760, %v4549_v22  ;;  %1573 = vmatprep.subr.mxu0 %v4229_v32 }
 0x164   :  { %1872 = vmatpush2.msra.mxu1 %v1871_v23  ;;  %v4643_v21 = vsub.f32 %v190_v19, %v4597_v42  ;;  %v1925_v23 = vand.u32 4294901760, %v4604_v0  ;;  %v4651_v10 = vsub.f32 %v187_v41, %v4609_v50  ;;  %v4653_v16 = vand.u32 4294901760, %v179_v14  ;;  %v171_v0 = vld [vmem:[#allocation5 + $0x238] sm:$0xff]  ;;  %1575 = vmatpush1.msra.mxu0 %v4244_v18 }
 0x165   :  { %v4628_v39 = vsub.f32 %v4536_v27, %v6064_v6  ;;  %v4640_v48 = vsub.f32 %v4549_v22, %v6066_v2  ;;  %v4645_v6 = vand.u32 4294901760, %v182_v58  ;;  %1878 = vmatprep.subr.mxu1 %v1877_v11  ;;  %v174_v2 = vld [vmem:[#allocation5 + $0x250] sm:$0xff]  ;;  %v1931_v19 = vand.u32 4294901760, %v4616_v26  ;;  %1577 = vmatprep.subr.mxu0 %v4309_v45 }
 0x166   :  { %6067 = vst [vmem:[#allocation119_spill] sm:$0xff] %v4643_v21  ;;  %1884 = vmatpush2.msra.mxu1 %v1883_v61  ;;  %v4659_v11 = vsub.f32 %v186_v47, %v4621_v1  ;;  %v4661_v9 = vand.u32 4294901760, %v178_v3  ;;  %v4667_v61 = vsub.f32 %v183_v13, %v4633_v35  ;;  %v4669_v32 = vand.u32 4294901760, %v175_v17  ;;  %v170_v26 = vld [vmem:[#allocation5 + $0x230] sm:$0xff]  ;;  %1579 = vmatpush2.msra.mxu0 %v4321_v12 }
 0x167   :  { %1890 = vmatprep.subr.mxu1 %v1889_v8  ;;  %v1937_v41 = vand.u32 4294901760, %v4628_v39  ;;  %v1943_v47 = vand.u32 4294901760, %v4640_v48  ;;  %v4675_v8 = vsub.f32 %v182_v58, %v4645_v6  ;;  %v4677_v18 = vand.u32 4294901760, %v174_v2  ;;  %v167_v39 = vld [vmem:[#allocation5 + $0x218] sm:$0xff]  ;;  %v166_v22 = vld [vmem:[#allocation5 + $0x210] sm:$0xff]  ;;  %1581 = vmatprep.subr.mxu0 %v4333_v59 }
 0x168   :  { %6068 = vst [vmem:[#allocation120_spill] sm:$0xff] %v4659_v11  ;;  %1896 = vmatpush2.msra.mxu1 %v1895_v20  ;;  %v6069_v13 = vand.u32 4294901760, %v4607_v38  ;;  %v4685_v45 = vsub.f32 %v179_v14, %v4653_v16  ;;  %v4687_v48 = vand.u32 4294901760, %v171_v0  ;;  %v6070_v58 = vand.u32 4294901760, %v4619_v46  ;;  %1583 = vmatpush2.msra.mxu0 %v4345_v44 }
 0x169   :  { %1902 = vmatprep.subr.mxu1 %v1901_v31  ;;  %v4695_v52 = vsub.f32 %v178_v3, %v4661_v9  ;;  %v6071_v14 = vand.u32 4294901760, %v4631_v55  ;;  %1585 = vmatprep.subr.mxu0 %v4359_v30  ;;  %v6072_v3 = vand.u32 4294901760, %v4643_v21  ;;  %v6073_v20 = vand.u32 4294901760, %v4651_v10 }
 0x16a   :  { %v1948_v27 = vsub.f32 %v4607_v38, %v6069_v13  ;;  %1908 = vmatpush2.msra.mxu1 %v1907_v5  ;;  %v1954_v31 = vsub.f32 %v4619_v46, %v6070_v58  ;;  %v4697_v13 = vand.u32 4294901760, %v170_v26  ;;  %v4705_v38 = vsub.f32 %v175_v17, %v4669_v32  ;;  %1587 = vmatpush2.msra.mxu0 %v4373_v63 }
 0x16b   :  { %1914 = vmatprep.subr.mxu1 %v1913_v51  ;;  %v1960_v5 = vsub.f32 %v4631_v55, %v6071_v14  ;;  %v4707_v58 = vand.u32 4294901760, %v167_v39  ;;  %v1966_v51 = vsub.f32 %v4643_v21, %v6072_v3  ;;  %v4715_v46 = vsub.f32 %v174_v2, %v4677_v18  ;;  %1589 = vmatprep.subr.mxu0 %v4387_v36 }
 0x16c   :  { %1920 = vmatpush2.msra.mxu1 %v1919_v4  ;;  %v4717_v14 = vand.u32 4294901760, %v166_v22  ;;  %v1949_v17 = vand.u32 4294901760, %v1948_v27  ;;  %v1972_v4 = vsub.f32 %v4651_v10, %v6073_v20  ;;  %v4725_v30 = vsub.f32 %v171_v0, %v4687_v48  ;;  %1591 = vmatpush2.msra.mxu0 %v4401_v28 }
 0x16d   :  { %1926 = vmatprep.subr.mxu1 %v1925_v23  ;;  %v1955_v2 = vand.u32 4294901760, %v1954_v31  ;;  %v6074_v3 = vand.u32 4294901760, %v4659_v11  ;;  %v4733_v27 = vsub.f32 %v170_v26, %v4697_v13  ;;  %v1961_v20 = vand.u32 4294901760, %v1960_v5  ;;  %1593 = vmatprep.subr.mxu0 %v4411_v29 }
 0x16e   :  { %1932 = vmatpush2.msra.mxu1 %v1931_v19  ;;  %v6075_v0 = vand.u32 4294901760, %v4667_v61  ;;  %v4741_v31 = vsub.f32 %v167_v39, %v4707_v58  ;;  %v6076_v26 = vand.u32 4294901760, %v4675_v8  ;;  %v4749_v5 = vsub.f32 %v166_v22, %v4717_v14  ;;  %1595 = vmatpush2.msra.mxu0 %v4421_v33 }
 0x16f   :  { %v1978_v23 = vsub.f32 %v4659_v11, %v6074_v3  ;;  %1938 = vmatprep.subr.mxu1 %v1937_v41  ;;  %v1967_v3 = vand.u32 4294901760, %v1966_v51  ;;  %v6078_v39 = vand.u32 4294901760, %v4685_v45  ;;  %1597 = vmatprep.subr.mxu0 %v4431_v53 }
 0x170   :  { %v1984_v19 = vsub.f32 %v4667_v61, %v6075_v0  ;;  %1944 = vmatpush2.msra.mxu1 %v1943_v47  ;;  %v1990_v41 = vsub.f32 %v4675_v8, %v6076_v26  ;;  %6077 = vst [vmem:[#allocation121_spill] sm:$0xff] %v4749_v5  ;;  %v1973_v0 = vand.u32 4294901760, %v1972_v4  ;;  %v6079_v26 = vand.u32 4294901760, %v4695_v52  ;;  %1599 = vmatpush2.msra.mxu0 %v4441_v57 }
 0x171   :  { %1950 = vmatprep.subr.mxu1 %v1949_v17  ;;  %v1996_v47 = vsub.f32 %v4685_v45, %v6078_v39  ;;  %v1979_v51 = vand.u32 4294901760, %v1978_v23  ;;  %v6080_v4 = vand.u32 4294901760, %v4705_v38  ;;  %1601 = vmatprep.subr.mxu0 %v4455_v25  ;;  %v6081_v23 = vand.u32 4294901760, %v4715_v46 }
 0x172   :  { %1956 = vmatpush2.msra.mxu1 %v1955_v2  ;;  %v2002_v12 = vsub.f32 %v4695_v52, %v6079_v26  ;;  %v1985_v17 = vand.u32 4294901760, %v1984_v19  ;;  %v1991_v2 = vand.u32 4294901760, %v1990_v41  ;;  %v5522_v22 = vand.u32 4294901760, %v4749_v5  ;;  %1603 = vmatpush2.msra.mxu0 %v4469_v49 }
 0x173   :  { %1962 = vmatprep.subr.mxu1 %v1961_v20  ;;  %v2008_v39 = vsub.f32 %v4705_v38, %v6080_v4  ;;  %v2014_v26 = vsub.f32 %v4715_v46, %v6081_v23  ;;  %v1997_v20 = vand.u32 4294901760, %v1996_v47  ;;  %v6082_v19 = vand.u32 4294901760, %v4725_v30  ;;  %1605 = vmatprep.subr.mxu0 %v4483_v24 }
 0x174   :  { %1968 = vmatpush2.msra.mxu1 %v1967_v3  ;;  %v2003_v3 = vand.u32 4294901760, %v2002_v12  ;;  %v6083_v41 = vand.u32 4294901760, %v4733_v27  ;;  %1607 = vmatpush2.msra.mxu0 %v4497_v56  ;;  %v2038_v12 = vsub.f32 %v4749_v5, %v5522_v22  ;;  %v6101_v22 = vld [vmem:[#allocation79_spill] sm:$0xff] }
 0x175   :  { %1974 = vmatprep.subr.mxu1 %v1973_v0  ;;  %v2020_v4 = vsub.f32 %v4725_v30, %v6082_v19  ;;  %v2009_v23 = vand.u32 4294901760, %v2008_v39  ;;  %v6084_v0 = vand.u32 4294901760, %v4741_v31  ;;  %1609 = vmatprep.subr.mxu0 %v4561_v62  ;;  %v2015_v19 = vand.u32 4294901760, %v2014_v26  ;;  %v6086_v26 = vld [vmem:[#allocation14_spill] sm:$0xff] }
 0x176   :  { %1980 = vmatpush2.msra.mxu1 %v1979_v51  ;;  %v2026_v55 = vsub.f32 %v4733_v27, %v6083_v41  ;;  %1611 = vmatpush2.msra.mxu0 %v4573_v60  ;;  %v6090_v41 = vld [vmem:[#allocation76_spill] sm:$0xff] }
 0x177   :  { %1986 = vmatprep.subr.mxu1 %v1985_v17  ;;  %v2032_v47 = vsub.f32 %v4741_v31, %v6084_v0  ;;  %v2021_v51 = vand.u32 4294901760, %v2020_v4  ;;  %1613 = vmatprep.subr.mxu0 %v4585_v43  ;;  %v6088_v4 = vld [vmem:[#allocation65_spill] sm:$0xff]  ;;  %v6092_v0 = vld [vmem:[#allocation11_spill] sm:$0xff] }
 0x178   :  { %1992 = vmatpush2.msra.mxu1 %v1991_v2  ;;  %v2027_v17 = vand.u32 4294901760, %v2026_v55  ;;  %1615 = vmatpush2.msra.mxu0 %v4597_v42  ;;  %v2039_v2 = vand.u32 4294901760, %v2038_v12  ;;  %v6085_v55 = vld [vmem:[#allocation102_spill] sm:$0xff]  ;;  %v6095_v12 = vld [vmem:[#allocation100_spill] sm:$0xff] }
 0x179   :  { %1998 = vmatprep.subr.mxu1 %v1997_v20  ;;  %v2033_v39 = vand.u32 4294901760, %v2032_v47  ;;  %1617 = vmatprep.subr.mxu0 %v4609_v50  ;;  %v6087_v20 = vld [vmem:[#allocation47_spill] sm:$0xff]  ;;  %v6093_v47 = vld [vmem:[#allocation80_spill] sm:$0xff] }
 0x17a   :  { %2004 = vmatpush2.msra.mxu1 %v2003_v3  ;;  %1619 = vmatpush2.msra.mxu0 %v4621_v1  ;;  %v6089_v3 = vld [vmem:[#allocation68_spill] sm:$0xff] }
 0x17b   :  { %2010 = vmatprep.subr.mxu1 %v2009_v23  ;;  %1621 = vmatprep.subr.mxu0 %v4633_v35  ;;  %v6091_v23 = vld [vmem:[#allocation103_spill] sm:$0xff] }
 0x17c   :  { %2016 = vmatpush2.msra.mxu1 %v2015_v19  ;;  %1623 = vmatpush2.msra.mxu0 %v4645_v6  ;;  %v6094_v19 = vld [vmem:[#allocation63_spill] sm:$0xff] }
 0x17d   :  { %2022 = vmatprep.subr.mxu1 %v2021_v51  ;;  %1625 = vmatprep.subr.mxu0 %v4653_v16  ;;  %v6096_v51 = vld [vmem:[#allocation83_spill] sm:$0xff] }
 0x17e   :  { %2028 = vmatpush2.msra.mxu1 %v2027_v17  ;;  %1627 = vmatpush2.msra.mxu0 %v4661_v9  ;;  %v6097_v17 = vld [vmem:[#allocation67_spill] sm:$0xff] }
 0x17f   :  { %2034 = vmatprep.subr.mxu1 %v2033_v39  ;;  %1629 = vmatprep.subr.mxu0 %v4669_v32  ;;  %v6098_v39 = vld [vmem:[#allocation85_spill] sm:$0xff] }
 0x180   :  { %2040 = vmatpush2.msra.mxu1 %v2039_v2  ;;  %1631 = vmatpush2.msra.mxu0 %v4677_v18  ;;  %v6099_v2 = vld [vmem:[#allocation75_spill] sm:$0xff] }
 0x181   :  { %2044 = vmatmul.mubr.f32.vlgmr.msra.gmra.mxu1 %v5929_v34  ;;  %2254 = vmatprep.subr.mxu1 %v3849_v37  ;;  %v6103_v34 = vld [vmem:[#allocation89_spill] sm:$0xff] }
 0x182   :  { %2256 = vmatpush1.msra.mxu1 %v3854_v7  ;;  %2384 = vmatprep.mubr.f32.mxu1 %v6085_v55  ;;  %v6100_v55 = vld [vmem:[#allocation91_spill] sm:$0xff] }
 0x183   :  { %2258 = vmatprep.subr.mxu1 %v3859_v15  ;;  %1633 = vmatprep.subr.mxu0 %v4687_v48 }
 0x184   :  { %2260 = vmatpush1.msra.mxu1 %v6086_v26  ;;  %1635 = vmatpush2.msra.mxu0 %v4697_v13 }
 0x185   :  { %2262 = vmatprep.subr.mxu1 %v6087_v20  ;;  %1637 = vmatprep.subr.mxu0 %v4707_v58 }
 0x186   :  { %2264 = vmatpush1.msra.mxu1 %v6088_v4  ;;  %1639 = vmatpush2.msra.mxu0 %v4717_v14 }
 0x187   :  { %2266 = vmatprep.subr.mxu1 %v6089_v3  ;;  %1651 = vmatmul.mubr.f32.vlgmr.msra.gmra.mxu0 %v6091_v23  ;;  %v6102_v23 = vld [vmem:[#allocation94_spill] sm:$0xff] }
 0x188   :  { %2268 = vmatpush1.msra.mxu1 %v6090_v41  ;;  %2052 = vmatprep.subr.mxu0 %v6092_v0 }
 0x189   :  { %2270 = vmatprep.subr.mxu1 %v6093_v47  ;;  %2055 = vmatpush1.msra.mxu0 %v6094_v19  ;;  %v6104_v47 = vld [vmem:[#allocation18_spill] sm:$0xff]  ;;  %v6105_v19 = vld [vmem:[#allocation84_spill] sm:$0xff] }
 0x18a   :  { %2244 = vmatprep.mubr.f32.mxu0 %v6095_v12  ;;  %2272 = vmatpush1.msra.mxu1 %v6096_v51  ;;  %v6106_v12 = vld [vmem:[#allocation90_spill] sm:$0xff] }
 0x18b   :  { %2058 = vmatprep.subr.mxu0 %v6097_v17  ;;  %2274 = vmatprep.subr.mxu1 %v6098_v39  ;;  %v6107_v17 = vld [vmem:[#allocation23_spill] sm:$0xff]  ;;  %v6108_v39 = vld [vmem:[#allocation93_spill] sm:$0xff] }
 0x18c   :  { %2061 = vmatpush1.msra.mxu0 %v6099_v2  ;;  %2276 = vmatpush1.msra.mxu1 %v6100_v55  ;;  %v6109_v2 = vld [vmem:[#allocation17_spill] sm:$0xff]  ;;  %v6110_v55 = vld [vmem:[#allocation96_spill] sm:$0xff] }
 0x18d   :  { %2064 = vmatprep.subr.mxu0 %v6101_v22  ;;  %2278 = vmatprep.subr.mxu1 %v6102_v23  ;;  %v6111_v23 = vld [vmem:[#allocation12_spill] sm:$0xff] }
 0x18e   :  { %2067 = vmatpush1.msra.mxu0 %v6103_v34  ;;  %2280 = vmatpush1.msra.mxu1 %v6104_v47  ;;  %v6112_v34 = vld [vmem:[#allocation19_spill] sm:$0xff]  ;;  %v6113_v47 = vld [vmem:[#allocation13_spill] sm:$0xff] }
 0x18f   :  { %2070 = vmatprep.subr.mxu0 %v6105_v19  ;;  %2282 = vmatprep.subr.mxu1 %v6017_v54  ;;  %v6114_v19 = vld [vmem:[#allocation29_spill] sm:$0xff]  ;;  %v6115_v54 = vld [vmem:[#allocation15_spill] sm:$0xff] }
 0x190   :  { %2073 = vmatpush1.msra.mxu0 %v6106_v12  ;;  %2284 = vmatpush1.msra.mxu1 %v6107_v17  ;;  %v6116_v12 = vld [vmem:[#allocation30_spill] sm:$0xff]  ;;  %v6117_v17 = vld [vmem:[#allocation24_spill] sm:$0xff] }
 0x191   :  { %2076 = vmatprep.subr.mxu0 %v6108_v39  ;;  %2286 = vmatprep.subr.mxu1 %v6109_v2  ;;  %v6118_v39 = vld [vmem:[#allocation34_spill] sm:$0xff]  ;;  %v6119_v2 = vld [vmem:[#allocation16_spill] sm:$0xff] }
 0x192   :  { %2079 = vmatpush1.msra.mxu0 %v6110_v55  ;;  %2288 = vmatpush1.msra.mxu1 %v6031_v40  ;;  %v6120_v55 = vld [vmem:[#allocation38_spill] sm:$0xff]  ;;  %v6121_v40 = vld [vmem:[#allocation25_spill] sm:$0xff] }
 0x193   :  { %2082 = vmatprep.subr.mxu0 %v6111_v23  ;;  %2290 = vmatprep.subr.mxu1 %v6112_v34  ;;  %v6122_v23 = vld [vmem:[#allocation39_spill] sm:$0xff]  ;;  %v6123_v34 = vld [vmem:[#allocation20_spill] sm:$0xff] }
 0x194   :  { %2085 = vmatpush1.msra.mxu0 %v6113_v47  ;;  %2292 = vmatpush1.msra.mxu1 %v6114_v19  ;;  %v6124_v47 = vld [vmem:[#allocation40_spill] sm:$0xff]  ;;  %v6125_v19 = vld [vmem:[#allocation21_spill] sm:$0xff] }
 0x195   :  { %2088 = vmatprep.subr.mxu0 %v6115_v54  ;;  %2294 = vmatprep.subr.mxu1 %v6116_v12  ;;  %v6126_v54 = vld [vmem:[#allocation41_spill] sm:$0xff]  ;;  %v6127_v12 = vld [vmem:[#allocation27_spill] sm:$0xff] }
 0x196   :  { %2091 = vmatpush1.msra.mxu0 %v6117_v17  ;;  %2296 = vmatpush1.msra.mxu1 %v6118_v39  ;;  %v6128_v17 = vld [vmem:[#allocation42_spill] sm:$0xff]  ;;  %v6129_v39 = vld [vmem:[#allocation28_spill] sm:$0xff] }
 0x197   :  { %2094 = vmatprep.subr.mxu0 %v6119_v2  ;;  %2298 = vmatprep.subr.mxu1 %v6120_v55  ;;  %v6130_v2 = vld [vmem:[#allocation45_spill] sm:$0xff]  ;;  %v6131_v55 = vld [vmem:[#allocation31_spill] sm:$0xff] }
 0x198   :  { %2097 = vmatpush1.msra.mxu0 %v6121_v40  ;;  %2300 = vmatpush1.msra.mxu1 %v6122_v23  ;;  %v6132_v40 = vld [vmem:[#allocation46_spill] sm:$0xff]  ;;  %v6133_v23 = vld [vmem:[#allocation32_spill] sm:$0xff] }
 0x199   :  { %2100 = vmatprep.subr.mxu0 %v6123_v34  ;;  %2302 = vmatprep.subr.mxu1 %v6124_v47  ;;  %v6134_v34 = vld [vmem:[#allocation50_spill] sm:$0xff]  ;;  %v6135_v47 = vld [vmem:[#allocation33_spill] sm:$0xff] }
 0x19a   :  { %2103 = vmatpush1.msra.mxu0 %v6125_v19  ;;  %2304 = vmatpush1.msra.mxu1 %v6126_v54  ;;  %v6136_v19 = vld [vmem:[#allocation54_spill] sm:$0xff]  ;;  %v6137_v54 = vld [vmem:[#allocation35_spill] sm:$0xff] }
 0x19b   :  { %2106 = vmatprep.subr.mxu0 %v6127_v12  ;;  %2306 = vmatprep.subr.mxu1 %v6128_v17  ;;  %v6138_v12 = vld [vmem:[#allocation55_spill] sm:$0xff]  ;;  %v6139_v17 = vld [vmem:[#allocation36_spill] sm:$0xff] }
 0x19c   :  { %2109 = vmatpush1.msra.mxu0 %v6129_v39  ;;  %2308 = vmatpush1.msra.mxu1 %v6130_v2  ;;  %v6140_v39 = vld [vmem:[#allocation58_spill] sm:$0xff]  ;;  %v6141_v2 = vld [vmem:[#allocation37_spill] sm:$0xff] }
 0x19d   :  { %2112 = vmatprep.subr.mxu0 %v6131_v55  ;;  %2310 = vmatprep.subr.mxu1 %v6132_v40  ;;  %v6142_v55 = vld [vmem:[#allocation51_spill] sm:$0xff] }
 0x19e   :  { %2115 = vmatpush1.msra.mxu0 %v6133_v23  ;;  %2312 = vmatpush1.msra.mxu1 %v6134_v34  ;;  %v6143_v40 = vld [vmem:[#allocation43_spill] sm:$0xff]  ;;  %v6144_v34 = vld [vmem:[#allocation44_spill] sm:$0xff] }
 0x19f   :  { %2118 = vmatprep.subr.mxu0 %v6135_v47  ;;  %2314 = vmatprep.subr.mxu1 %v6136_v19  ;;  %v6145_v19 = vld [vmem:[#allocation56_spill] sm:$0xff] }
 0x1a0   :  { %2121 = vmatpush1.msra.mxu0 %v6137_v54  ;;  %2316 = vmatpush1.msra.mxu1 %v6138_v12  ;;  %v6146_v54 = vld [vmem:[#allocation53_spill] sm:$0xff]  ;;  %v6147_v12 = vld [vmem:[#allocation48_spill] sm:$0xff] }
 0x1a1   :  { %2124 = vmatprep.subr.mxu0 %v6139_v17  ;;  %2318 = vmatprep.subr.mxu1 %v6140_v39  ;;  %v6148_v39 = vld [vmem:[#allocation57_spill] sm:$0xff] }
 0x1a2   :  { %2127 = vmatpush1.msra.mxu0 %v6141_v2  ;;  %2320 = vmatpush2.msra.mxu1 %v6142_v55  ;;  %v6149_v55 = vld [vmem:[#allocation49_spill] sm:$0xff] }
 0x1a3   :  { %2130 = vmatprep.subr.mxu0 %v6143_v40  ;;  %2322 = vmatprep.subr.mxu1 %v4333_v59  ;;  %v6150_v59 = vld [vmem:[#allocation62_spill] sm:$0xff] }
 0x1a4   :  { %2133 = vmatpush1.msra.mxu0 %v6144_v34  ;;  %2324 = vmatpush2.msra.mxu1 %v4345_v44  ;;  %v6151_v44 = vld [vmem:[#allocation66_spill] sm:$0xff] }
 0x1a5   :  { %2136 = vmatprep.subr.mxu0 %v6145_v19  ;;  %2326 = vmatprep.subr.mxu1 %v6146_v54  ;;  %v6152_v54 = vld [vmem:[#allocation70_spill] sm:$0xff] }
 0x1a6   :  { %2139 = vmatpush1.msra.mxu0 %v6147_v12  ;;  %2328 = vmatpush2.msra.mxu1 %v4373_v63  ;;  %v6153_v63 = vld [vmem:[#allocation71_spill] sm:$0xff] }
 0x1a7   :  { %2142 = vmatprep.subr.mxu0 %v6148_v39  ;;  %2330 = vmatprep.subr.mxu1 %v4387_v36  ;;  %v6154_v36 = vld [vmem:[#allocation64_spill] sm:$0xff] }
 0x1a8   :  { %2145 = vmatpush1.msra.mxu0 %v6149_v55  ;;  %2332 = vmatpush2.msra.mxu1 %v4401_v28  ;;  %v6155_v28 = vld [vmem:[#allocation74_spill] sm:$0xff] }
 0x1a9   :  { %2148 = vmatprep.subr.mxu0 %v6150_v59  ;;  %2334 = vmatprep.subr.mxu1 %v4411_v29  ;;  %v6156_v29 = vld [vmem:[#allocation78_spill] sm:$0xff] }
 0x1aa   :  { %2151 = vmatpush2.msra.mxu0 %v6151_v44  ;;  %2336 = vmatpush2.msra.mxu1 %v4421_v33  ;;  %v6157_v33 = vld [vmem:[#allocation82_spill] sm:$0xff] }
 0x1ab   :  { %2154 = vmatprep.subr.mxu0 %v6152_v54  ;;  %2338 = vmatprep.subr.mxu1 %v4431_v53  ;;  %v6158_v53 = vld [vmem:[#allocation87_spill] sm:$0xff] }
 0x1ac   :  { %2157 = vmatpush2.msra.mxu0 %v6153_v63  ;;  %2340 = vmatpush2.msra.mxu1 %v4441_v57  ;;  %v6159_v57 = vld [vmem:[#allocation81_spill] sm:$0xff] }
 0x1ad   :  { %2160 = vmatprep.subr.mxu0 %v6154_v36  ;;  %2342 = vmatprep.subr.mxu1 %v4455_v25  ;;  %v6160_v25 = vld [vmem:[#allocation95_spill] sm:$0xff] }
 0x1ae   :  { %2163 = vmatpush2.msra.mxu0 %v6155_v28  ;;  %2344 = vmatpush2.msra.mxu1 %v4469_v49  ;;  %v6161_v49 = vld [vmem:[#allocation105_spill] sm:$0xff] }
 0x1af   :  { %2166 = vmatprep.subr.mxu0 %v6156_v29  ;;  %2346 = vmatprep.subr.mxu1 %v4483_v24  ;;  %v6162_v24 = vld [vmem:[#allocation107_spill] sm:$0xff] }
 0x1b0   :  { %2169 = vmatpush2.msra.mxu0 %v6157_v33  ;;  %2348 = vmatpush2.msra.mxu1 %v4497_v56  ;;  %v6163_v56 = vld [vmem:[#allocation108_spill] sm:$0xff] }
 0x1b1   :  { %2172 = vmatprep.subr.mxu0 %v6158_v53  ;;  %2350 = vmatprep.subr.mxu1 %v4561_v62  ;;  %v6164_v62 = vld [vmem:[#allocation109_spill] sm:$0xff] }
 0x1b2   :  { %2175 = vmatpush2.msra.mxu0 %v6159_v57  ;;  %2352 = vmatpush2.msra.mxu1 %v4573_v60  ;;  %v6165_v60 = vld [vmem:[#allocation110_spill] sm:$0xff] }
 0x1b3   :  { %2178 = vmatprep.subr.mxu0 %v6160_v25  ;;  %2354 = vmatprep.subr.mxu1 %v4585_v43  ;;  %v6166_v43 = vld [vmem:[#allocation115_spill] sm:$0xff] }
 0x1b4   :  { %2181 = vmatpush2.msra.mxu0 %v6161_v49  ;;  %2356 = vmatpush2.msra.mxu1 %v4597_v42  ;;  %v6167_v42 = vld [vmem:[#allocation117_spill] sm:$0xff] }
 0x1b5   :  { %2184 = vmatprep.subr.mxu0 %v6162_v24  ;;  %2358 = vmatprep.subr.mxu1 %v4609_v50  ;;  %v6168_v50 = vld [vmem:[#allocation118_spill] sm:$0xff] }
 0x1b6   :  { %2187 = vmatpush2.msra.mxu0 %v6163_v56  ;;  %2360 = vmatpush2.msra.mxu1 %v4621_v1 }
 0x1b7   :  { %2190 = vmatprep.subr.mxu0 %v6164_v62  ;;  %2362 = vmatprep.subr.mxu1 %v4633_v35 }
 0x1b8   :  { %2193 = vmatpush2.msra.mxu0 %v6165_v60  ;;  %2364 = vmatpush2.msra.mxu1 %v4645_v6 }
 0x1b9   :  { %2196 = vmatprep.subr.mxu0 %v6166_v43  ;;  %2366 = vmatprep.subr.mxu1 %v4653_v16 }
 0x1ba   :  { %2199 = vmatpush2.msra.mxu0 %v6167_v42  ;;  %2368 = vmatpush2.msra.mxu1 %v4661_v9 }
 0x1bb   :  { %2202 = vmatprep.subr.mxu0 %v6168_v50  ;;  %2370 = vmatprep.subr.mxu1 %v4669_v32 }
 0x1bc   :  { %2205 = vmatpush2.msra.mxu0 %v4643_v21  ;;  %2372 = vmatpush2.msra.mxu1 %v4677_v18  ;;  %v6169_v21 = vld [vmem:[#allocation101_spill] sm:$0xff] }
 0x1bd   :  { %2208 = vmatprep.subr.mxu0 %v4651_v10  ;;  %2374 = vmatprep.subr.mxu1 %v4687_v48 }
 0x1be   :  { %2211 = vmatpush2.msra.mxu0 %v4659_v11  ;;  %2376 = vmatpush2.msra.mxu1 %v4697_v13  ;;  %v6170_v11 = vld [vmem:[#allocation98_spill] sm:$0xff] }
 0x1bf   :  { %2214 = vmatprep.subr.mxu0 %v4667_v61  ;;  %2378 = vmatprep.subr.mxu1 %v4707_v58 }
 0x1c0   :  { %2217 = vmatpush2.msra.mxu0 %v4675_v8  ;;  %2380 = vmatpush2.msra.mxu1 %v4717_v14 }
 0x1c1   :  { %2220 = vmatprep.subr.mxu0 %v4685_v45  ;;  %2388 = vmatmul.mubr.f32.vlgmr.msra.gmra.mxu1 %v6169_v21  ;;  %v6174_v21 = vld [vmem:[#allocation63_spill] sm:$0xff] }
 0x1c2   :  { %2660 = vmatprep.subr.mxu1 %v3849_v37  ;;  %2223 = vmatpush2.msra.mxu0 %v4695_v52  ;;  %v6171_v37 = vld [vmem:[#allocation99_spill] sm:$0xff] }
 0x1c3   :  { %2662 = vmatpush1.msra.mxu1 %v3854_v7  ;;  %2788 = vmatprep.mubr.f32.mxu1 %v6170_v11  ;;  %v6172_v7 = vand.u32 4294901760, %v6092_v0  ;;  %v6182_v0 = vand.u32 4294901760, %v6101_v22 }
 0x1c4   :  { %2226 = vmatprep.subr.mxu0 %v4705_v38  ;;  %2664 = vmatprep.subr.mxu1 %v3859_v15  ;;  %v6173_v15 = vld [vmem:[#allocation80_spill] sm:$0xff] }
 0x1c5   :  { %2229 = vmatpush2.msra.mxu0 %v4715_v46  ;;  %2666 = vmatpush1.msra.mxu1 %v6086_v26  ;;  %v6175_v26 = vand.u32 4294901760, %v6174_v21 }
 0x1c6   :  { %2232 = vmatprep.subr.mxu0 %v4725_v30  ;;  %2668 = vmatprep.subr.mxu1 %v6087_v20  ;;  %v6176_v20 = vld [vmem:[#allocation67_spill] sm:$0xff] }
 0x1c7   :  { %2235 = vmatpush2.msra.mxu0 %v4733_v27  ;;  %2670 = vmatpush1.msra.mxu1 %v6088_v4  ;;  %v6177_v4 = vand.u32 4294901760, %v6176_v20  ;;  %v6189_v20 = vld [vmem:[#allocation22_spill] sm:$0xff] }
 0x1c8   :  { %2238 = vmatprep.subr.mxu0 %v4741_v31  ;;  %2672 = vmatprep.subr.mxu1 %v6089_v3  ;;  %v6178_v3 = vld [vmem:[#allocation85_spill] sm:$0xff] }
 0x1c9   :  { %2241 = vmatpush2.msra.mxu0 %v4749_v5  ;;  %2674 = vmatpush1.msra.mxu1 %v6090_v41  ;;  %v6179_v41 = vld [vmem:[#allocation75_spill] sm:$0xff] }
 0x1ca   :  { %2247 = vmatmul.mubr.f32.vlgmr.msra.gmra.mxu0 %v6171_v37  ;;  %2397 = vmatprep.subr.mxu0 %v6172_v7  ;;  %v6180_v5 = vand.u32 4294901760, %v6179_v41  ;;  %v6181_v37 = vld [vmem:[#allocation91_spill] sm:$0xff]  ;;  %v6183_v7 = vld [vmem:[#allocation94_spill] sm:$0xff]  ;;  %v6193_v41 = vld [vmem:[#allocation93_spill] sm:$0xff] }
 0x1cb   :  { %2676 = vmatprep.subr.mxu1 %v6173_v15  ;;  %2401 = vmatpush1.msra.mxu0 %v6175_v26  ;;  %v6184_v15 = vld [vmem:[#allocation89_spill] sm:$0xff]  ;;  %v6194_v22 = vand.u32 4294901760, %v6193_v41  ;;  %v6207_v41 = vld [vmem:[#allocation30_spill] sm:$0xff] }
 0x1cc   :  { %2651 = vmatprep.mubr.f32.mxu0 %v6170_v11  ;;  %2678 = vmatpush1.msra.mxu1 %v6096_v51  ;;  %v6185_v21 = vand.u32 4294901760, %v6184_v15  ;;  %v6186_v11 = vld [vmem:[#allocation18_spill] sm:$0xff]  ;;  %v6187_v51 = vld [vmem:[#allocation84_spill] sm:$0xff] }
 0x1cd   :  { %2405 = vmatprep.subr.mxu0 %v6177_v4  ;;  %2680 = vmatprep.subr.mxu1 %v6178_v3  ;;  %v6188_v26 = vand.u32 4294901760, %v6187_v51  ;;  %v6190_v4 = vld [vmem:[#allocation90_spill] sm:$0xff]  ;;  %v6201_v51 = vld [vmem:[#allocation19_spill] sm:$0xff] }
 0x1ce   :  { %2409 = vmatpush1.msra.mxu0 %v6180_v5  ;;  %2682 = vmatpush1.msra.mxu1 %v6181_v37  ;;  %v6191_v3 = vand.u32 4294901760, %v6190_v4  ;;  %v6192_v5 = vld [vmem:[#allocation23_spill] sm:$0xff]  ;;  %v6195_v37 = vld [vmem:[#allocation17_spill] sm:$0xff]  ;;  %v6198_v15 = vld [vmem:[#allocation26_spill] sm:$0xff] }
 0x1cf   :  { %2413 = vmatprep.subr.mxu0 %v6182_v0  ;;  %2684 = vmatprep.subr.mxu1 %v6183_v7  ;;  %v6196_v0 = vld [vmem:[#allocation96_spill] sm:$0xff]  ;;  %v6204_v4 = vld [vmem:[#allocation29_spill] sm:$0xff] }
 0x1d0   :  { %2417 = vmatpush1.msra.mxu0 %v6185_v21  ;;  %2686 = vmatpush1.msra.mxu1 %v6186_v11  ;;  %v6197_v7 = vand.u32 4294901760, %v6196_v0  ;;  %v6199_v21 = vld [vmem:[#allocation12_spill] sm:$0xff]  ;;  %v6210_v0 = vld [vmem:[#allocation34_spill] sm:$0xff] }
 0x1d1   :  { %2421 = vmatprep.subr.mxu0 %v6188_v26  ;;  %2688 = vmatprep.subr.mxu1 %v6189_v20  ;;  %v6200_v11 = vand.u32 4294901760, %v6199_v21  ;;  %v6202_v26 = vld [vmem:[#allocation13_spill] sm:$0xff]  ;;  %v6213_v21 = vld [vmem:[#allocation38_spill] sm:$0xff] }
 0x1d2   :  { %2425 = vmatpush1.msra.mxu0 %v6191_v3  ;;  %2690 = vmatpush1.msra.mxu1 %v6192_v5  ;;  %v6203_v20 = vand.u32 4294901760, %v6202_v26  ;;  %v6205_v3 = vld [vmem:[#allocation15_spill] sm:$0xff] }
 0x1d3   :  { %2429 = vmatprep.subr.mxu0 %v6194_v22  ;;  %2692 = vmatprep.subr.mxu1 %v6195_v37  ;;  %v6206_v5 = vand.u32 4294901760, %v6205_v3  ;;  %v6208_v22 = vld [vmem:[#allocation24_spill] sm:$0xff]  ;;  %v6216_v26 = vld [vmem:[#allocation39_spill] sm:$0xff] }
 0x1d4   :  { %2433 = vmatpush1.msra.mxu0 %v6197_v7  ;;  %2694 = vmatpush1.msra.mxu1 %v6198_v15  ;;  %v6209_v37 = vand.u32 4294901760, %v6208_v22  ;;  %v6211_v7 = vld [vmem:[#allocation16_spill] sm:$0xff]  ;;  %v6222_v22 = vld [vmem:[#allocation41_spill] sm:$0xff] }
 0x1d5   :  { %2437 = vmatprep.subr.mxu0 %v6200_v11  ;;  %2696 = vmatprep.subr.mxu1 %v6201_v51  ;;  %v6212_v15 = vand.u32 4294901760, %v6211_v7  ;;  %v6214_v11 = vld [vmem:[#allocation25_spill] sm:$0xff]  ;;  %v6219_v3 = vld [vmem:[#allocation40_spill] sm:$0xff]  ;;  %v6225_v7 = vld [vmem:[#allocation42_spill] sm:$0xff] }
 0x1d6   :  { %2441 = vmatpush1.msra.mxu0 %v6203_v20  ;;  %2698 = vmatpush1.msra.mxu1 %v6204_v4  ;;  %v6215_v51 = vand.u32 4294901760, %v6214_v11  ;;  %v6217_v20 = vld [vmem:[#allocation20_spill] sm:$0xff]  ;;  %v6228_v11 = vld [vmem:[#allocation45_spill] sm:$0xff] }
 0x1d7   :  { %2445 = vmatprep.subr.mxu0 %v6206_v5  ;;  %2700 = vmatprep.subr.mxu1 %v6207_v41  ;;  %v6218_v4 = vand.u32 4294901760, %v6217_v20  ;;  %v6220_v5 = vld [vmem:[#allocation21_spill] sm:$0xff]  ;;  %v6231_v20 = vld [vmem:[#allocation46_spill] sm:$0xff] }
 0x1d8   :  { %2449 = vmatpush1.msra.mxu0 %v6209_v37  ;;  %2702 = vmatpush1.msra.mxu1 %v6210_v0  ;;  %v6221_v41 = vand.u32 4294901760, %v6220_v5  ;;  %v6223_v37 = vld [vmem:[#allocation27_spill] sm:$0xff]  ;;  %v6234_v5 = vand.u32 4294901760, %v6135_v47  ;;  %v6243_v47 = vand.u32 4294901760, %v6143_v40  ;;  %v6251_v40 = vand.u32 4294901760, %v6148_v39 }
 0x1d9   :  { %2453 = vmatprep.subr.mxu0 %v6212_v15  ;;  %2704 = vmatprep.subr.mxu1 %v6213_v21  ;;  %v6224_v0 = vand.u32 4294901760, %v6223_v37  ;;  %v6226_v15 = vld [vmem:[#allocation28_spill] sm:$0xff]  ;;  %v6259_v39 = vand.u32 4294901760, %v6152_v54  ;;  %v6267_v54 = vand.u32 4294901760, %v6156_v29  ;;  %v6275_v29 = vand.u32 4294901760, %v6160_v25 }
 0x1da   :  { %2457 = vmatpush1.msra.mxu0 %v6215_v51  ;;  %2706 = vmatpush1.msra.mxu1 %v6216_v26  ;;  %v6227_v21 = vand.u32 4294901760, %v6226_v15  ;;  %v6229_v51 = vld [vmem:[#allocation31_spill] sm:$0xff]  ;;  %v6240_v15 = vld [vmem:[#allocation58_spill] sm:$0xff]  ;;  %v6282_v25 = vand.u32 4294901760, %v6164_v62  ;;  %v6286_v62 = vand.u32 4294901760, %v6168_v50 }
 0x1db   :  { %2461 = vmatprep.subr.mxu0 %v6218_v4  ;;  %2708 = vmatprep.subr.mxu1 %v6219_v3  ;;  %v6230_v26 = vand.u32 4294901760, %v6229_v51  ;;  %v6232_v4 = vand.u32 4294901760, %v6133_v23  ;;  %v6233_v3 = vld [vmem:[#allocation50_spill] sm:$0xff]  ;;  %v6241_v23 = vand.u32 4294901760, %v6141_v2  ;;  %v6245_v51 = vand.u32 4294901760, %v6144_v34 }
 0x1dc   :  { %2465 = vmatpush1.msra.mxu0 %v6221_v41  ;;  %2710 = vmatpush1.msra.mxu1 %v6222_v22  ;;  %v6235_v41 = vld [vmem:[#allocation54_spill] sm:$0xff]  ;;  %v6236_v22 = vld [vmem:[#allocation35_spill] sm:$0xff]  ;;  %v6249_v2 = vand.u32 4294901760, %v6147_v12  ;;  %v6253_v34 = vand.u32 4294901760, %v6149_v55  ;;  %v6257_v12 = vand.u32 4294901760, %v6151_v44  ;;  %v6261_v55 = vand.u32 4294901760, %v6153_v63 }
 0x1dd   :  { %2469 = vmatprep.subr.mxu0 %v6224_v0  ;;  %2712 = vmatprep.subr.mxu1 %v6225_v7  ;;  %v6237_v37 = vand.u32 4294901760, %v6236_v22  ;;  %v6238_v0 = vld [vmem:[#allocation55_spill] sm:$0xff]  ;;  %v6239_v7 = vand.u32 4294901760, %v6139_v17  ;;  %v6247_v17 = vand.u32 4294901760, %v6145_v19  ;;  %v6255_v19 = vand.u32 4294901760, %v6150_v59  ;;  %v6258_v22 = vld [vmem:[#allocation77_spill] sm:$0xff] }
 0x1de   :  { %2473 = vmatpush1.msra.mxu0 %v6227_v21  ;;  %2714 = vmatpush1.msra.mxu1 %v6228_v11  ;;  %v6242_v21 = vld [vmem:[#allocation51_spill] sm:$0xff]  ;;  %v6244_v11 = vld [vmem:[#allocation61_spill] sm:$0xff]  ;;  %v6263_v59 = vand.u32 4294901760, %v6154_v36  ;;  %v6265_v44 = vand.u32 4294901760, %v6155_v28  ;;  %v6269_v63 = vand.u32 4294901760, %v6157_v33  ;;  %v6271_v36 = vand.u32 4294901760, %v6158_v53 }
 0x1df   :  { %2477 = vmatprep.subr.mxu0 %v6230_v26  ;;  %2716 = vmatprep.subr.mxu1 %v6231_v20  ;;  %v6246_v26 = vld [vmem:[#allocation52_spill] sm:$0xff]  ;;  %v6248_v20 = vld [vmem:[#allocation53_spill] sm:$0xff]  ;;  %v6273_v28 = vand.u32 4294901760, %v6159_v57  ;;  %v6277_v33 = vand.u32 4294901760, %v6161_v49  ;;  %v6279_v53 = vand.u32 4294901760, %v6162_v24  ;;  %v6281_v57 = vand.u32 4294901760, %v6163_v56 }
 0x1e0   :  { %2481 = vmatpush1.msra.mxu0 %v6232_v4  ;;  %2718 = vmatpush1.msra.mxu1 %v6233_v3  ;;  %v6250_v4 = vld [vmem:[#allocation59_spill] sm:$0xff]  ;;  %v6252_v3 = vld [vmem:[#allocation60_spill] sm:$0xff]  ;;  %v6283_v49 = vand.u32 4294901760, %v6165_v60  ;;  %v6284_v24 = vand.u32 4294901760, %v6166_v43  ;;  %v6285_v56 = vand.u32 4294901760, %v6167_v42  ;;  %v6289_v43 = vand.u32 4294901760, %v4651_v10 }
 0x1e1   :  { %2485 = vmatprep.subr.mxu0 %v6234_v5  ;;  %2720 = vmatprep.subr.mxu1 %v6235_v41  ;;  %v6254_v5 = vld [vmem:[#allocation72_spill] sm:$0xff]  ;;  %v6256_v41 = vld [vmem:[#allocation73_spill] sm:$0xff]  ;;  %v6287_v60 = vld [vmem:[#allocation119_spill] sm:$0xff] }
 0x1e2   :  { %2489 = vmatpush1.msra.mxu0 %v6237_v37  ;;  %2722 = vmatpush1.msra.mxu1 %v6238_v0  ;;  %v6260_v37 = vld [vmem:[#allocation69_spill] sm:$0xff]  ;;  %v6262_v0 = vld [vmem:[#allocation86_spill] sm:$0xff] }
 0x1e3   :  { %2493 = vmatprep.subr.mxu0 %v6239_v7  ;;  %2724 = vmatprep.subr.mxu1 %v6240_v15  ;;  %v6264_v7 = vld [vmem:[#allocation88_spill] sm:$0xff] }
 0x1e4   :  { %2497 = vmatpush1.msra.mxu0 %v6241_v23  ;;  %2726 = vmatpush2.msra.mxu1 %v6242_v21  ;;  %v6266_v15 = vld [vmem:[#allocation92_spill] sm:$0xff]  ;;  %v6270_v21 = vld [vmem:[#allocation106_spill] sm:$0xff] }
 0x1e5   :  { %2501 = vmatprep.subr.mxu0 %v6243_v47  ;;  %2728 = vmatprep.subr.mxu1 %v6244_v11  ;;  %v6268_v23 = vld [vmem:[#allocation104_spill] sm:$0xff]  ;;  %v6272_v47 = vld [vmem:[#allocation111_spill] sm:$0xff] }
 0x1e6   :  { %2505 = vmatpush1.msra.mxu0 %v6245_v51  ;;  %2730 = vmatpush2.msra.mxu1 %v6246_v26  ;;  %v6274_v11 = vld [vmem:[#allocation112_spill] sm:$0xff]  ;;  %v368_v51 = vpop.f32.mrf.mxu0  ;;  %v6276_v26 = vld [vmem:[#allocation113_spill] sm:$0xff] }
 0x1e7   :  { %2509 = vmatprep.subr.mxu0 %v6247_v17  ;;  %2732 = vmatprep.subr.mxu1 %v6248_v20  ;;  %v6278_v17 = vld [vmem:[#allocation114_spill] sm:$0xff]  ;;  %v6280_v20 = vld [vmem:[#allocation116_spill] sm:$0xff] }
 0x1e8   :  { %2513 = vmatpush1.msra.mxu0 %v6249_v2  ;;  %2734 = vmatpush2.msra.mxu1 %v6250_v4  ;;  %v761_v2 = vpop.f32.mrf.mxu1  ;;  %v370_v4 = vpop.f32.mrf.mxu0 }
 0x1e9   :  { %2517 = vmatprep.subr.mxu0 %v6251_v40  ;;  %2736 = vmatprep.subr.mxu1 %v6252_v3 }
 0x1ea   :  { %2521 = vmatpush1.msra.mxu0 %v6253_v34  ;;  %2738 = vmatpush2.msra.mxu1 %v6254_v5  ;;  %v964_v40 = vpop.f32.mrf.mxu0 }
 0x1eb   :  { %2525 = vmatprep.subr.mxu0 %v6255_v19  ;;  %2740 = vmatprep.subr.mxu1 %v6256_v41  ;;  %v6295_v19 = vld [vmem:[#allocation97_spill] sm:$0xff]  ;;  %v6296_v41 = vand.u32 4294901760, %v4695_v52  ;;  %v6301_v52 = vand.u32 4294901760, %v4741_v31 }
 0x1ec   :  { %2529 = vmatpush2.msra.mxu0 %v6257_v12  ;;  %2742 = vmatpush2.msra.mxu1 %v6258_v22  ;;  %v966_v42 = vpop.f32.mrf.mxu0 }
 0x1ed   :  { %2533 = vmatprep.subr.mxu0 %v6259_v39  ;;  %2744 = vmatprep.subr.mxu1 %v6260_v37  ;;  %v6300_v39 = vand.u32 4294901760, %v4733_v27 }
 0x1ee   :  { %2537 = vmatpush2.msra.mxu0 %v6261_v55  ;;  %2746 = vmatpush2.msra.mxu1 %v6262_v0 }
 0x1ef   :  { %2541 = vmatprep.subr.mxu0 %v6263_v59  ;;  %2748 = vmatprep.subr.mxu1 %v6264_v7  ;;  %v6302_v59 = vld [vmem:[#allocation121_spill] sm:$0xff] }
 0x1f0   :  { %2545 = vmatpush2.msra.mxu0 %v6265_v44  ;;  %2750 = vmatpush2.msra.mxu1 %v6266_v15  ;;  %v6303_v7 = vand.u32 4294901760, %v6302_v59 }
 0x1f1   :  { %2549 = vmatprep.subr.mxu0 %v6267_v54  ;;  %2752 = vmatprep.subr.mxu1 %v6268_v23 }
 0x1f2   :  { %2553 = vmatpush2.msra.mxu0 %v6269_v63  ;;  %2754 = vmatpush2.msra.mxu1 %v6270_v21 }
 0x1f3   :  { %2557 = vmatprep.subr.mxu0 %v6271_v36  ;;  %2756 = vmatprep.subr.mxu1 %v6272_v47 }
 0x1f4   :  { %2561 = vmatpush2.msra.mxu0 %v6273_v28  ;;  %2758 = vmatpush2.msra.mxu1 %v6274_v11 }
 0x1f5   :  { %2565 = vmatprep.subr.mxu0 %v6275_v29  ;;  %2760 = vmatprep.subr.mxu1 %v6276_v26 }
 0x1f6   :  { %2569 = vmatpush2.msra.mxu0 %v6277_v33  ;;  %2762 = vmatpush2.msra.mxu1 %v6278_v17 }
 0x1f7   :  { %2573 = vmatprep.subr.mxu0 %v6279_v53  ;;  %2764 = vmatprep.subr.mxu1 %v6280_v20 }
 0x1f8   :  { %2577 = vmatpush2.msra.mxu0 %v6281_v57  ;;  %2766 = vmatpush2.msra.mxu1 %v4621_v1  ;;  %v763_v1 = vpop.f32.mrf.mxu1 }
 0x1f9   :  { %2581 = vmatprep.subr.mxu0 %v6282_v25  ;;  %2768 = vmatprep.subr.mxu1 %v4633_v35  ;;  %v6288_v35 = vand.u32 4294901760, %v6287_v60  ;;  %v764_v50 = vadd.f32 %v763_v1, %v370_v4 }
 0x1fa   :  { %2585 = vmatpush2.msra.mxu0 %v6283_v49  ;;  %2770 = vmatpush2.msra.mxu1 %v4645_v6  ;;  %v762_v6 = vadd.f32 %v761_v2, %v368_v51 }
 0x1fb   :  { %2589 = vmatprep.subr.mxu0 %v6284_v24  ;;  %2772 = vmatprep.subr.mxu1 %v4653_v16  ;;  %v1105_v16 = vpop.f32.mrf.mxu1  ;;  %v967_v10 = vadd.f32 %v966_v42, %v764_v50 }
 0x1fc   :  { %2593 = vmatpush2.msra.mxu0 %v6285_v56  ;;  %2774 = vmatpush2.msra.mxu1 %v4661_v9  ;;  %v6290_v9 = vld [vmem:[#allocation120_spill] sm:$0xff]  ;;  %v965_v34 = vadd.f32 %v964_v40, %v762_v6 }
 0x1fd   :  { %2597 = vmatprep.subr.mxu0 %v6286_v62  ;;  %2776 = vmatprep.subr.mxu1 %v4669_v32  ;;  %v6291_v3 = vand.u32 4294901760, %v6290_v9  ;;  %v6292_v32 = vand.u32 4294901760, %v4667_v61  ;;  %v1107_v5 = vpop.f32.mrf.mxu1  ;;  %v6297_v61 = vand.u32 4294901760, %v4705_v38 }
 0x1fe   :  { %2601 = vmatpush2.msra.mxu0 %v6288_v35  ;;  %2778 = vmatpush2.msra.mxu1 %v4677_v18  ;;  %v6293_v18 = vand.u32 4294901760, %v4675_v8  ;;  %v6298_v8 = vand.u32 4294901760, %v4715_v46  ;;  %v1108_v22 = vadd.f32 %v1107_v5, %v967_v10 }
 0x1ff   :  { %2605 = vmatprep.subr.mxu0 %v6289_v43  ;;  %2780 = vmatprep.subr.mxu1 %v4687_v48  ;;  %v6294_v48 = vand.u32 4294901760, %v4685_v45 }
 0x200   :  { %2609 = vmatpush2.msra.mxu0 %v6291_v3  ;;  %2782 = vmatpush2.msra.mxu1 %v4697_v13  ;;  %v1106_v13 = vadd.f32 %v1105_v16, %v965_v34 }
 0x201   :  { %2613 = vmatprep.subr.mxu0 %v6292_v32  ;;  %2784 = vmatprep.subr.mxu1 %v4707_v58  ;;  %v1507_v58 = vpop.f32.mrf.mxu1 }
 0x202   :  { %2617 = vmatpush2.msra.mxu0 %v6293_v18  ;;  %2786 = vmatpush2.msra.mxu1 %v4717_v14  ;;  %v1370_v12 = vpop.f32.mrf.mxu0  ;;  %v6299_v14 = vand.u32 4294901760, %v4725_v30 }
 0x203   :  { %2621 = vmatprep.subr.mxu0 %v6294_v48  ;;  %2790 = vmatmul.mubr.f32.vlgmr.msra.gmra.mxu1 %v6295_v19  ;;  %v1371_v45 = vadd.f32 %v1370_v12, %v1106_v13  ;;  %v1509_v0 = vpop.f32.mrf.mxu1 }
 0x204   :  { %2625 = vmatpush2.msra.mxu0 %v6296_v41  ;;  %v1372_v37 = vpop.f32.mrf.mxu0 }
 0x205   :  { %2629 = vmatprep.subr.mxu0 %v6297_v61  ;;  %v1508_v38 = vadd.f32 %v1507_v58, %v1371_v45  ;;  %v1373_v55 = vadd.f32 %v1372_v37, %v1108_v22 }
 0x206   :  { %2633 = vmatpush2.msra.mxu0 %v6298_v8 }
 0x207   :  { %2637 = vmatprep.subr.mxu0 %v6299_v14  ;;  %2796 = vst [vmem:[#allocation7] sm:$0xff] %v1508_v38  ;;  %v1510_v46 = vadd.f32 %v1509_v0, %v1373_v55 }
 0x208   :  { %2641 = vmatpush2.msra.mxu0 %v6300_v39 }
 0x209   :  { %2645 = vmatprep.subr.mxu0 %v6301_v52  ;;  %2797 = vst [vmem:[#allocation7 + $0x8] sm:$0xff] %v1510_v46 }
 0x20a   :  { %2649 = vmatpush2.msra.mxu0 %v6303_v7 }
 0x20b   :  { %2653 = vmatmul.mubr.f32.vlgmr.msra.gmra.mxu0 %v6295_v19 }
 0x241   :  { %v2045_v44 = vpop.f32.mrf.mxu1 }
 0x243   :  { %v2047_v54 = vpop.f32.mrf.mxu1 }
 0x247   :  { %v1652_v30 = vpop.f32.mrf.mxu0 }
 0x248   :  { %v2046_v23 = vadd.f32 %v2045_v44, %v1652_v30 }
 0x249   :  { %v1654_v15 = vpop.f32.mrf.mxu0 }
 0x24a   :  { %v2048_v21 = vadd.f32 %v2047_v54, %v1654_v15 }
 0x281   :  { %v2389_v63 = vpop.f32.mrf.mxu1 }
 0x283   :  { %v2391_v28 = vpop.f32.mrf.mxu1 }
 0x28a   :  { %v2248_v27 = vpop.f32.mrf.mxu0 }
 0x28b   :  { %v2249_v36 = vadd.f32 %v2248_v27, %v2046_v23 }
 0x28c   :  { %v2250_v31 = vpop.f32.mrf.mxu0 }
 0x28d   :  { %v2251_v47 = vadd.f32 %v2250_v31, %v2048_v21  ;;  %v2390_v11 = vadd.f32 %v2389_v63, %v2249_v36 }
 0x28f   :  { %v2392_v33 = vadd.f32 %v2391_v28, %v2251_v47 }
 0x2c3   :  { %v2791_v29 = vpop.f32.mrf.mxu1 }
 0x2c5   :  { %v2793_v57 = vpop.f32.mrf.mxu1 }
 0x2cb   :  { %v2654_v51 = vpop.f32.mrf.mxu0 }
 0x2cc   :  { %v2655_v26 = vadd.f32 %v2654_v51, %v2390_v11 }
 0x2cd   :  { %v2656_v17 = vpop.f32.mrf.mxu0 }
 0x2ce   :  { %v2792_v53 = vadd.f32 %v2791_v29, %v2655_v26  ;;  %v2657_v20 = vadd.f32 %v2656_v17, %v2392_v33 }
 0x2d0   :  { %2798 = vst [vmem:[#allocation7 + $0x10] sm:$0xff] %v2792_v53  ;;  %v2794_v25 = vadd.f32 %v2793_v57, %v2657_v20 }
 0x2d2   :  { %2799 = vst [vmem:[#allocation7 + $0x18] sm:$0xff] %v2794_v25 }
 0x2d3   :  { %2892 = shalt.err (!%p2889_p0)
}
 0x2d4   :  { %2809 = dma.vmem_to_hbm [thread:$0]  %s2807_s1, 512, %s5137_s2, [#allocation4]  }
 0x2d5   :  { %2905 = dma.done.wait [#allocation4], 512  }
 0x2d6   :  { %2906 = vsyncadd [#allocation4], 4294966784 }
 0x2d7   :  { %2813 = vsyncpa [#allocation3], 1 }
 0x2d8   :  { %2814 = vsyncpa [#allocation6], 1 }
 0x2d9   :  { %2815 = vsyncpa [#allocation4], 1 }

</bundles_post_ra>
